<compile_context>
chip_gen: v6e
topology: v6e:2x2x1
jax: 0.10.0
libtpu: 0.0.40
codegen_flags: <defaults>
</compile_context>

<pallas_src>
import functools

import jax
import jax.numpy as jnp
from jax import lax
from jax.experimental import pallas as pl
from jax.experimental.pallas import tpu as pltpu


# ----------------------------------------------------------------------------
# small helpers
# ----------------------------------------------------------------------------
def _round8(n):
    return -(-n // 8) * 8


def _offsets(row_counts):
    """Row offsets of packed sections (each section padded to 8 rows)."""
    offs, r = [], 0
    for n in row_counts:
        offs.append(r)
        r += _round8(n)
    return tuple(offs), r


def _tree_reduce(op, vals):
    """Log-depth reduction of a static list of values."""
    vals = list(vals)
    while len(vals) > 1:
        nxt = [op(vals[i], vals[i + 1]) for i in range(0, len(vals) - 1, 2)]
        if len(vals) % 2:
            nxt.append(vals[-1])
        vals = nxt
    return vals[0]


# ----------------------------------------------------------------------------
# Fused T_DAN kernel
# ----------------------------------------------------------------------------
def _t_dan_kernel(x_ref, wa_ref, wb_ref, st_ref, ctx_ref, in2_sc, *,
                  t_tar, t_text, t_max, batch, hidden, emb_dim,
                  offs_a, offs_b):
    H, B, E = hidden, batch, emb_dim
    f32 = jnp.float32
    GA = 4 * H          # per-gate block width, stage A (4 fused directions)
    G2 = 2 * H          # per-gate block width, stage B (2 fused directions)

    # ---- packed weights / biases: static slices of the two VMEM slabs -------
    oAF, oATB, oAXB, oHHA, oBA = offs_a
    oU, oV, oHH2, oB2 = offs_b
    wAF = wa_ref[oAF:oAF + 2 * E, :]          # (2E, 16H) fwd (tarF+txtF) in-proj
    wATB = wa_ref[oATB:oATB + 2 * E, :]       # (2E, 16H) tarB in-proj
    wAXB = wa_ref[oAXB:oAXB + 2 * E, :]       # (2E, 16H) txtB in-proj
    whhA = wa_ref[oHHA:oHHA + 4 * H, :]       # (4H, 16H) block-diag recurrent
    bA = wa_ref[oBA:oBA + 1, :]               # (1, 16H)
    wU = wb_ref[oU:oU + 2 * H + E, :]         # (2H+E, 8H)
    wV = wb_ref[oV:oV + 2 * H + E, :]         # (2H+E, 8H)
    whh2 = wb_ref[oHH2:oHH2 + 2 * H, :]       # (2H, 8H) block-diag recurrent
    b2 = wb_ref[oB2:oB2 + 1, :]               # (1, 8H)

    # ---- hoisted gate-activation constants (built once, reused 22x) ---------
    # gate layout is gate-major: [ i | f | g | o ], each block GA / G2 wide.
    # sigmoid is computed as 0.5*tanh(x/2)+0.5; the 0.5 input scale was folded
    # into the i/f/o weight columns offline, so in-kernel: a = tanh(g)*sc + off.
    def act_consts(width, gblk):
        lane = lax.broadcasted_iota(jnp.int32, (B, width), 1)
        is_g = jnp.logical_and(lane >= 2 * gblk, lane < 3 * gblk)
        return (jnp.where(is_g, 1.0, 0.5).astype(f32),
                jnp.where(is_g, 0.0, 0.5).astype(f32))

    scA, offA = act_consts(16 * H, GA)
    sc2, off2 = act_consts(8 * H, G2)

    # ---- hoisted stage-A input projections (time-major rows) ----------------
    # MXU precision: kept f32 operands (explicit decision; bf16 pre-cast would
    # be faster but compounds rounding across the recurrence).
    xc = x_ref[...]                                        # (T_max*B, 2E)
    xgF = jnp.dot(xc, wAF, preferred_element_type=f32) + bA
    xgTB = jnp.dot(xc, wATB, preferred_element_type=f32)
    xgXB = jnp.dot(xc, wAXB, preferred_element_type=f32)

    # x columns of the layer-2 input slab (written once, 16 lanes)
    in2_sc[:, 2 * H:2 * H + E] = xc[0:t_text * B, E:2 * E]

    # ---- stage A: target BiLSTM + text layer-1 BiLSTM, 4 directions fused ---
    # state layout: [tarF | tarB | txtF | txtB], each H wide -> (B, 4H).
    st = st_ref[...]
    hA = st[0:B, :]
    cA = st[B:2 * B, :]
    h_tar_fin = hA[:, 0:2 * H]
    h1_fin = hA[:, 2 * H:4 * H]
    c1_fin = cA[:, 2 * H:4 * H]
    for s in range(t_max):                                 # static, fully unrolled
        rf = s * B
        gx = xgF[rf:rf + B, :]
        if s < t_tar:
            rb = (t_tar - 1 - s) * B
            gx = gx + xgTB[rb:rb + B, :]
        if s < t_text:
            rb = (t_text - 1 - s) * B
            gx = gx + xgXB[rb:rb + B, :]
        gates = gx + jnp.dot(hA, whhA, preferred_element_type=f32)
        a = jnp.tanh(gates) * scA + offA
        i, f = a[:, 0:GA], a[:, GA:2 * GA]
        g, o = a[:, 2 * GA:3 * GA], a[:, 3 * GA:4 * GA]
        cA = f * cA + i * g
        hA = o * jnp.tanh(cA)
        if s == t_tar - 1:                                 # target final [fwd|bwd]
            h_tar_fin = hA[:, 0:2 * H]
        if s < t_text:                                     # one 64-lane row / step
            in2_sc[rf:rf + B, 0:2 * H] = hA[:, 2 * H:4 * H]
        if s == t_text - 1:                                # layer-1 final states
            h1_fin = hA[:, 2 * H:4 * H]
            c1_fin = cA[:, 2 * H:4 * H]

    # ---- stage B: text layer-2 BiLSTM (input = [out1 | x]), 2 dirs fused ----
    # U[row s] + V[row T-1-s]  ==  fwd gates(time s) + bwd gates(time T-1-s);
    # the time-reversal of out1's bwd half is absorbed into wU / wV offline.
    in2 = in2_sc[...]                                      # (T_text*B, 2H+E)
    U = jnp.dot(in2, wU, preferred_element_type=f32) + b2
    V = jnp.dot(in2, wV, preferred_element_type=f32)
    h2, c2 = h1_fin, c1_fin
    z2 = [None] * t_text
    for s in range(t_text):
        rf = s * B
        rb = (t_text - 1 - s) * B
        gates = U[rf:rf + B, :] + V[rb:rb + B, :] + jnp.dot(
            h2, whh2, preferred_element_type=f32)
        a = jnp.tanh(gates) * sc2 + off2
        i, f = a[:, 0:G2], a[:, G2:2 * G2]
        g, o = a[:, 2 * G2:3 * G2], a[:, 3 * G2:4 * G2]
        c2 = f * c2 + i * g
        h2 = o * jnp.tanh(c2)
        z2[s] = h2                                         # [fwd_s | bwd_{T-1-s}]

    # ---- attention over the T_text layer-2 outputs ---------------------------
    # TODO(synk): Attention class source was not provided; standard scaled
    # dot-product attention (softmax over time of q . out2_t) is assumed,
    # as in the prior reviewed version.
    scale = 1.0 / float(2 * H) ** 0.5
    qf = h_tar_fin[:, H:2 * H] * h2[:, H:2 * H] * scale    # pairs with fwd outputs
    qb = h_tar_fin[:, 0:H] * h2[:, 0:H] * scale            # pairs with bwd outputs
    es = [jnp.sum(z2[t][:, 0:H] * qf + z2[t_text - 1 - t][:, H:2 * H] * qb,
                  axis=1, keepdims=True) for t in range(t_text)]
    m = _tree_reduce(jnp.maximum, es)
    ps = [jnp.exp(e - m) for e in es]
    inv = pl.reciprocal(_tree_reduce(lambda x, y: x + y, ps), approx=True)
    wgt = [p * inv for p in ps]
    ctx_f = _tree_reduce(lambda x, y: x + y,
                         [wgt[t] * z2[t][:, 0:H] for t in range(t_text)])
    ctx_b = _tree_reduce(lambda x, y: x + y,
                         [wgt[t] * z2[t_text - 1 - t][:, H:2 * H]
                          for t in range(t_text)])
    ctx_ref[:, 0:H] = ctx_f
    ctx_ref[:, H:2 * H] = ctx_b


def t_dan_kernel_call(kp, x_comb, state0, *, t_tar, t_text, t_max, batch,
                      hidden, emb_dim):
    vmem = pl.BlockSpec(memory_space=pltpu.MemorySpace.VMEM)
    offs_a, _ = _offsets([2 * emb_dim, 2 * emb_dim, 2 * emb_dim, 4 * hidden, 1])
    offs_b, _ = _offsets([2 * hidden + emb_dim, 2 * hidden + emb_dim,
                          2 * hidden, 1])
    kernel = functools.partial(
        _t_dan_kernel, t_tar=t_tar, t_text=t_text, t_max=t_max, batch=batch,
        hidden=hidden, emb_dim=emb_dim, offs_a=offs_a, offs_b=offs_b)
    return pl.pallas_call(
        kernel,
        out_shape=jax.ShapeDtypeStruct((batch, 2 * hidden), jnp.float32),
        in_specs=[vmem] * 4,
        out_specs=vmem,
        scratch_shapes=[pltpu.VMEM((t_text * batch, 2 * hidden + emb_dim),
                                   jnp.float32)],
    )(x_comb, kp['wa'], kp['wb'], state0)


# ----------------------------------------------------------------------------
# Parameters: PyTorch-style init, then a ONE-TIME re-layout for the kernel
# ----------------------------------------------------------------------------
def init_params(key, vocab, emb_dim, hidden):
    ks = jax.random.split(key, 10)

    def uni(k, shape, s):
        return jax.random.uniform(k, shape, jnp.float32, -s, s)

    def lstm_dir(k, in_dim):
        k1, k2, k3, k4 = jax.random.split(k, 4)
        s = 1.0 / hidden ** 0.5
        return dict(w_ih=uni(k1, (4 * hidden, in_dim), s),
                    w_hh=uni(k2, (4 * hidden, hidden), s),
                    b=uni(k3, (4 * hidden,), s) + uni(k4, (4 * hidden,), s))

    return dict(
        emb_tar=jax.random.normal(ks[0], (vocab, emb_dim), jnp.float32),
        emb_text=jax.random.normal(ks[1], (vocab, emb_dim), jnp.float32),
        tar_lstm=dict(fwd=lstm_dir(ks[2], emb_dim), bwd=lstm_dir(ks[3], emb_dim)),
        text_lstm1=dict(fwd=lstm_dir(ks[4], emb_dim), bwd=lstm_dir(ks[5], emb_dim)),
        text_lstm2=dict(fwd=lstm_dir(ks[6], 2 * hidden + emb_dim),
                        bwd=lstm_dir(ks[7], 2 * hidden + emb_dim)),
        fc_w=uni(ks[8], (3, 2 * hidden), 1.0 / (2 * hidden) ** 0.5),
        fc_b=uni(ks[9], (3,), 1.0 / (2 * hidden) ** 0.5),
    )


def prepare_kernel_params(params, hidden):
    """One-time re-layout of PyTorch weights into two packed kernel slabs:
    gate-major/direction-minor columns, block-diagonal recurrences, and the
    0.5 sigmoid-as-tanh input scale folded into the i/f/o columns."""
    H = hidden
    ifo = jnp.concatenate([jnp.full((H,), 0.5), jnp.full((H,), 0.5),
                           jnp.ones((H,)), jnp.full((H,), 0.5)]).astype(jnp.float32)

    def prep_dir(d):
        return (d['w_ih'].T * ifo[None, :],      # (IN, 4H)
                d['w_hh'].T * ifo[None, :],      # (H, 4H)
                d['b'] * ifo)                    # (4H,)

    def place(block, d, n_dirs):
        # (R, 4H) [i|f|g|o] -> (R, 4H*n_dirs) gate-major, direction slot d
        R = block.shape[0]
        cols = []
        for k in range(4):
            for dd in range(n_dirs):
                cols.append(block[:, k * H:(k + 1) * H] if dd == d
                            else jnp.zeros((R, H), jnp.float32))
        return jnp.concatenate(cols, axis=1)

    def pack(sections, width):
        parts = []
        for sarr in sections:
            pad = _round8(sarr.shape[0]) - sarr.shape[0]
            if pad:
                sarr = jnp.concatenate(
                    [sarr, jnp.zeros((pad, width), jnp.float32)], axis=0)
            parts.append(sarr)
        return jnp.concatenate(parts, axis=0)

    # stage A: direction order [tarF, tarB, txtF, txtB]
    tFw, tFh, tFb = prep_dir(params['tar_lstm']['fwd'])
    tBw, tBh, tBb = prep_dir(params['tar_lstm']['bwd'])
    xFw, xFh, xFb = prep_dir(params['text_lstm1']['fwd'])
    xBw, xBh, xBb = prep_dir(params['text_lstm1']['bwd'])
    E = tFw.shape[0]
    zE = jnp.zeros((E, 16 * H), jnp.float32)
    wAF = jnp.concatenate([place(tFw, 0, 4), place(xFw, 2, 4)], axis=0)
    wATB = jnp.concatenate([place(tBw, 1, 4), zE], axis=0)
    wAXB = jnp.concatenate([zE, place(xBw, 3, 4)], axis=0)
    whhA = jnp.concatenate([place(tFh, 0, 4), place(tBh, 1, 4),
                            place(xFh, 2, 4), place(xBh, 3, 4)], axis=0)
    bA = (place(tFb[None, :], 0, 4) + place(tBb[None, :], 1, 4)
          + place(xFb[None, :], 2, 4) + place(xBb[None, :], 3, 4))

    # stage B (layer 2): input feature order [out1_fwd | out1_bwd | x]
    Fw, Fh, Fb = prep_dir(params['text_lstm2']['fwd'])
    Bw, Bh, Bb = prep_dir(params['text_lstm2']['bwd'])
    Fp, Bp = place(Fw, 0, 2), place(Bw, 1, 2)            # (2H+E, 8H)
    # U reads [o1f@t | o1b@(T-1-t) | x@t]; V is the mirrored partner, so that
    # U[t] + V[T-1-t] equals fwd-gates(t) + bwd-gates(T-1-t) exactly.
    wU = jnp.concatenate([Fp[0:H], Bp[H:2 * H], Fp[2 * H:]], axis=0)
    wV = jnp.concatenate([Bp[0:H], Fp[H:2 * H], Bp[2 * H:]], axis=0)
    whh2 = jnp.concatenate([place(Fh, 0, 2), place(Bh, 1, 2)], axis=0)
    b2 = place(Fb[None, :], 0, 2) + place(Bb[None, :], 1, 2)

    kp = dict(
        wa=pack([wAF, wATB, wAXB, whhA, bA], 16 * H),
        wb=pack([wU, wV, whh2, b2], 8 * H),
        fc_wT=params['fc_w'].T,
        fc_b=params['fc_b'],
        emb_tar=params['emb_tar'],
        emb_text=params['emb_text'],
    )
    return jax.tree_util.tree_map(jnp.asarray, kp)


# ----------------------------------------------------------------------------
# T_DAN forward
# ----------------------------------------------------------------------------
@functools.partial(jax.jit, static_argnames=('hidden',))
def t_dan_forward(kparams, inputs, key, hidden):
    text_ids = inputs[0]      # (B, T_text) -> DC_BiLSTM text branch
    target_ids = inputs[2]    # (B, T_tar)  -> BiLSTM target branch
    B, T_text = text_ids.shape
    T_tar = target_ids.shape[1]
    T_max = max(T_text, T_tar)
    E = kparams['emb_tar'].shape[1]
    k1, k2, k3, k4 = jax.random.split(key, 4)

    # torch.randn h0/c0 per forward call (index 0 = fwd, 1 = bwd)
    h0_tar = jax.random.normal(k1, (2, B, hidden), jnp.float32)
    c0_tar = jax.random.normal(k2, (2, B, hidden), jnp.float32)
    h0_text = jax.random.normal(k3, (2, B, hidden), jnp.float32)
    c0_text = jax.random.normal(k4, (2, B, hidden), jnp.float32)

    # embedding gathers + seq-first flatten stay in XLA; the two branches are
    # packed side by side so the kernel receives ONE activation slab.
    x_tar = kparams['emb_tar'][target_ids.T].reshape(T_tar * B, E)
    x_text = kparams['emb_text'][text_ids.T].reshape(T_text * B, E)

    def pad_rows(x, t):
        return jnp.pad(x, ((0, (T_max - t) * B), (0, 0)))

    x_comb = jnp.concatenate([pad_rows(x_tar, T_tar), pad_rows(x_text, T_text)],
                             axis=1)                       # (T_max*B, 2E)

    # fused initial state [tarF | tarB | txtF | txtB]; rows = [h ; c]
    hA0 = jnp.concatenate([h0_tar[0], h0_tar[1], h0_text[0], h0_text[1]], axis=1)
    cA0 = jnp.concatenate([c0_tar[0], c0_tar[1], c0_text[0], c0_text[1]], axis=1)
    state0 = jnp.concatenate([hA0, cA0], axis=0)           # (2B, 4H)

    ctx = t_dan_kernel_call(kparams, x_comb, state0, t_tar=T_tar, t_text=T_text,
                            t_max=T_max, batch=B, hidden=hidden, emb_dim=E)

    # nn.Dropout is identity in eval mode; the final Linear(2H -> 3) stays in
    # XLA so the kernel never emits a 3-lane-wide masked store / wasted MXU op.
    return ctx @ kparams['fc_wT'] + kparams['fc_b']


if __name__ == "__main__":
    key = jax.random.PRNGKey(0)
    vocab, emb_dim, hidden = 50, 16, 32
    B, T_text, T_tar = 2, 8, 6

    kp_, kd, ki1, ki2, ki3 = jax.random.split(key, 5)
    params = init_params(kp_, vocab, emb_dim, hidden)
    kparams = prepare_kernel_params(params, hidden)
    text_ids = jax.random.randint(ki1, (B, T_text), 0, vocab)
    aspect_ids = jax.random.randint(ki2, (B, T_text), 0, vocab)  # input[1], unused
    target_ids = jax.random.randint(ki3, (B, T_tar), 0, vocab)

    out = t_dan_forward(kparams, (text_ids, aspect_ids, target_ids), kd, hidden)
    out = jax.block_until_ready(out)
    assert out.shape == (B, 3) and out.dtype == jnp.float32
    print("KERNEL_OK")
</pallas_src>

<mosaic_0001>
module attributes {stable_mosaic.version = 11 : i64} {
  func.func @_t_dan_kernel(%arg0: memref<16x32xf32, #tpu.memory_space<vmem>>, %arg1: memref<232x512xf32, #tpu.memory_space<vmem>>, %arg2: memref<232x256xf32, #tpu.memory_space<vmem>>, %arg3: memref<4x128xf32, #tpu.memory_space<vmem>>, %arg4: memref<2x64xf32, #tpu.memory_space<vmem>>, %arg5: memref<16x80xf32, #tpu.memory_space<vmem>>) attributes {dimension_semantics = [], scalar_prefetch = 0 : i64, scratch_operands = 1 : i64, tpu.core_type = #tpu.core_type<tc>} {
    %c0 = arith.constant 0 : index
    %c0_0 = arith.constant 0 : index
    %0 = vector.load %arg1[%c0, %c0_0] : memref<232x512xf32, #tpu.memory_space<vmem>>, vector<32x512xf32>
    %c32 = arith.constant 32 : index
    %c0_1 = arith.constant 0 : index
    %1 = vector.load %arg1[%c32, %c0_1] : memref<232x512xf32, #tpu.memory_space<vmem>>, vector<32x512xf32>
    %c64 = arith.constant 64 : index
    %c0_2 = arith.constant 0 : index
    %2 = vector.load %arg1[%c64, %c0_2] : memref<232x512xf32, #tpu.memory_space<vmem>>, vector<32x512xf32>
    %c96 = arith.constant 96 : index
    %c0_3 = arith.constant 0 : index
    %3 = vector.load %arg1[%c96, %c0_3] : memref<232x512xf32, #tpu.memory_space<vmem>>, vector<128x512xf32>
    %c224 = arith.constant 224 : index
    %c0_4 = arith.constant 0 : index
    %4 = vector.load %arg1[%c224, %c0_4] : memref<232x512xf32, #tpu.memory_space<vmem>>, vector<1x512xf32>
    %c0_5 = arith.constant 0 : index
    %c0_6 = arith.constant 0 : index
    %5 = vector.load %arg2[%c0_5, %c0_6] : memref<232x256xf32, #tpu.memory_space<vmem>>, vector<80x256xf32>
    %c80 = arith.constant 80 : index
    %c0_7 = arith.constant 0 : index
    %6 = vector.load %arg2[%c80, %c0_7] : memref<232x256xf32, #tpu.memory_space<vmem>>, vector<80x256xf32>
    %c160 = arith.constant 160 : index
    %c0_8 = arith.constant 0 : index
    %7 = vector.load %arg2[%c160, %c0_8] : memref<232x256xf32, #tpu.memory_space<vmem>>, vector<64x256xf32>
    %c224_9 = arith.constant 224 : index
    %c0_10 = arith.constant 0 : index
    %8 = vector.load %arg2[%c224_9, %c0_10] : memref<232x256xf32, #tpu.memory_space<vmem>>, vector<1x256xf32>
    %9 = tpu.iota {dimensions = array<i32: 1>} : vector<2x512xi32>
    %c256_i32 = arith.constant 256 : i32
    %10 = vector.broadcast %c256_i32 : i32 to vector<2x512xi32>
    %11 = arith.cmpi sge, %9, %10 : vector<2x512xi32>
    %c384_i32 = arith.constant 384 : i32
    %12 = vector.broadcast %c384_i32 : i32 to vector<2x512xi32>
    %13 = arith.cmpi slt, %9, %12 : vector<2x512xi32>
    %14 = arith.andi %11, %13 : vector<2x512xi1>
    %cst = arith.constant 1.000000e+00 : f32
    %cst_11 = arith.constant 5.000000e-01 : f32
    %15 = vector.broadcast %cst : f32 to vector<2x512xf32>
    %16 = vector.broadcast %cst_11 : f32 to vector<2x512xf32>
    %17 = arith.select %14, %15, %16 : vector<2x512xi1>, vector<2x512xf32>
    %cst_12 = arith.constant 0.000000e+00 : f32
    %cst_13 = arith.constant 5.000000e-01 : f32
    %18 = vector.broadcast %cst_12 : f32 to vector<2x512xf32>
    %19 = vector.broadcast %cst_13 : f32 to vector<2x512xf32>
    %20 = arith.select %14, %18, %19 : vector<2x512xi1>, vector<2x512xf32>
    %21 = tpu.iota {dimensions = array<i32: 1>} : vector<2x256xi32>
    %c128_i32 = arith.constant 128 : i32
    %22 = vector.broadcast %c128_i32 : i32 to vector<2x256xi32>
    %23 = arith.cmpi sge, %21, %22 : vector<2x256xi32>
    %c192_i32 = arith.constant 192 : i32
    %24 = vector.broadcast %c192_i32 : i32 to vector<2x256xi32>
    %25 = arith.cmpi slt, %21, %24 : vector<2x256xi32>
    %26 = arith.andi %23, %25 : vector<2x256xi1>
    %cst_14 = arith.constant 1.000000e+00 : f32
    %cst_15 = arith.constant 5.000000e-01 : f32
    %27 = vector.broadcast %cst_14 : f32 to vector<2x256xf32>
    %28 = vector.broadcast %cst_15 : f32 to vector<2x256xf32>
    %29 = arith.select %26, %27, %28 : vector<2x256xi1>, vector<2x256xf32>
    %cst_16 = arith.constant 0.000000e+00 : f32
    %cst_17 = arith.constant 5.000000e-01 : f32
    %30 = vector.broadcast %cst_16 : f32 to vector<2x256xf32>
    %31 = vector.broadcast %cst_17 : f32 to vector<2x256xf32>
    %32 = arith.select %26, %30, %31 : vector<2x256xi1>, vector<2x256xf32>
    %c0_18 = arith.constant 0 : index
    %c0_19 = arith.constant 0 : index
    %33 = vector.load %arg0[%c0_18, %c0_19] : memref<16x32xf32, #tpu.memory_space<vmem>>, vector<16x32xf32>
    %cst_20 = arith.constant dense<0.000000e+00> : vector<16x512xf32>
    %34 = tpu.matmul %33, %0, %cst_20 {dimension_numbers = #tpu.dot_dimension_numbers<[1], [0], [0], [1], [0, 0, 1, 1], [], []>} : vector<16x32xf32>, vector<32x512xf32>, vector<16x512xf32> -> vector<16x512xf32>
    %35 = vector.broadcast %4 : vector<1x512xf32> to vector<16x512xf32>
    %36 = arith.addf %34, %35 : vector<16x512xf32>
    %cst_21 = arith.constant dense<0.000000e+00> : vector<16x512xf32>
    %37 = tpu.matmul %33, %1, %cst_21 {dimension_numbers = #tpu.dot_dimension_numbers<[1], [0], [0], [1], [0, 0, 1, 1], [], []>} : vector<16x32xf32>, vector<32x512xf32>, vector<16x512xf32> -> vector<16x512xf32>
    %cst_22 = arith.constant dense<0.000000e+00> : vector<16x512xf32>
    %38 = tpu.matmul %33, %2, %cst_22 {dimension_numbers = #tpu.dot_dimension_numbers<[1], [0], [0], [1], [0, 0, 1, 1], [], []>} : vector<16x32xf32>, vector<32x512xf32>, vector<16x512xf32> -> vector<16x512xf32>
    %39 = vector.extract_strided_slice %33 {offsets = [0, 16], sizes = [16, 16], strides = [1, 1]} : vector<16x32xf32> to vector<16x16xf32>
    %c0_23 = arith.constant 0 : index
    %c64_24 = arith.constant 64 : index
    %40 = vector.load %arg5[%c0_23, %c64_24] : memref<16x80xf32, #tpu.memory_space<vmem>>, vector<16x16xf32>
    tpu.vector_store %arg5[%c0_23, %c64_24], %39 {strides = array<i32>} : memref<16x80xf32, #tpu.memory_space<vmem>>, vector<16x16xf32>,
    %c0_25 = arith.constant 0 : index
    %c0_26 = arith.constant 0 : index
    %41 = vector.load %arg3[%c0_25, %c0_26] : memref<4x128xf32, #tpu.memory_space<vmem>>, vector<4x128xf32>
    %42 = vector.extract_strided_slice %41 {offsets = [0, 0], sizes = [2, 128], strides = [1, 1]} : vector<4x128xf32> to vector<2x128xf32>
    %43 = vector.extract_strided_slice %41 {offsets = [2, 0], sizes = [2, 128], strides = [1, 1]} : vector<4x128xf32> to vector<2x128xf32>
    %44 = vector.extract_strided_slice %36 {offsets = [0, 0], sizes = [2, 512], strides = [1, 1]} : vector<16x512xf32> to vector<2x512xf32>
    %45 = vector.extract_strided_slice %37 {offsets = [10, 0], sizes = [2, 512], strides = [1, 1]} : vector<16x512xf32> to vector<2x512xf32>
    %46 = arith.addf %44, %45 : vector<2x512xf32>
    %47 = vector.extract_strided_slice %38 {offsets = [14, 0], sizes = [2, 512], strides = [1, 1]} : vector<16x512xf32> to vector<2x512xf32>
    %48 = arith.addf %46, %47 : vector<2x512xf32>
    %cst_27 = arith.constant dense<0.000000e+00> : vector<2x512xf32>
    %49 = tpu.matmul %42, %3, %cst_27 {dimension_numbers = #tpu.dot_dimension_numbers<[1], [0], [0], [1], [0, 0, 1, 1], [], []>} : vector<2x128xf32>, vector<128x512xf32>, vector<2x512xf32> -> vector<2x512xf32>
    %50 = arith.addf %48, %49 : vector<2x512xf32>
    %51 = math.tanh %50 : vector<2x512xf32>
    %52 = arith.mulf %51, %17 : vector<2x512xf32>
    %53 = arith.addf %52, %20 : vector<2x512xf32>
    %54 = vector.extract_strided_slice %53 {offsets = [0, 0], sizes = [2, 128], strides = [1, 1]} : vector<2x512xf32> to vector<2x128xf32>
    %55 = vector.extract_strided_slice %53 {offsets = [0, 128], sizes = [2, 128], strides = [1, 1]} : vector<2x512xf32> to vector<2x128xf32>
    %56 = vector.extract_strided_slice %53 {offsets = [0, 256], sizes = [2, 128], strides = [1, 1]} : vector<2x512xf32> to vector<2x128xf32>
    %57 = vector.extract_strided_slice %53 {offsets = [0, 384], sizes = [2, 128], strides = [1, 1]} : vector<2x512xf32> to vector<2x128xf32>
    %58 = arith.mulf %55, %43 : vector<2x128xf32>
    %59 = arith.mulf %54, %56 : vector<2x128xf32>
    %60 = arith.addf %58, %59 : vector<2x128xf32>
    %61 = math.tanh %60 : vector<2x128xf32>
    %62 = arith.mulf %57, %61 : vector<2x128xf32>
    %63 = vector.extract_strided_slice %62 {offsets = [0, 64], sizes = [2, 64], strides = [1, 1]} : vector<2x128xf32> to vector<2x64xf32>
    %c0_28 = arith.constant 0 : index
    %c0_29 = arith.constant 0 : index
    %64 = vector.load %arg5[%c0_28, %c0_29] : memref<16x80xf32, #tpu.memory_space<vmem>>, vector<2x64xf32>
    tpu.vector_store %arg5[%c0_28, %c0_29], %63 {strides = array<i32>} : memref<16x80xf32, #tpu.memory_space<vmem>>, vector<2x64xf32>,
    %65 = vector.extract_strided_slice %36 {offsets = [2, 0], sizes = [2, 512], strides = [1, 1]} : vector<16x512xf32> to vector<2x512xf32>
    %66 = vector.extract_strided_slice %37 {offsets = [8, 0], sizes = [2, 512], strides = [1, 1]} : vector<16x512xf32> to vector<2x512xf32>
    %67 = arith.addf %65, %66 : vector<2x512xf32>
    %68 = vector.extract_strided_slice %38 {offsets = [12, 0], sizes = [2, 512], strides = [1, 1]} : vector<16x512xf32> to vector<2x512xf32>
    %69 = arith.addf %67, %68 : vector<2x512xf32>
    %cst_30 = arith.constant dense<0.000000e+00> : vector<2x512xf32>
    %70 = tpu.matmul %62, %3, %cst_30 {dimension_numbers = #tpu.dot_dimension_numbers<[1], [0], [0], [1], [0, 0, 1, 1], [], []>} : vector<2x128xf32>, vector<128x512xf32>, vector<2x512xf32> -> vector<2x512xf32>
    %71 = arith.addf %69, %70 : vector<2x512xf32>
    %72 = math.tanh %71 : vector<2x512xf32>
    %73 = arith.mulf %72, %17 : vector<2x512xf32>
    %74 = arith.addf %73, %20 : vector<2x512xf32>
    %75 = vector.extract_strided_slice %74 {offsets = [0, 0], sizes = [2, 128], strides = [1, 1]} : vector<2x512xf32> to vector<2x128xf32>
    %76 = vector.extract_strided_slice %74 {offsets = [0, 128], sizes = [2, 128], strides = [1, 1]} : vector<2x512xf32> to vector<2x128xf32>
    %77 = vector.extract_strided_slice %74 {offsets = [0, 256], sizes = [2, 128], strides = [1, 1]} : vector<2x512xf32> to vector<2x128xf32>
    %78 = vector.extract_strided_slice %74 {offsets = [0, 384], sizes = [2, 128], strides = [1, 1]} : vector<2x512xf32> to vector<2x128xf32>
    %79 = arith.mulf %76, %60 : vector<2x128xf32>
    %80 = arith.mulf %75, %77 : vector<2x128xf32>
    %81 = arith.addf %79, %80 : vector<2x128xf32>
    %82 = math.tanh %81 : vector<2x128xf32>
    %83 = arith.mulf %78, %82 : vector<2x128xf32>
    %84 = vector.extract_strided_slice %83 {offsets = [0, 64], sizes = [2, 64], strides = [1, 1]} : vector<2x128xf32> to vector<2x64xf32>
    %c2 = arith.constant 2 : index
    %c0_31 = arith.constant 0 : index
    %85 = vector.load %arg5[%c2, %c0_31] : memref<16x80xf32, #tpu.memory_space<vmem>>, vector<2x64xf32>
    tpu.vector_store %arg5[%c2, %c0_31], %84 {strides = array<i32>} : memref<16x80xf32, #tpu.memory_space<vmem>>, vector<2x64xf32>,
    %86 = vector.extract_strided_slice %36 {offsets = [4, 0], sizes = [2, 512], strides = [1, 1]} : vector<16x512xf32> to vector<2x512xf32>
    %87 = vector.extract_strided_slice %37 {offsets = [6, 0], sizes = [2, 512], strides = [1, 1]} : vector<16x512xf32> to vector<2x512xf32>
    %88 = arith.addf %86, %87 : vector<2x512xf32>
    %89 = vector.extract_strided_slice %38 {offsets = [10, 0], sizes = [2, 512], strides = [1, 1]} : vector<16x512xf32> to vector<2x512xf32>
    %90 = arith.addf %88, %89 : vector<2x512xf32>
    %cst_32 = arith.constant dense<0.000000e+00> : vector<2x512xf32>
    %91 = tpu.matmul %83, %3, %cst_32 {dimension_numbers = #tpu.dot_dimension_numbers<[1], [0], [0], [1], [0, 0, 1, 1], [], []>} : vector<2x128xf32>, vector<128x512xf32>, vector<2x512xf32> -> vector<2x512xf32>
    %92 = arith.addf %90, %91 : vector<2x512xf32>
    %93 = math.tanh %92 : vector<2x512xf32>
    %94 = arith.mulf %93, %17 : vector<2x512xf32>
    %95 = arith.addf %94, %20 : vector<2x512xf32>
    %96 = vector.extract_strided_slice %95 {offsets = [0, 0], sizes = [2, 128], strides = [1, 1]} : vector<2x512xf32> to vector<2x128xf32>
    %97 = vector.extract_strided_slice %95 {offsets = [0, 128], sizes = [2, 128], strides = [1, 1]} : vector<2x512xf32> to vector<2x128xf32>
    %98 = vector.extract_strided_slice %95 {offsets = [0, 256], sizes = [2, 128], strides = [1, 1]} : vector<2x512xf32> to vector<2x128xf32>
    %99 = vector.extract_strided_slice %95 {offsets = [0, 384], sizes = [2, 128], strides = [1, 1]} : vector<2x512xf32> to vector<2x128xf32>
    %100 = arith.mulf %97, %81 : vector<2x128xf32>
    %101 = arith.mulf %96, %98 : vector<2x128xf32>
    %102 = arith.addf %100, %101 : vector<2x128xf32>
    %103 = math.tanh %102 : vector<2x128xf32>
    %104 = arith.mulf %99, %103 : vector<2x128xf32>
    %105 = vector.extract_strided_slice %104 {offsets = [0, 64], sizes = [2, 64], strides = [1, 1]} : vector<2x128xf32> to vector<2x64xf32>
    %c4 = arith.constant 4 : index
    %c0_33 = arith.constant 0 : index
    %106 = vector.load %arg5[%c4, %c0_33] : memref<16x80xf32, #tpu.memory_space<vmem>>, vector<2x64xf32>
    tpu.vector_store %arg5[%c4, %c0_33], %105 {strides = array<i32>} : memref<16x80xf32, #tpu.memory_space<vmem>>, vector<2x64xf32>,
    %107 = vector.extract_strided_slice %36 {offsets = [6, 0], sizes = [2, 512], strides = [1, 1]} : vector<16x512xf32> to vector<2x512xf32>
    %108 = vector.extract_strided_slice %37 {offsets = [4, 0], sizes = [2, 512], strides = [1, 1]} : vector<16x512xf32> to vector<2x512xf32>
    %109 = arith.addf %107, %108 : vector<2x512xf32>
    %110 = vector.extract_strided_slice %38 {offsets = [8, 0], sizes = [2, 512], strides = [1, 1]} : vector<16x512xf32> to vector<2x512xf32>
    %111 = arith.addf %109, %110 : vector<2x512xf32>
    %cst_34 = arith.constant dense<0.000000e+00> : vector<2x512xf32>
    %112 = tpu.matmul %104, %3, %cst_34 {dimension_numbers = #tpu.dot_dimension_numbers<[1], [0], [0], [1], [0, 0, 1, 1], [], []>} : vector<2x128xf32>, vector<128x512xf32>, vector<2x512xf32> -> vector<2x512xf32>
    %113 = arith.addf %111, %112 : vector<2x512xf32>
    %114 = math.tanh %113 : vector<2x512xf32>
    %115 = arith.mulf %114, %17 : vector<2x512xf32>
    %116 = arith.addf %115, %20 : vector<2x512xf32>
    %117 = vector.extract_strided_slice %116 {offsets = [0, 0], sizes = [2, 128], strides = [1, 1]} : vector<2x512xf32> to vector<2x128xf32>
    %118 = vector.extract_strided_slice %116 {offsets = [0, 128], sizes = [2, 128], strides = [1, 1]} : vector<2x512xf32> to vector<2x128xf32>
    %119 = vector.extract_strided_slice %116 {offsets = [0, 256], sizes = [2, 128], strides = [1, 1]} : vector<2x512xf32> to vector<2x128xf32>
    %120 = vector.extract_strided_slice %116 {offsets = [0, 384], sizes = [2, 128], strides = [1, 1]} : vector<2x512xf32> to vector<2x128xf32>
    %121 = arith.mulf %118, %102 : vector<2x128xf32>
    %122 = arith.mulf %117, %119 : vector<2x128xf32>
    %123 = arith.addf %121, %122 : vector<2x128xf32>
    %124 = math.tanh %123 : vector<2x128xf32>
    %125 = arith.mulf %120, %124 : vector<2x128xf32>
    %126 = vector.extract_strided_slice %125 {offsets = [0, 64], sizes = [2, 64], strides = [1, 1]} : vector<2x128xf32> to vector<2x64xf32>
    %c6 = arith.constant 6 : index
    %c0_35 = arith.constant 0 : index
    %127 = vector.load %arg5[%c6, %c0_35] : memref<16x80xf32, #tpu.memory_space<vmem>>, vector<2x64xf32>
    tpu.vector_store %arg5[%c6, %c0_35], %126 {strides = array<i32>} : memref<16x80xf32, #tpu.memory_space<vmem>>, vector<2x64xf32>,
    %128 = vector.extract_strided_slice %36 {offsets = [8, 0], sizes = [2, 512], strides = [1, 1]} : vector<16x512xf32> to vector<2x512xf32>
    %129 = vector.extract_strided_slice %37 {offsets = [2, 0], sizes = [2, 512], strides = [1, 1]} : vector<16x512xf32> to vector<2x512xf32>
    %130 = arith.addf %128, %129 : vector<2x512xf32>
    %131 = vector.extract_strided_slice %38 {offsets = [6, 0], sizes = [2, 512], strides = [1, 1]} : vector<16x512xf32> to vector<2x512xf32>
    %132 = arith.addf %130, %131 : vector<2x512xf32>
    %cst_36 = arith.constant dense<0.000000e+00> : vector<2x512xf32>
    %133 = tpu.matmul %125, %3, %cst_36 {dimension_numbers = #tpu.dot_dimension_numbers<[1], [0], [0], [1], [0, 0, 1, 1], [], []>} : vector<2x128xf32>, vector<128x512xf32>, vector<2x512xf32> -> vector<2x512xf32>
    %134 = arith.addf %132, %133 : vector<2x512xf32>
    %135 = math.tanh %134 : vector<2x512xf32>
    %136 = arith.mulf %135, %17 : vector<2x512xf32>
    %137 = arith.addf %136, %20 : vector<2x512xf32>
    %138 = vector.extract_strided_slice %137 {offsets = [0, 0], sizes = [2, 128], strides = [1, 1]} : vector<2x512xf32> to vector<2x128xf32>
    %139 = vector.extract_strided_slice %137 {offsets = [0, 128], sizes = [2, 128], strides = [1, 1]} : vector<2x512xf32> to vector<2x128xf32>
    %140 = vector.extract_strided_slice %137 {offsets = [0, 256], sizes = [2, 128], strides = [1, 1]} : vector<2x512xf32> to vector<2x128xf32>
    %141 = vector.extract_strided_slice %137 {offsets = [0, 384], sizes = [2, 128], strides = [1, 1]} : vector<2x512xf32> to vector<2x128xf32>
    %142 = arith.mulf %139, %123 : vector<2x128xf32>
    %143 = arith.mulf %138, %140 : vector<2x128xf32>
    %144 = arith.addf %142, %143 : vector<2x128xf32>
    %145 = math.tanh %144 : vector<2x128xf32>
    %146 = arith.mulf %141, %145 : vector<2x128xf32>
    %147 = vector.extract_strided_slice %146 {offsets = [0, 64], sizes = [2, 64], strides = [1, 1]} : vector<2x128xf32> to vector<2x64xf32>
    %c8 = arith.constant 8 : index
    %c0_37 = arith.constant 0 : index
    %148 = vector.load %arg5[%c8, %c0_37] : memref<16x80xf32, #tpu.memory_space<vmem>>, vector<2x64xf32>
    tpu.vector_store %arg5[%c8, %c0_37], %147 {strides = array<i32>} : memref<16x80xf32, #tpu.memory_space<vmem>>, vector<2x64xf32>,
    %149 = vector.extract_strided_slice %36 {offsets = [10, 0], sizes = [2, 512], strides = [1, 1]} : vector<16x512xf32> to vector<2x512xf32>
    %150 = vector.extract_strided_slice %37 {offsets = [0, 0], sizes = [2, 512], strides = [1, 1]} : vector<16x512xf32> to vector<2x512xf32>
    %151 = arith.addf %149, %150 : vector<2x512xf32>
    %152 = vector.extract_strided_slice %38 {offsets = [4, 0], sizes = [2, 512], strides = [1, 1]} : vector<16x512xf32> to vector<2x512xf32>
    %153 = arith.addf %151, %152 : vector<2x512xf32>
    %cst_38 = arith.constant dense<0.000000e+00> : vector<2x512xf32>
    %154 = tpu.matmul %146, %3, %cst_38 {dimension_numbers = #tpu.dot_dimension_numbers<[1], [0], [0], [1], [0, 0, 1, 1], [], []>} : vector<2x128xf32>, vector<128x512xf32>, vector<2x512xf32> -> vector<2x512xf32>
    %155 = arith.addf %153, %154 : vector<2x512xf32>
    %156 = math.tanh %155 : vector<2x512xf32>
    %157 = arith.mulf %156, %17 : vector<2x512xf32>
    %158 = arith.addf %157, %20 : vector<2x512xf32>
    %159 = vector.extract_strided_slice %158 {offsets = [0, 0], sizes = [2, 128], strides = [1, 1]} : vector<2x512xf32> to vector<2x128xf32>
    %160 = vector.extract_strided_slice %158 {offsets = [0, 128], sizes = [2, 128], strides = [1, 1]} : vector<2x512xf32> to vector<2x128xf32>
    %161 = vector.extract_strided_slice %158 {offsets = [0, 256], sizes = [2, 128], strides = [1, 1]} : vector<2x512xf32> to vector<2x128xf32>
    %162 = vector.extract_strided_slice %158 {offsets = [0, 384], sizes = [2, 128], strides = [1, 1]} : vector<2x512xf32> to vector<2x128xf32>
    %163 = arith.mulf %160, %144 : vector<2x128xf32>
    %164 = arith.mulf %159, %161 : vector<2x128xf32>
    %165 = arith.addf %163, %164 : vector<2x128xf32>
    %166 = math.tanh %165 : vector<2x128xf32>
    %167 = arith.mulf %162, %166 : vector<2x128xf32>
    %168 = vector.extract_strided_slice %167 {offsets = [0, 0], sizes = [2, 64], strides = [1, 1]} : vector<2x128xf32> to vector<2x64xf32>
    %169 = vector.extract_strided_slice %167 {offsets = [0, 64], sizes = [2, 64], strides = [1, 1]} : vector<2x128xf32> to vector<2x64xf32>
    %c10 = arith.constant 10 : index
    %c0_39 = arith.constant 0 : index
    %170 = vector.load %arg5[%c10, %c0_39] : memref<16x80xf32, #tpu.memory_space<vmem>>, vector<2x64xf32>
    tpu.vector_store %arg5[%c10, %c0_39], %169 {strides = array<i32>} : memref<16x80xf32, #tpu.memory_space<vmem>>, vector<2x64xf32>,
    %171 = vector.extract_strided_slice %36 {offsets = [12, 0], sizes = [2, 512], strides = [1, 1]} : vector<16x512xf32> to vector<2x512xf32>
    %172 = vector.extract_strided_slice %38 {offsets = [2, 0], sizes = [2, 512], strides = [1, 1]} : vector<16x512xf32> to vector<2x512xf32>
    %173 = arith.addf %171, %172 : vector<2x512xf32>
    %cst_40 = arith.constant dense<0.000000e+00> : vector<2x512xf32>
    %174 = tpu.matmul %167, %3, %cst_40 {dimension_numbers = #tpu.dot_dimension_numbers<[1], [0], [0], [1], [0, 0, 1, 1], [], []>} : vector<2x128xf32>, vector<128x512xf32>, vector<2x512xf32> -> vector<2x512xf32>
    %175 = arith.addf %173, %174 : vector<2x512xf32>
    %176 = math.tanh %175 : vector<2x512xf32>
    %177 = arith.mulf %176, %17 : vector<2x512xf32>
    %178 = arith.addf %177, %20 : vector<2x512xf32>
    %179 = vector.extract_strided_slice %178 {offsets = [0, 0], sizes = [2, 128], strides = [1, 1]} : vector<2x512xf32> to vector<2x128xf32>
    %180 = vector.extract_strided_slice %178 {offsets = [0, 128], sizes = [2, 128], strides = [1, 1]} : vector<2x512xf32> to vector<2x128xf32>
    %181 = vector.extract_strided_slice %178 {offsets = [0, 256], sizes = [2, 128], strides = [1, 1]} : vector<2x512xf32> to vector<2x128xf32>
    %182 = vector.extract_strided_slice %178 {offsets = [0, 384], sizes = [2, 128], strides = [1, 1]} : vector<2x512xf32> to vector<2x128xf32>
    %183 = arith.mulf %180, %165 : vector<2x128xf32>
    %184 = arith.mulf %179, %181 : vector<2x128xf32>
    %185 = arith.addf %183, %184 : vector<2x128xf32>
    %186 = math.tanh %185 : vector<2x128xf32>
    %187 = arith.mulf %182, %186 : vector<2x128xf32>
    %188 = vector.extract_strided_slice %187 {offsets = [0, 64], sizes = [2, 64], strides = [1, 1]} : vector<2x128xf32> to vector<2x64xf32>
    %c12 = arith.constant 12 : index
    %c0_41 = arith.constant 0 : index
    %189 = vector.load %arg5[%c12, %c0_41] : memref<16x80xf32, #tpu.memory_space<vmem>>, vector<2x64xf32>
    tpu.vector_store %arg5[%c12, %c0_41], %188 {strides = array<i32>} : memref<16x80xf32, #tpu.memory_space<vmem>>, vector<2x64xf32>,
    %190 = vector.extract_strided_slice %36 {offsets = [14, 0], sizes = [2, 512], strides = [1, 1]} : vector<16x512xf32> to vector<2x512xf32>
    %191 = vector.extract_strided_slice %38 {offsets = [0, 0], sizes = [2, 512], strides = [1, 1]} : vector<16x512xf32> to vector<2x512xf32>
    %192 = arith.addf %190, %191 : vector<2x512xf32>
    %cst_42 = arith.constant dense<0.000000e+00> : vector<2x512xf32>
    %193 = tpu.matmul %187, %3, %cst_42 {dimension_numbers = #tpu.dot_dimension_numbers<[1], [0], [0], [1], [0, 0, 1, 1], [], []>} : vector<2x128xf32>, vector<128x512xf32>, vector<2x512xf32> -> vector<2x512xf32>
    %194 = arith.addf %192, %193 : vector<2x512xf32>
    %195 = math.tanh %194 : vector<2x512xf32>
    %196 = arith.mulf %195, %17 : vector<2x512xf32>
    %197 = arith.addf %196, %20 : vector<2x512xf32>
    %198 = vector.extract_strided_slice %197 {offsets = [0, 0], sizes = [2, 128], strides = [1, 1]} : vector<2x512xf32> to vector<2x128xf32>
    %199 = vector.extract_strided_slice %197 {offsets = [0, 128], sizes = [2, 128], strides = [1, 1]} : vector<2x512xf32> to vector<2x128xf32>
    %200 = vector.extract_strided_slice %197 {offsets = [0, 256], sizes = [2, 128], strides = [1, 1]} : vector<2x512xf32> to vector<2x128xf32>
    %201 = vector.extract_strided_slice %197 {offsets = [0, 384], sizes = [2, 128], strides = [1, 1]} : vector<2x512xf32> to vector<2x128xf32>
    %202 = arith.mulf %199, %185 : vector<2x128xf32>
    %203 = arith.mulf %198, %200 : vector<2x128xf32>
    %204 = arith.addf %202, %203 : vector<2x128xf32>
    %205 = math.tanh %204 : vector<2x128xf32>
    %206 = arith.mulf %201, %205 : vector<2x128xf32>
    %207 = vector.extract_strided_slice %206 {offsets = [0, 64], sizes = [2, 64], strides = [1, 1]} : vector<2x128xf32> to vector<2x64xf32>
    %c14 = arith.constant 14 : index
    %c0_43 = arith.constant 0 : index
    %208 = vector.load %arg5[%c14, %c0_43] : memref<16x80xf32, #tpu.memory_space<vmem>>, vector<2x64xf32>
    tpu.vector_store %arg5[%c14, %c0_43], %207 {strides = array<i32>} : memref<16x80xf32, #tpu.memory_space<vmem>>, vector<2x64xf32>,
    %209 = vector.extract_strided_slice %206 {offsets = [0, 64], sizes = [2, 64], strides = [1, 1]} : vector<2x128xf32> to vector<2x64xf32>
    %210 = vector.extract_strided_slice %204 {offsets = [0, 64], sizes = [2, 64], strides = [1, 1]} : vector<2x128xf32> to vector<2x64xf32>
    %c0_44 = arith.constant 0 : index
    %c0_45 = arith.constant 0 : index
    %211 = vector.load %arg5[%c0_44, %c0_45] : memref<16x80xf32, #tpu.memory_space<vmem>>, vector<16x80xf32>
    %cst_46 = arith.constant dense<0.000000e+00> : vector<16x256xf32>
    %212 = tpu.matmul %211, %5, %cst_46 {dimension_numbers = #tpu.dot_dimension_numbers<[1], [0], [0], [1], [0, 0, 1, 1], [], []>} : vector<16x80xf32>, vector<80x256xf32>, vector<16x256xf32> -> vector<16x256xf32>
    %213 = vector.broadcast %8 : vector<1x256xf32> to vector<16x256xf32>
    %214 = arith.addf %212, %213 : vector<16x256xf32>
    %cst_47 = arith.constant dense<0.000000e+00> : vector<16x256xf32>
    %215 = tpu.matmul %211, %6, %cst_47 {dimension_numbers = #tpu.dot_dimension_numbers<[1], [0], [0], [1], [0, 0, 1, 1], [], []>} : vector<16x80xf32>, vector<80x256xf32>, vector<16x256xf32> -> vector<16x256xf32>
    %216 = vector.extract_strided_slice %214 {offsets = [0, 0], sizes = [2, 256], strides = [1, 1]} : vector<16x256xf32> to vector<2x256xf32>
    %217 = vector.extract_strided_slice %215 {offsets = [14, 0], sizes = [2, 256], strides = [1, 1]} : vector<16x256xf32> to vector<2x256xf32>
    %218 = arith.addf %216, %217 : vector<2x256xf32>
    %cst_48 = arith.constant dense<0.000000e+00> : vector<2x256xf32>
    %219 = tpu.matmul %209, %7, %cst_48 {dimension_numbers = #tpu.dot_dimension_numbers<[1], [0], [0], [1], [0, 0, 1, 1], [], []>} : vector<2x64xf32>, vector<64x256xf32>, vector<2x256xf32> -> vector<2x256xf32>
    %220 = arith.addf %218, %219 : vector<2x256xf32>
    %221 = math.tanh %220 : vector<2x256xf32>
    %222 = arith.mulf %221, %29 : vector<2x256xf32>
    %223 = arith.addf %222, %32 : vector<2x256xf32>
    %224 = vector.extract_strided_slice %223 {offsets = [0, 0], sizes = [2, 64], strides = [1, 1]} : vector<2x256xf32> to vector<2x64xf32>
    %225 = vector.extract_strided_slice %223 {offsets = [0, 64], sizes = [2, 64], strides = [1, 1]} : vector<2x256xf32> to vector<2x64xf32>
    %226 = vector.extract_strided_slice %223 {offsets = [0, 128], sizes = [2, 64], strides = [1, 1]} : vector<2x256xf32> to vector<2x64xf32>
    %227 = vector.extract_strided_slice %223 {offsets = [0, 192], sizes = [2, 64], strides = [1, 1]} : vector<2x256xf32> to vector<2x64xf32>
    %228 = arith.mulf %225, %210 : vector<2x64xf32>
    %229 = arith.mulf %224, %226 : vector<2x64xf32>
    %230 = arith.addf %228, %229 : vector<2x64xf32>
    %231 = math.tanh %230 : vector<2x64xf32>
    %232 = arith.mulf %227, %231 : vector<2x64xf32>
    %233 = vector.extract_strided_slice %214 {offsets = [2, 0], sizes = [2, 256], strides = [1, 1]} : vector<16x256xf32> to vector<2x256xf32>
    %234 = vector.extract_strided_slice %215 {offsets = [12, 0], sizes = [2, 256], strides = [1, 1]} : vector<16x256xf32> to vector<2x256xf32>
    %235 = arith.addf %233, %234 : vector<2x256xf32>
    %cst_49 = arith.constant dense<0.000000e+00> : vector<2x256xf32>
    %236 = tpu.matmul %232, %7, %cst_49 {dimension_numbers = #tpu.dot_dimension_numbers<[1], [0], [0], [1], [0, 0, 1, 1], [], []>} : vector<2x64xf32>, vector<64x256xf32>, vector<2x256xf32> -> vector<2x256xf32>
    %237 = arith.addf %235, %236 : vector<2x256xf32>
    %238 = math.tanh %237 : vector<2x256xf32>
    %239 = arith.mulf %238, %29 : vector<2x256xf32>
    %240 = arith.addf %239, %32 : vector<2x256xf32>
    %241 = vector.extract_strided_slice %240 {offsets = [0, 0], sizes = [2, 64], strides = [1, 1]} : vector<2x256xf32> to vector<2x64xf32>
    %242 = vector.extract_strided_slice %240 {offsets = [0, 64], sizes = [2, 64], strides = [1, 1]} : vector<2x256xf32> to vector<2x64xf32>
    %243 = vector.extract_strided_slice %240 {offsets = [0, 128], sizes = [2, 64], strides = [1, 1]} : vector<2x256xf32> to vector<2x64xf32>
    %244 = vector.extract_strided_slice %240 {offsets = [0, 192], sizes = [2, 64], strides = [1, 1]} : vector<2x256xf32> to vector<2x64xf32>
    %245 = arith.mulf %242, %230 : vector<2x64xf32>
    %246 = arith.mulf %241, %243 : vector<2x64xf32>
    %247 = arith.addf %245, %246 : vector<2x64xf32>
    %248 = math.tanh %247 : vector<2x64xf32>
    %249 = arith.mulf %244, %248 : vector<2x64xf32>
    %250 = vector.extract_strided_slice %214 {offsets = [4, 0], sizes = [2, 256], strides = [1, 1]} : vector<16x256xf32> to vector<2x256xf32>
    %251 = vector.extract_strided_slice %215 {offsets = [10, 0], sizes = [2, 256], strides = [1, 1]} : vector<16x256xf32> to vector<2x256xf32>
    %252 = arith.addf %250, %251 : vector<2x256xf32>
    %cst_50 = arith.constant dense<0.000000e+00> : vector<2x256xf32>
    %253 = tpu.matmul %249, %7, %cst_50 {dimension_numbers = #tpu.dot_dimension_numbers<[1], [0], [0], [1], [0, 0, 1, 1], [], []>} : vector<2x64xf32>, vector<64x256xf32>, vector<2x256xf32> -> vector<2x256xf32>
    %254 = arith.addf %252, %253 : vector<2x256xf32>
    %255 = math.tanh %254 : vector<2x256xf32>
    %256 = arith.mulf %255, %29 : vector<2x256xf32>
    %257 = arith.addf %256, %32 : vector<2x256xf32>
    %258 = vector.extract_strided_slice %257 {offsets = [0, 0], sizes = [2, 64], strides = [1, 1]} : vector<2x256xf32> to vector<2x64xf32>
    %259 = vector.extract_strided_slice %257 {offsets = [0, 64], sizes = [2, 64], strides = [1, 1]} : vector<2x256xf32> to vector<2x64xf32>
    %260 = vector.extract_strided_slice %257 {offsets = [0, 128], sizes = [2, 64], strides = [1, 1]} : vector<2x256xf32> to vector<2x64xf32>
    %261 = vector.extract_strided_slice %257 {offsets = [0, 192], sizes = [2, 64], strides = [1, 1]} : vector<2x256xf32> to vector<2x64xf32>
    %262 = arith.mulf %259, %247 : vector<2x64xf32>
    %263 = arith.mulf %258, %260 : vector<2x64xf32>
    %264 = arith.addf %262, %263 : vector<2x64xf32>
    %265 = math.tanh %264 : vector<2x64xf32>
    %266 = arith.mulf %261, %265 : vector<2x64xf32>
    %267 = vector.extract_strided_slice %214 {offsets = [6, 0], sizes = [2, 256], strides = [1, 1]} : vector<16x256xf32> to vector<2x256xf32>
    %268 = vector.extract_strided_slice %215 {offsets = [8, 0], sizes = [2, 256], strides = [1, 1]} : vector<16x256xf32> to vector<2x256xf32>
    %269 = arith.addf %267, %268 : vector<2x256xf32>
    %cst_51 = arith.constant dense<0.000000e+00> : vector<2x256xf32>
    %270 = tpu.matmul %266, %7, %cst_51 {dimension_numbers = #tpu.dot_dimension_numbers<[1], [0], [0], [1], [0, 0, 1, 1], [], []>} : vector<2x64xf32>, vector<64x256xf32>, vector<2x256xf32> -> vector<2x256xf32>
    %271 = arith.addf %269, %270 : vector<2x256xf32>
    %272 = math.tanh %271 : vector<2x256xf32>
    %273 = arith.mulf %272, %29 : vector<2x256xf32>
    %274 = arith.addf %273, %32 : vector<2x256xf32>
    %275 = vector.extract_strided_slice %274 {offsets = [0, 0], sizes = [2, 64], strides = [1, 1]} : vector<2x256xf32> to vector<2x64xf32>
    %276 = vector.extract_strided_slice %274 {offsets = [0, 64], sizes = [2, 64], strides = [1, 1]} : vector<2x256xf32> to vector<2x64xf32>
    %277 = vector.extract_strided_slice %274 {offsets = [0, 128], sizes = [2, 64], strides = [1, 1]} : vector<2x256xf32> to vector<2x64xf32>
    %278 = vector.extract_strided_slice %274 {offsets = [0, 192], sizes = [2, 64], strides = [1, 1]} : vector<2x256xf32> to vector<2x64xf32>
    %279 = arith.mulf %276, %264 : vector<2x64xf32>
    %280 = arith.mulf %275, %277 : vector<2x64xf32>
    %281 = arith.addf %279, %280 : vector<2x64xf32>
    %282 = math.tanh %281 : vector<2x64xf32>
    %283 = arith.mulf %278, %282 : vector<2x64xf32>
    %284 = vector.extract_strided_slice %214 {offsets = [8, 0], sizes = [2, 256], strides = [1, 1]} : vector<16x256xf32> to vector<2x256xf32>
    %285 = vector.extract_strided_slice %215 {offsets = [6, 0], sizes = [2, 256], strides = [1, 1]} : vector<16x256xf32> to vector<2x256xf32>
    %286 = arith.addf %284, %285 : vector<2x256xf32>
    %cst_52 = arith.constant dense<0.000000e+00> : vector<2x256xf32>
    %287 = tpu.matmul %283, %7, %cst_52 {dimension_numbers = #tpu.dot_dimension_numbers<[1], [0], [0], [1], [0, 0, 1, 1], [], []>} : vector<2x64xf32>, vector<64x256xf32>, vector<2x256xf32> -> vector<2x256xf32>
    %288 = arith.addf %286, %287 : vector<2x256xf32>
    %289 = math.tanh %288 : vector<2x256xf32>
    %290 = arith.mulf %289, %29 : vector<2x256xf32>
    %291 = arith.addf %290, %32 : vector<2x256xf32>
    %292 = vector.extract_strided_slice %291 {offsets = [0, 0], sizes = [2, 64], strides = [1, 1]} : vector<2x256xf32> to vector<2x64xf32>
    %293 = vector.extract_strided_slice %291 {offsets = [0, 64], sizes = [2, 64], strides = [1, 1]} : vector<2x256xf32> to vector<2x64xf32>
    %294 = vector.extract_strided_slice %291 {offsets = [0, 128], sizes = [2, 64], strides = [1, 1]} : vector<2x256xf32> to vector<2x64xf32>
    %295 = vector.extract_strided_slice %291 {offsets = [0, 192], sizes = [2, 64], strides = [1, 1]} : vector<2x256xf32> to vector<2x64xf32>
    %296 = arith.mulf %293, %281 : vector<2x64xf32>
    %297 = arith.mulf %292, %294 : vector<2x64xf32>
    %298 = arith.addf %296, %297 : vector<2x64xf32>
    %299 = math.tanh %298 : vector<2x64xf32>
    %300 = arith.mulf %295, %299 : vector<2x64xf32>
    %301 = vector.extract_strided_slice %214 {offsets = [10, 0], sizes = [2, 256], strides = [1, 1]} : vector<16x256xf32> to vector<2x256xf32>
    %302 = vector.extract_strided_slice %215 {offsets = [4, 0], sizes = [2, 256], strides = [1, 1]} : vector<16x256xf32> to vector<2x256xf32>
    %303 = arith.addf %301, %302 : vector<2x256xf32>
    %cst_53 = arith.constant dense<0.000000e+00> : vector<2x256xf32>
    %304 = tpu.matmul %300, %7, %cst_53 {dimension_numbers = #tpu.dot_dimension_numbers<[1], [0], [0], [1], [0, 0, 1, 1], [], []>} : vector<2x64xf32>, vector<64x256xf32>, vector<2x256xf32> -> vector<2x256xf32>
    %305 = arith.addf %303, %304 : vector<2x256xf32>
    %306 = math.tanh %305 : vector<2x256xf32>
    %307 = arith.mulf %306, %29 : vector<2x256xf32>
    %308 = arith.addf %307, %32 : vector<2x256xf32>
    %309 = vector.extract_strided_slice %308 {offsets = [0, 0], sizes = [2, 64], strides = [1, 1]} : vector<2x256xf32> to vector<2x64xf32>
    %310 = vector.extract_strided_slice %308 {offsets = [0, 64], sizes = [2, 64], strides = [1, 1]} : vector<2x256xf32> to vector<2x64xf32>
    %311 = vector.extract_strided_slice %308 {offsets = [0, 128], sizes = [2, 64], strides = [1, 1]} : vector<2x256xf32> to vector<2x64xf32>
    %312 = vector.extract_strided_slice %308 {offsets = [0, 192], sizes = [2, 64], strides = [1, 1]} : vector<2x256xf32> to vector<2x64xf32>
    %313 = arith.mulf %310, %298 : vector<2x64xf32>
    %314 = arith.mulf %309, %311 : vector<2x64xf32>
    %315 = arith.addf %313, %314 : vector<2x64xf32>
    %316 = math.tanh %315 : vector<2x64xf32>
    %317 = arith.mulf %312, %316 : vector<2x64xf32>
    %318 = vector.extract_strided_slice %214 {offsets = [12, 0], sizes = [2, 256], strides = [1, 1]} : vector<16x256xf32> to vector<2x256xf32>
    %319 = vector.extract_strided_slice %215 {offsets = [2, 0], sizes = [2, 256], strides = [1, 1]} : vector<16x256xf32> to vector<2x256xf32>
    %320 = arith.addf %318, %319 : vector<2x256xf32>
    %cst_54 = arith.constant dense<0.000000e+00> : vector<2x256xf32>
    %321 = tpu.matmul %317, %7, %cst_54 {dimension_numbers = #tpu.dot_dimension_numbers<[1], [0], [0], [1], [0, 0, 1, 1], [], []>} : vector<2x64xf32>, vector<64x256xf32>, vector<2x256xf32> -> vector<2x256xf32>
    %322 = arith.addf %320, %321 : vector<2x256xf32>
    %323 = math.tanh %322 : vector<2x256xf32>
    %324 = arith.mulf %323, %29 : vector<2x256xf32>
    %325 = arith.addf %324, %32 : vector<2x256xf32>
    %326 = vector.extract_strided_slice %325 {offsets = [0, 0], sizes = [2, 64], strides = [1, 1]} : vector<2x256xf32> to vector<2x64xf32>
    %327 = vector.extract_strided_slice %325 {offsets = [0, 64], sizes = [2, 64], strides = [1, 1]} : vector<2x256xf32> to vector<2x64xf32>
    %328 = vector.extract_strided_slice %325 {offsets = [0, 128], sizes = [2, 64], strides = [1, 1]} : vector<2x256xf32> to vector<2x64xf32>
    %329 = vector.extract_strided_slice %325 {offsets = [0, 192], sizes = [2, 64], strides = [1, 1]} : vector<2x256xf32> to vector<2x64xf32>
    %330 = arith.mulf %327, %315 : vector<2x64xf32>
    %331 = arith.mulf %326, %328 : vector<2x64xf32>
    %332 = arith.addf %330, %331 : vector<2x64xf32>
    %333 = math.tanh %332 : vector<2x64xf32>
    %334 = arith.mulf %329, %333 : vector<2x64xf32>
    %335 = vector.extract_strided_slice %214 {offsets = [14, 0], sizes = [2, 256], strides = [1, 1]} : vector<16x256xf32> to vector<2x256xf32>
    %336 = vector.extract_strided_slice %215 {offsets = [0, 0], sizes = [2, 256], strides = [1, 1]} : vector<16x256xf32> to vector<2x256xf32>
    %337 = arith.addf %335, %336 : vector<2x256xf32>
    %cst_55 = arith.constant dense<0.000000e+00> : vector<2x256xf32>
    %338 = tpu.matmul %334, %7, %cst_55 {dimension_numbers = #tpu.dot_dimension_numbers<[1], [0], [0], [1], [0, 0, 1, 1], [], []>} : vector<2x64xf32>, vector<64x256xf32>, vector<2x256xf32> -> vector<2x256xf32>
    %339 = arith.addf %337, %338 : vector<2x256xf32>
    %340 = math.tanh %339 : vector<2x256xf32>
    %341 = arith.mulf %340, %29 : vector<2x256xf32>
    %342 = arith.addf %341, %32 : vector<2x256xf32>
    %343 = vector.extract_strided_slice %342 {offsets = [0, 0], sizes = [2, 64], strides = [1, 1]} : vector<2x256xf32> to vector<2x64xf32>
    %344 = vector.extract_strided_slice %342 {offsets = [0, 64], sizes = [2, 64], strides = [1, 1]} : vector<2x256xf32> to vector<2x64xf32>
    %345 = vector.extract_strided_slice %342 {offsets = [0, 128], sizes = [2, 64], strides = [1, 1]} : vector<2x256xf32> to vector<2x64xf32>
    %346 = vector.extract_strided_slice %342 {offsets = [0, 192], sizes = [2, 64], strides = [1, 1]} : vector<2x256xf32> to vector<2x64xf32>
    %347 = arith.mulf %344, %332 : vector<2x64xf32>
    %348 = arith.mulf %343, %345 : vector<2x64xf32>
    %349 = arith.addf %347, %348 : vector<2x64xf32>
    %350 = math.tanh %349 : vector<2x64xf32>
    %351 = arith.mulf %346, %350 : vector<2x64xf32>
    %352 = vector.extract_strided_slice %168 {offsets = [0, 32], sizes = [2, 32], strides = [1, 1]} : vector<2x64xf32> to vector<2x32xf32>
    %353 = vector.extract_strided_slice %351 {offsets = [0, 32], sizes = [2, 32], strides = [1, 1]} : vector<2x64xf32> to vector<2x32xf32>
    %354 = arith.mulf %352, %353 : vector<2x32xf32>
    %cst_56 = arith.constant 1.250000e-01 : f32
    %355 = vector.broadcast %cst_56 : f32 to vector<2x32xf32>
    %356 = arith.mulf %354, %355 : vector<2x32xf32>
    %357 = vector.extract_strided_slice %168 {offsets = [0, 0], sizes = [2, 32], strides = [1, 1]} : vector<2x64xf32> to vector<2x32xf32>
    %358 = vector.extract_strided_slice %351 {offsets = [0, 0], sizes = [2, 32], strides = [1, 1]} : vector<2x64xf32> to vector<2x32xf32>
    %359 = arith.mulf %357, %358 : vector<2x32xf32>
    %cst_57 = arith.constant 1.250000e-01 : f32
    %360 = vector.broadcast %cst_57 : f32 to vector<2x32xf32>
    %361 = arith.mulf %359, %360 : vector<2x32xf32>
    %362 = vector.extract_strided_slice %232 {offsets = [0, 0], sizes = [2, 32], strides = [1, 1]} : vector<2x64xf32> to vector<2x32xf32>
    %363 = arith.mulf %362, %356 : vector<2x32xf32>
    %364 = vector.extract_strided_slice %351 {offsets = [0, 32], sizes = [2, 32], strides = [1, 1]} : vector<2x64xf32> to vector<2x32xf32>
    %365 = arith.mulf %364, %361 : vector<2x32xf32>
    %366 = arith.addf %363, %365 : vector<2x32xf32>
    %cst_58 = arith.constant dense<0.000000e+00> : vector<2xf32>
    %367 = vector.multi_reduction <add>, %366, %cst_58 [1] : vector<2x32xf32> to vector<2xf32>
    %368 = vector.shape_cast %367 : vector<2xf32> to vector<2x1xf32>
    %369 = vector.extract_strided_slice %249 {offsets = [0, 0], sizes = [2, 32], strides = [1, 1]} : vector<2x64xf32> to vector<2x32xf32>
    %370 = arith.mulf %369, %356 : vector<2x32xf32>
    %371 = vector.extract_strided_slice %334 {offsets = [0, 32], sizes = [2, 32], strides = [1, 1]} : vector<2x64xf32> to vector<2x32xf32>
    %372 = arith.mulf %371, %361 : vector<2x32xf32>
    %373 = arith.addf %370, %372 : vector<2x32xf32>
    %cst_59 = arith.constant dense<0.000000e+00> : vector<2xf32>
    %374 = vector.multi_reduction <add>, %373, %cst_59 [1] : vector<2x32xf32> to vector<2xf32>
    %375 = vector.shape_cast %374 : vector<2xf32> to vector<2x1xf32>
    %376 = vector.extract_strided_slice %266 {offsets = [0, 0], sizes = [2, 32], strides = [1, 1]} : vector<2x64xf32> to vector<2x32xf32>
    %377 = arith.mulf %376, %356 : vector<2x32xf32>
    %378 = vector.extract_strided_slice %317 {offsets = [0, 32], sizes = [2, 32], strides = [1, 1]} : vector<2x64xf32> to vector<2x32xf32>
    %379 = arith.mulf %378, %361 : vector<2x32xf32>
    %380 = arith.addf %377, %379 : vector<2x32xf32>
    %cst_60 = arith.constant dense<0.000000e+00> : vector<2xf32>
    %381 = vector.multi_reduction <add>, %380, %cst_60 [1] : vector<2x32xf32> to vector<2xf32>
    %382 = vector.shape_cast %381 : vector<2xf32> to vector<2x1xf32>
    %383 = vector.extract_strided_slice %283 {offsets = [0, 0], sizes = [2, 32], strides = [1, 1]} : vector<2x64xf32> to vector<2x32xf32>
    %384 = arith.mulf %383, %356 : vector<2x32xf32>
    %385 = vector.extract_strided_slice %300 {offsets = [0, 32], sizes = [2, 32], strides = [1, 1]} : vector<2x64xf32> to vector<2x32xf32>
    %386 = arith.mulf %385, %361 : vector<2x32xf32>
    %387 = arith.addf %384, %386 : vector<2x32xf32>
    %cst_61 = arith.constant dense<0.000000e+00> : vector<2xf32>
    %388 = vector.multi_reduction <add>, %387, %cst_61 [1] : vector<2x32xf32> to vector<2xf32>
    %389 = vector.shape_cast %388 : vector<2xf32> to vector<2x1xf32>
    %390 = vector.extract_strided_slice %300 {offsets = [0, 0], sizes = [2, 32], strides = [1, 1]} : vector<2x64xf32> to vector<2x32xf32>
    %391 = arith.mulf %390, %356 : vector<2x32xf32>
    %392 = vector.extract_strided_slice %283 {offsets = [0, 32], sizes = [2, 32], strides = [1, 1]} : vector<2x64xf32> to vector<2x32xf32>
    %393 = arith.mulf %392, %361 : vector<2x32xf32>
    %394 = arith.addf %391, %393 : vector<2x32xf32>
    %cst_62 = arith.constant dense<0.000000e+00> : vector<2xf32>
    %395 = vector.multi_reduction <add>, %394, %cst_62 [1] : vector<2x32xf32> to vector<2xf32>
    %396 = vector.shape_cast %395 : vector<2xf32> to vector<2x1xf32>
    %397 = vector.extract_strided_slice %317 {offsets = [0, 0], sizes = [2, 32], strides = [1, 1]} : vector<2x64xf32> to vector<2x32xf32>
    %398 = arith.mulf %397, %356 : vector<2x32xf32>
    %399 = vector.extract_strided_slice %266 {offsets = [0, 32], sizes = [2, 32], strides = [1, 1]} : vector<2x64xf32> to vector<2x32xf32>
    %400 = arith.mulf %399, %361 : vector<2x32xf32>
    %401 = arith.addf %398, %400 : vector<2x32xf32>
    %cst_63 = arith.constant dense<0.000000e+00> : vector<2xf32>
    %402 = vector.multi_reduction <add>, %401, %cst_63 [1] : vector<2x32xf32> to vector<2xf32>
    %403 = vector.shape_cast %402 : vector<2xf32> to vector<2x1xf32>
    %404 = vector.extract_strided_slice %334 {offsets = [0, 0], sizes = [2, 32], strides = [1, 1]} : vector<2x64xf32> to vector<2x32xf32>
    %405 = arith.mulf %404, %356 : vector<2x32xf32>
    %406 = vector.extract_strided_slice %249 {offsets = [0, 32], sizes = [2, 32], strides = [1, 1]} : vector<2x64xf32> to vector<2x32xf32>
    %407 = arith.mulf %406, %361 : vector<2x32xf32>
    %408 = arith.addf %405, %407 : vector<2x32xf32>
    %cst_64 = arith.constant dense<0.000000e+00> : vector<2xf32>
    %409 = vector.multi_reduction <add>, %408, %cst_64 [1] : vector<2x32xf32> to vector<2xf32>
    %410 = vector.shape_cast %409 : vector<2xf32> to vector<2x1xf32>
    %411 = vector.extract_strided_slice %351 {offsets = [0, 0], sizes = [2, 32], strides = [1, 1]} : vector<2x64xf32> to vector<2x32xf32>
    %412 = arith.mulf %411, %356 : vector<2x32xf32>
    %413 = vector.extract_strided_slice %232 {offsets = [0, 32], sizes = [2, 32], strides = [1, 1]} : vector<2x64xf32> to vector<2x32xf32>
    %414 = arith.mulf %413, %361 : vector<2x32xf32>
    %415 = arith.addf %412, %414 : vector<2x32xf32>
    %cst_65 = arith.constant dense<0.000000e+00> : vector<2xf32>
    %416 = vector.multi_reduction <add>, %415, %cst_65 [1] : vector<2x32xf32> to vector<2xf32>
    %417 = vector.shape_cast %416 : vector<2xf32> to vector<2x1xf32>
    %418 = arith.maximumf %368, %375 : vector<2x1xf32>
    %419 = arith.maximumf %382, %389 : vector<2x1xf32>
    %420 = arith.maximumf %396, %403 : vector<2x1xf32>
    %421 = arith.maximumf %410, %417 : vector<2x1xf32>
    %422 = arith.maximumf %418, %419 : vector<2x1xf32>
    %423 = arith.maximumf %420, %421 : vector<2x1xf32>
    %424 = arith.maximumf %422, %423 : vector<2x1xf32>
    %425 = arith.subf %368, %424 : vector<2x1xf32>
    %426 = math.exp %425 : vector<2x1xf32>
    %427 = arith.subf %375, %424 : vector<2x1xf32>
    %428 = math.exp %427 : vector<2x1xf32>
    %429 = arith.subf %382, %424 : vector<2x1xf32>
    %430 = math.exp %429 : vector<2x1xf32>
    %431 = arith.subf %389, %424 : vector<2x1xf32>
    %432 = math.exp %431 : vector<2x1xf32>
    %433 = arith.subf %396, %424 : vector<2x1xf32>
    %434 = math.exp %433 : vector<2x1xf32>
    %435 = arith.subf %403, %424 : vector<2x1xf32>
    %436 = math.exp %435 : vector<2x1xf32>
    %437 = arith.subf %410, %424 : vector<2x1xf32>
    %438 = math.exp %437 : vector<2x1xf32>
    %439 = arith.subf %417, %424 : vector<2x1xf32>
    %440 = math.exp %439 : vector<2x1xf32>
    %441 = arith.addf %426, %428 : vector<2x1xf32>
    %442 = arith.addf %430, %432 : vector<2x1xf32>
    %443 = arith.addf %434, %436 : vector<2x1xf32>
    %444 = arith.addf %438, %440 : vector<2x1xf32>
    %445 = arith.addf %441, %442 : vector<2x1xf32>
    %446 = arith.addf %443, %444 : vector<2x1xf32>
    %447 = arith.addf %445, %446 : vector<2x1xf32>
    %448 = tpu.reciprocal %447 {approx = true} : vector<2x1xf32> -> vector<2x1xf32>
    %449 = arith.mulf %426, %448 : vector<2x1xf32>
    %450 = arith.mulf %428, %448 : vector<2x1xf32>
    %451 = arith.mulf %430, %448 : vector<2x1xf32>
    %452 = arith.mulf %432, %448 : vector<2x1xf32>
    %453 = arith.mulf %434, %448 : vector<2x1xf32>
    %454 = arith.mulf %436, %448 : vector<2x1xf32>
    %455 = arith.mulf %438, %448 : vector<2x1xf32>
    %456 = arith.mulf %440, %448 : vector<2x1xf32>
    %457 = vector.extract_strided_slice %232 {offsets = [0, 0], sizes = [2, 32], strides = [1, 1]} : vector<2x64xf32> to vector<2x32xf32>
    %458 = vector.broadcast %449 : vector<2x1xf32> to vector<2x32xf32>
    %459 = arith.mulf %458, %457 : vector<2x32xf32>
    %460 = vector.extract_strided_slice %249 {offsets = [0, 0], sizes = [2, 32], strides = [1, 1]} : vector<2x64xf32> to vector<2x32xf32>
    %461 = vector.broadcast %450 : vector<2x1xf32> to vector<2x32xf32>
    %462 = arith.mulf %461, %460 : vector<2x32xf32>
    %463 = vector.extract_strided_slice %266 {offsets = [0, 0], sizes = [2, 32], strides = [1, 1]} : vector<2x64xf32> to vector<2x32xf32>
    %464 = vector.broadcast %451 : vector<2x1xf32> to vector<2x32xf32>
    %465 = arith.mulf %464, %463 : vector<2x32xf32>
    %466 = vector.extract_strided_slice %283 {offsets = [0, 0], sizes = [2, 32], strides = [1, 1]} : vector<2x64xf32> to vector<2x32xf32>
    %467 = vector.broadcast %452 : vector<2x1xf32> to vector<2x32xf32>
    %468 = arith.mulf %467, %466 : vector<2x32xf32>
    %469 = vector.extract_strided_slice %300 {offsets = [0, 0], sizes = [2, 32], strides = [1, 1]} : vector<2x64xf32> to vector<2x32xf32>
    %470 = vector.broadcast %453 : vector<2x1xf32> to vector<2x32xf32>
    %471 = arith.mulf %470, %469 : vector<2x32xf32>
    %472 = vector.extract_strided_slice %317 {offsets = [0, 0], sizes = [2, 32], strides = [1, 1]} : vector<2x64xf32> to vector<2x32xf32>
    %473 = vector.broadcast %454 : vector<2x1xf32> to vector<2x32xf32>
    %474 = arith.mulf %473, %472 : vector<2x32xf32>
    %475 = vector.extract_strided_slice %334 {offsets = [0, 0], sizes = [2, 32], strides = [1, 1]} : vector<2x64xf32> to vector<2x32xf32>
    %476 = vector.broadcast %455 : vector<2x1xf32> to vector<2x32xf32>
    %477 = arith.mulf %476, %475 : vector<2x32xf32>
    %478 = vector.extract_strided_slice %351 {offsets = [0, 0], sizes = [2, 32], strides = [1, 1]} : vector<2x64xf32> to vector<2x32xf32>
    %479 = vector.broadcast %456 : vector<2x1xf32> to vector<2x32xf32>
    %480 = arith.mulf %479, %478 : vector<2x32xf32>
    %481 = arith.addf %459, %462 : vector<2x32xf32>
    %482 = arith.addf %465, %468 : vector<2x32xf32>
    %483 = arith.addf %471, %474 : vector<2x32xf32>
    %484 = arith.addf %477, %480 : vector<2x32xf32>
    %485 = arith.addf %481, %482 : vector<2x32xf32>
    %486 = arith.addf %483, %484 : vector<2x32xf32>
    %487 = arith.addf %485, %486 : vector<2x32xf32>
    %488 = vector.extract_strided_slice %351 {offsets = [0, 32], sizes = [2, 32], strides = [1, 1]} : vector<2x64xf32> to vector<2x32xf32>
    %489 = vector.broadcast %449 : vector<2x1xf32> to vector<2x32xf32>
    %490 = arith.mulf %489, %488 : vector<2x32xf32>
    %491 = vector.extract_strided_slice %334 {offsets = [0, 32], sizes = [2, 32], strides = [1, 1]} : vector<2x64xf32> to vector<2x32xf32>
    %492 = vector.broadcast %450 : vector<2x1xf32> to vector<2x32xf32>
    %493 = arith.mulf %492, %491 : vector<2x32xf32>
    %494 = vector.extract_strided_slice %317 {offsets = [0, 32], sizes = [2, 32], strides = [1, 1]} : vector<2x64xf32> to vector<2x32xf32>
    %495 = vector.broadcast %451 : vector<2x1xf32> to vector<2x32xf32>
    %496 = arith.mulf %495, %494 : vector<2x32xf32>
    %497 = vector.extract_strided_slice %300 {offsets = [0, 32], sizes = [2, 32], strides = [1, 1]} : vector<2x64xf32> to vector<2x32xf32>
    %498 = vector.broadcast %452 : vector<2x1xf32> to vector<2x32xf32>
    %499 = arith.mulf %498, %497 : vector<2x32xf32>
    %500 = vector.extract_strided_slice %283 {offsets = [0, 32], sizes = [2, 32], strides = [1, 1]} : vector<2x64xf32> to vector<2x32xf32>
    %501 = vector.broadcast %453 : vector<2x1xf32> to vector<2x32xf32>
    %502 = arith.mulf %501, %500 : vector<2x32xf32>
    %503 = vector.extract_strided_slice %266 {offsets = [0, 32], sizes = [2, 32], strides = [1, 1]} : vector<2x64xf32> to vector<2x32xf32>
    %504 = vector.broadcast %454 : vector<2x1xf32> to vector<2x32xf32>
    %505 = arith.mulf %504, %503 : vector<2x32xf32>
    %506 = vector.extract_strided_slice %249 {offsets = [0, 32], sizes = [2, 32], strides = [1, 1]} : vector<2x64xf32> to vector<2x32xf32>
    %507 = vector.broadcast %455 : vector<2x1xf32> to vector<2x32xf32>
    %508 = arith.mulf %507, %506 : vector<2x32xf32>
    %509 = vector.extract_strided_slice %232 {offsets = [0, 32], sizes = [2, 32], strides = [1, 1]} : vector<2x64xf32> to vector<2x32xf32>
    %510 = vector.broadcast %456 : vector<2x1xf32> to vector<2x32xf32>
    %511 = arith.mulf %510, %509 : vector<2x32xf32>
    %512 = arith.addf %490, %493 : vector<2x32xf32>
    %513 = arith.addf %496, %499 : vector<2x32xf32>
    %514 = arith.addf %502, %505 : vector<2x32xf32>
    %515 = arith.addf %508, %511 : vector<2x32xf32>
    %516 = arith.addf %512, %513 : vector<2x32xf32>
    %517 = arith.addf %514, %515 : vector<2x32xf32>
    %518 = arith.addf %516, %517 : vector<2x32xf32>
    %c0_66 = arith.constant 0 : index
    %c0_67 = arith.constant 0 : index
    %519 = vector.load %arg4[%c0_66, %c0_67] : memref<2x64xf32, #tpu.memory_space<vmem>>, vector<2x32xf32>
    tpu.vector_store %arg4[%c0_66, %c0_67], %487 {strides = array<i32>} : memref<2x64xf32, #tpu.memory_space<vmem>>, vector<2x32xf32>,
    %c0_68 = arith.constant 0 : index
    %c32_69 = arith.constant 32 : index
    %520 = vector.load %arg4[%c0_68, %c32_69] : memref<2x64xf32, #tpu.memory_space<vmem>>, vector<2x32xf32>
    tpu.vector_store %arg4[%c0_68, %c32_69], %518 {strides = array<i32>} : memref<2x64xf32, #tpu.memory_space<vmem>>, vector<2x32xf32>,
    return
  }
}

</mosaic_0001>

<bundles_post_ra>
// kernel: t_dan_forward.3
= control target key start
LH: loop header
LB: loop body
LE: loop exit
PB: predicated region body
PF: predicated region fallthrough
CT: control target
= control target key end

     0   :  { %9 = vsyncpa [#allocation4], 0  ;;  %s4020_s15 = smov [#allocation3]   ;;  %s5666_s0 = inlined_call_operand.vmem [shape: f32[16,32], index: 0, kind: input, shape index: {}]   ;;  %s5667_s1 = inlined_call_operand.hbm [shape: f32[232,512], index: 1, kind: input, shape index: {}]   ;;  %s5668_s2 = inlined_call_operand.vmem [shape: f32[232,256], index: 2, kind: input, shape index: {}]   ;;  %s5669_s3 = inlined_call_operand.vmem [shape: f32[4,128], index: 3, kind: input, shape index: {}]   ;;  %s5670_s4 = inlined_call_operand.vmem [shape: f32[2,64], index: 4, kind: output, shape index: {}]  }
   0x1   :  { %s17_s16 = sshll.u32 %s4020_s15, 4  ;;  %s18_s16 = int_to_ptr.vmem [resolvable:$true] %s17_s16 }
   0x2   :  { %s4006_s17 = scalar_lea.vmem %s18_s16, 14848  ;;  %p4011_p1 = scmp.lt.s32.totalorder %s18_s16, %s18_s16 }
   0x3   :  { %p4007_p0 = scmp.ne.s32.totalorder %s18_s16, %s4006_s17  ;;  %p4012_p2 = scmp.lt.s32.totalorder %s4006_s17, %s4006_s17 }
   0x5   :  { %p4013_p3 = por %p4012_p2, %p4011_p1 }
   0x7   :  { %p4014_p4 = pnand %p4013_p3, %p4007_p0 }
   0x9   :  { %4017 = shalt.err (!%p4014_p4)
}
   0xa   :  { %s4021_s18 = smov 512   ;;  %s4022_s19 = smov 32  }
   0xb   :  { %23 = dma.hbm_to_vmem [thread:$0]  %s5667_s1, 14848, %s18_s16, [#allocation4], %s4021_s18, %s4021_s18, %s4022_s19  }
   0xc   :  { %4018 = dma.done.wait [#allocation4], 14848  }
   0xd   :  { %4019 = vsyncadd [#allocation4], 4294952448  ;;  %v5671_v0 = vmov 0.0   ;;  %v44_v1 = vld [vmem:[#allocation3 + $0x68] sm:$0xff]  ;;  %v46_v2 = vld [vmem:[#allocation3 + $0x78] sm:$0xff]  ;;  %vm261_vm0 = vcmask 261120  }
   0xe   :  { %332 = vmatprep.mubr.f32.mxu0 %v5671_v0  ;;  %409 = vmatprep.mubr.f32.mxu1 %v5671_v0  ;;  %v43_v3 = vld [vmem:[#allocation3 + $0x60] sm:$0xff]  ;;  %v45_v4 = vld [vmem:[#allocation3 + $0x70] sm:$0xff]  ;;  %v40_v5 = vld [vmem:[#allocation3 + $0x48] sm:$0xff]  ;;  %vm736_vm1 = vcmask 654848   ;;  %s4025_s27 = smov 64   ;;  %vm942_vm2 = vcmask 517120  }
   0xf   :  { %292 = vmatprep.subr.mxu0 %v44_v1  ;;  %369 = vmatprep.subr.mxu1 %v46_v2  ;;  %v42_v6 = vld [vmem:[#allocation3 + $0x58] sm:$0xff]  ;;  %v39_v7 = vld [vmem:[#allocation3 + $0x40] sm:$0xff]  ;;  %v41_v8 = vld [vmem:[#allocation3 + $0x50] sm:$0xff]  ;;  %vm1150_vm3 = vcmask 519170   ;;  %vm1356_vm4 = vcmask 521220   ;;  %vm1558_vm5 = vcmask 523270  }
  0x10   :  { %293 = vmatpush1.msra.mxu0 %v43_v3  ;;  %370 = vmatpush1.msra.mxu1 %v45_v4  ;;  %v36_v9 = vld [vmem:[#allocation3 + $0x28] sm:$0xff]  ;;  %v38_v10 = vld [vmem:[#allocation3 + $0x38] sm:$0xff]  ;;  %v35_v11 = vld [vmem:[#allocation3 + $0x20] sm:$0xff]  ;;  %vm2343_vm6 = vcmask 654336   ;;  %vm2515_vm7 = vcmask 523264   ;;  %vm3415_vm9 = vcmask 259076  }
  0x11   :  { %294 = vmatprep.subr.mxu0 %v40_v5  ;;  %371 = vmatprep.subr.mxu1 %v42_v6  ;;  %v37_v12 = vld [vmem:[#allocation3 + $0x30] sm:$0xff]  ;;  %v32_v13 = vld [vmem:[#allocation3 + $0x8] sm:$0xff]  ;;  %v34_v14 = vld [vmem:[#allocation3 + $0x18] sm:$0xff]  ;;  %vm3437_vm10 = vcmask 261126   ;;  %vm3370_vm11 = vcmask 254976   ;;  %vm3393_vm12 = vcmask 257026  }
  0x12   :  { %295 = vmatpush1.msra.mxu0 %v39_v7  ;;  %372 = vmatpush1.msra.mxu1 %v41_v8  ;;  %v31_v15 = vld [vmem:[#allocation3] sm:$0xff]  ;;  %v33_v16 = vld [vmem:[#allocation3 + $0x10] sm:$0xff]  ;;  %v60_v18 = vld [vmem:[#allocation3 + $0xe8] sm:$0xff]  ;;  %vm3744_vm13 = vcmask 517376  }
  0x13   :  { %296 = vmatprep.subr.mxu0 %v36_v9  ;;  %373 = vmatprep.subr.mxu1 %v38_v10  ;;  %v4063_v17 = vld [vmem:[%s5666_s0] sm:$0xff]  ;;  %v62_v19 = vld [vmem:[#allocation3 + $0xf8] sm:$0xff]  ;;  %v59_v20 = vld [vmem:[#allocation3 + $0xe0] sm:$0xff] }
  0x14   :  { %297 = vmatpush1.msra.mxu0 %v35_v11  ;;  %374 = vmatpush1.msra.mxu1 %v37_v12  ;;  %5827 = vst [vmem:[#allocation6_spill] sm:$0xff] %v4063_v17  ;;  %v61_v21 = vld [vmem:[#allocation3 + $0xf0] sm:$0xff]  ;;  %v56_v22 = vld [vmem:[#allocation3 + $0xc8] sm:$0xff]  ;;  %v58_v23 = vld [vmem:[#allocation3 + $0xd8] sm:$0xff] }
  0x15   :  { %298 = vmatprep.subr.mxu0 %v32_v13  ;;  %375 = vmatprep.subr.mxu1 %v34_v14  ;;  %v55_v24 = vld [vmem:[#allocation3 + $0xc0] sm:$0xff]  ;;  %v57_v25 = vld [vmem:[#allocation3 + $0xd0] sm:$0xff]  ;;  %v4072_v26 = vld [vmem:[%s5666_s0 + $0x8] sm:$0xff] }
  0x16   :  { %299 = vmatpush1.msra.mxu0 %v31_v15  ;;  %376 = vmatpush1.msra.mxu1 %v33_v16  ;;  %v52_v27 = vld [vmem:[#allocation3 + $0xa8] sm:$0xff]  ;;  %v54_v28 = vld [vmem:[#allocation3 + $0xb8] sm:$0xff]  ;;  %v51_v29 = vld [vmem:[#allocation3 + $0xa0] sm:$0xff] }
  0x17   :  { %3752 = vmatmul.mubr.msk.f32.vlgmr.msra.gmra.mxu0 %vm261_vm0, %v4063_v17  ;;  %3754 = vmatmul.mubr.msk.f32.vlgmr.msra.gmra.mxu1 %vm261_vm0, %v4063_v17  ;;  %v53_v30 = vld [vmem:[#allocation3 + $0xb0] sm:$0xff]  ;;  %v48_v31 = vld [vmem:[#allocation3 + $0x88] sm:$0xff]  ;;  %v50_v32 = vld [vmem:[#allocation3 + $0x98] sm:$0xff] }
  0x18   :  { %446 = vmatprep.subr.mxu0 %v60_v18  ;;  %523 = vmatprep.subr.mxu1 %v62_v19  ;;  %v47_v33 = vld [vmem:[#allocation3 + $0x80] sm:$0xff]  ;;  %v49_v34 = vld [vmem:[#allocation3 + $0x90] sm:$0xff]  ;;  %v76_v35 = vld [vmem:[#allocation3 + $0x168] sm:$0xff] }
  0x19   :  { %447 = vmatpush1.msra.mxu0 %v59_v20  ;;  %524 = vmatpush1.msra.mxu1 %v61_v21  ;;  %v78_v36 = vld [vmem:[#allocation3 + $0x178] sm:$0xff]  ;;  %v75_v37 = vld [vmem:[#allocation3 + $0x160] sm:$0xff]  ;;  %v77_v38 = vld [vmem:[#allocation3 + $0x170] sm:$0xff] }
  0x1a   :  { %448 = vmatprep.subr.mxu0 %v56_v22  ;;  %525 = vmatprep.subr.mxu1 %v58_v23  ;;  %v72_v39 = vld [vmem:[#allocation3 + $0x148] sm:$0xff]  ;;  %v74_v40 = vld [vmem:[#allocation3 + $0x158] sm:$0xff]  ;;  %v71_v41 = vld [vmem:[#allocation3 + $0x140] sm:$0xff] }
  0x1b   :  { %338 = vmatprep.mubr.f32.mxu0 %v5671_v0  ;;  %415 = vmatprep.mubr.f32.mxu1 %v5671_v0  ;;  %v73_v42 = vld [vmem:[#allocation3 + $0x150] sm:$0xff]  ;;  %v68_v43 = vld [vmem:[#allocation3 + $0x128] sm:$0xff]  ;;  %v70_v44 = vld [vmem:[#allocation3 + $0x138] sm:$0xff] }
  0x1c   :  { %449 = vmatpush1.msra.mxu0 %v55_v24  ;;  %526 = vmatpush1.msra.mxu1 %v57_v25  ;;  %v67_v45 = vld [vmem:[#allocation3 + $0x120] sm:$0xff]  ;;  %v69_v46 = vld [vmem:[#allocation3 + $0x130] sm:$0xff]  ;;  %v64_v47 = vld [vmem:[#allocation3 + $0x108] sm:$0xff] }
  0x1d   :  { %3753 = vmatmul.mubr.msk.f32.gmra.mxu0 %vm261_vm0, %v4072_v26  ;;  %3755 = vmatmul.mubr.msk.f32.gmra.mxu1 %vm261_vm0, %v4072_v26  ;;  %v66_v48 = vld [vmem:[#allocation3 + $0x118] sm:$0xff]  ;;  %v63_v49 = vld [vmem:[#allocation3 + $0x100] sm:$0xff]  ;;  %v65_v50 = vld [vmem:[#allocation3 + $0x110] sm:$0xff] }
  0x1e   :  { %450 = vmatprep.subr.mxu0 %v52_v27  ;;  %527 = vmatprep.subr.mxu1 %v54_v28  ;;  %v4093_v51 = vld [vmem:[#allocation3 + $0x368] sm:$0xff]  ;;  %v4095_v52 = vld [vmem:[#allocation3 + $0x378] sm:$0xff]  ;;  %v4098_v53 = vld [vmem:[#allocation3 + $0x360] sm:$0xff] }
  0x1f   :  { %451 = vmatpush1.msra.mxu0 %v51_v29  ;;  %528 = vmatpush1.msra.mxu1 %v53_v30  ;;  %5828 = vst [vmem:[#allocation7_spill] sm:$0xff] %v4093_v51  ;;  %5829 = vst [vmem:[#allocation8_spill] sm:$0xff] %v4095_v52  ;;  %v4100_v54 = vld [vmem:[#allocation3 + $0x370] sm:$0xff]  ;;  %v4106_v55 = vld [vmem:[#allocation3 + $0x348] sm:$0xff] }
  0x20   :  { %452 = vmatprep.subr.mxu0 %v48_v31  ;;  %529 = vmatprep.subr.mxu1 %v50_v32  ;;  %v4108_v56 = vld [vmem:[#allocation3 + $0x358] sm:$0xff]  ;;  %v4114_v57 = vld [vmem:[#allocation3 + $0x340] sm:$0xff]  ;;  %v4116_v58 = vld [vmem:[#allocation3 + $0x350] sm:$0xff] }
  0x21   :  { %453 = vmatpush1.msra.mxu0 %v47_v33  ;;  %486 = vmatprep.mubr.f32.mxu0 %v5671_v0  ;;  %v4122_v59 = vld [vmem:[#allocation3 + $0x328] sm:$0xff]  ;;  %v4124_v60 = vld [vmem:[#allocation3 + $0x338] sm:$0xff]  ;;  %v4128_v61 = vld [vmem:[#allocation3 + $0x320] sm:$0xff] }
  0x22   :  { %530 = vmatpush1.msra.mxu1 %v49_v34  ;;  %563 = vmatprep.mubr.f32.mxu1 %v5671_v0  ;;  %v4130_v62 = vld [vmem:[#allocation3 + $0x330] sm:$0xff]  ;;  %v4136_v63 = vld [vmem:[#allocation3 + $0x308] sm:$0xff]  ;;  %v4138_v1 = vld [vmem:[#allocation3 + $0x318] sm:$0xff] }
  0x23   :  { %3756 = vmatmul.mubr.msk.f32.vlgmr.msra.gmra.mxu0 %vm261_vm0, %v4063_v17  ;;  %3758 = vmatmul.mubr.msk.f32.vlgmr.msra.gmra.mxu1 %vm261_vm0, %v4063_v17  ;;  %v4142_v2 = vld [vmem:[#allocation3 + $0x300] sm:$0xff]  ;;  %v4144_v3 = vld [vmem:[#allocation3 + $0x310] sm:$0xff]  ;;  %v4148_v4 = vld [vmem:[#allocation3 + $0x2e8] sm:$0xff] }
  0x24   :  { %600 = vmatprep.subr.mxu0 %v76_v35  ;;  %677 = vmatprep.subr.mxu1 %v78_v36  ;;  %5830 = vst [vmem:[#allocation9_spill] sm:$0xff] %v4144_v3  ;;  %5831 = vst [vmem:[#allocation10_spill] sm:$0xff] %v4148_v4  ;;  %v4150_v5 = vld [vmem:[#allocation3 + $0x2f8] sm:$0xff]  ;;  %v4154_v6 = vld [vmem:[#allocation3 + $0x2e0] sm:$0xff] }
  0x25   :  { %601 = vmatpush1.msra.mxu0 %v75_v37  ;;  %678 = vmatpush1.msra.mxu1 %v77_v38  ;;  %5832 = vst [vmem:[#allocation11_spill] sm:$0xff] %v4150_v5  ;;  %5833 = vst [vmem:[#allocation12_spill] sm:$0xff] %v4154_v6  ;;  %v4156_v7 = vld [vmem:[#allocation3 + $0x2f0] sm:$0xff]  ;;  %v4160_v8 = vld [vmem:[#allocation3 + $0x2c8] sm:$0xff] }
  0x26   :  { %602 = vmatprep.subr.mxu0 %v72_v39  ;;  %679 = vmatprep.subr.mxu1 %v74_v40  ;;  %5834 = vst [vmem:[#allocation13_spill] sm:$0xff] %v4156_v7  ;;  %5835 = vst [vmem:[#allocation14_spill] sm:$0xff] %v4160_v8  ;;  %v4162_v9 = vld [vmem:[#allocation3 + $0x2d8] sm:$0xff]  ;;  %v4166_v10 = vld [vmem:[#allocation3 + $0x2c0] sm:$0xff] }
  0x27   :  { %492 = vmatprep.mubr.f32.mxu0 %v5671_v0  ;;  %569 = vmatprep.mubr.f32.mxu1 %v5671_v0  ;;  %5836 = vst [vmem:[#allocation15_spill] sm:$0xff] %v4162_v9  ;;  %5837 = vst [vmem:[#allocation16_spill] sm:$0xff] %v4166_v10  ;;  %v4168_v11 = vld [vmem:[#allocation3 + $0x2d0] sm:$0xff]  ;;  %v4172_v12 = vld [vmem:[#allocation3 + $0x2a8] sm:$0xff] }
  0x28   :  { %603 = vmatpush1.msra.mxu0 %v71_v41  ;;  %680 = vmatpush1.msra.mxu1 %v73_v42  ;;  %5838 = vst [vmem:[#allocation17_spill] sm:$0xff] %v4168_v11  ;;  %5839 = vst [vmem:[#allocation18_spill] sm:$0xff] %v4172_v12  ;;  %v4174_v13 = vld [vmem:[#allocation3 + $0x2b8] sm:$0xff]  ;;  %v4178_v14 = vld [vmem:[#allocation3 + $0x2a0] sm:$0xff] }
  0x29   :  { %3757 = vmatmul.mubr.msk.f32.gmra.mxu0 %vm261_vm0, %v4072_v26  ;;  %3759 = vmatmul.mubr.msk.f32.gmra.mxu1 %vm261_vm0, %v4072_v26  ;;  %5840 = vst [vmem:[#allocation19_spill] sm:$0xff] %v4174_v13  ;;  %5841 = vst [vmem:[#allocation20_spill] sm:$0xff] %v4178_v14  ;;  %v4180_v15 = vld [vmem:[#allocation3 + $0x2b0] sm:$0xff]  ;;  %v4184_v16 = vld [vmem:[#allocation3 + $0x288] sm:$0xff] }
  0x2a   :  { %604 = vmatprep.subr.mxu0 %v68_v43  ;;  %681 = vmatprep.subr.mxu1 %v70_v44  ;;  %5842 = vst [vmem:[#allocation21_spill] sm:$0xff] %v4180_v15  ;;  %5843 = vst [vmem:[#allocation22_spill] sm:$0xff] %v4184_v16  ;;  %v4186_v18 = vld [vmem:[#allocation3 + $0x298] sm:$0xff]  ;;  %v4190_v19 = vld [vmem:[#allocation3 + $0x280] sm:$0xff] }
  0x2b   :  { %605 = vmatpush1.msra.mxu0 %v67_v45  ;;  %682 = vmatpush1.msra.mxu1 %v69_v46  ;;  %5844 = vst [vmem:[#allocation23_spill] sm:$0xff] %v4186_v18  ;;  %5845 = vst [vmem:[#allocation24_spill] sm:$0xff] %v4190_v19  ;;  %v4192_v20 = vld [vmem:[#allocation3 + $0x290] sm:$0xff]  ;;  %v4196_v21 = vld [vmem:[#allocation3 + $0x268] sm:$0xff] }
  0x2c   :  { %606 = vmatprep.subr.mxu0 %v64_v47  ;;  %683 = vmatprep.subr.mxu1 %v66_v48  ;;  %5846 = vst [vmem:[#allocation25_spill] sm:$0xff] %v4192_v20  ;;  %5847 = vst [vmem:[#allocation26_spill] sm:$0xff] %v4196_v21  ;;  %v4198_v22 = vld [vmem:[#allocation3 + $0x278] sm:$0xff]  ;;  %v4202_v23 = vld [vmem:[#allocation3 + $0x260] sm:$0xff] }
  0x2d   :  { %607 = vmatpush1.msra.mxu0 %v63_v49  ;;  %640 = vmatprep.mubr.f32.mxu0 %v5671_v0  ;;  %5848 = vst [vmem:[#allocation27_spill] sm:$0xff] %v4198_v22  ;;  %5849 = vst [vmem:[#allocation28_spill] sm:$0xff] %v4202_v23  ;;  %v4204_v24 = vld [vmem:[#allocation3 + $0x270] sm:$0xff]  ;;  %v4208_v25 = vld [vmem:[#allocation3 + $0x248] sm:$0xff] }
  0x2e   :  { %684 = vmatpush1.msra.mxu1 %v65_v50  ;;  %717 = vmatprep.mubr.f32.mxu1 %v5671_v0  ;;  %5850 = vst [vmem:[#allocation29_spill] sm:$0xff] %v4204_v24  ;;  %5851 = vst [vmem:[#allocation30_spill] sm:$0xff] %v4208_v25  ;;  %v4214_v27 = vld [vmem:[#allocation3 + $0x240] sm:$0xff]  ;;  %v4216_v28 = vld [vmem:[#allocation3 + $0x250] sm:$0xff] }
  0x2f   :  { %3760 = vmatmul.mubr.msk.f32.vlgmr.msra.gmra.mxu0 %vm261_vm0, %v4063_v17  ;;  %3762 = vmatmul.mubr.msk.f32.vlgmr.msra.gmra.mxu1 %vm261_vm0, %v4063_v17  ;;  %5853 = vst [vmem:[#allocation32_spill] sm:$0xff] %v4214_v27  ;;  %5854 = vst [vmem:[#allocation33_spill] sm:$0xff] %v4216_v28  ;;  %v4220_v29 = vld [vmem:[#allocation3 + $0x228] sm:$0xff]  ;;  %v4222_v30 = vld [vmem:[#allocation3 + $0x238] sm:$0xff] }
  0x30   :  { %772 = vmatprep.subr.mxu0 %v4093_v51  ;;  %843 = vmatprep.subr.mxu1 %v4095_v52  ;;  %5855 = vst [vmem:[#allocation34_spill] sm:$0xff] %v4220_v29  ;;  %5856 = vst [vmem:[#allocation35_spill] sm:$0xff] %v4222_v30  ;;  %v4226_v31 = vld [vmem:[#allocation3 + $0x220] sm:$0xff]  ;;  %v4228_v32 = vld [vmem:[#allocation3 + $0x230] sm:$0xff] }
  0x31   :  { %773 = vmatpush1.msra.mxu0 %v4098_v53  ;;  %844 = vmatpush1.msra.mxu1 %v4100_v54  ;;  %5857 = vst [vmem:[#allocation36_spill] sm:$0xff] %v4226_v31  ;;  %5858 = vst [vmem:[#allocation37_spill] sm:$0xff] %v4228_v32  ;;  %v4232_v33 = vld [vmem:[#allocation3 + $0x208] sm:$0xff]  ;;  %v4234_v34 = vld [vmem:[#allocation3 + $0x218] sm:$0xff] }
  0x32   :  { %774 = vmatprep.subr.mxu0 %v4106_v55  ;;  %845 = vmatprep.subr.mxu1 %v4108_v56  ;;  %5859 = vst [vmem:[#allocation38_spill] sm:$0xff] %v4232_v33  ;;  %5860 = vst [vmem:[#allocation39_spill] sm:$0xff] %v4234_v34  ;;  %v4238_v35 = vld [vmem:[#allocation3 + $0x200] sm:$0xff]  ;;  %v4240_v36 = vld [vmem:[#allocation3 + $0x210] sm:$0xff] }
  0x33   :  { %646 = vmatprep.mubr.f32.mxu0 %v5671_v0  ;;  %723 = vmatprep.mubr.f32.mxu1 %v5671_v0  ;;  %5861 = vst [vmem:[#allocation40_spill] sm:$0xff] %v4238_v35  ;;  %5862 = vst [vmem:[#allocation41_spill] sm:$0xff] %v4240_v36  ;;  %v4244_v37 = vld [vmem:[#allocation3 + $0x1e8] sm:$0xff]  ;;  %v4246_v38 = vld [vmem:[#allocation3 + $0x1f8] sm:$0xff] }
  0x34   :  { %775 = vmatpush1.msra.mxu0 %v4114_v57  ;;  %846 = vmatpush1.msra.mxu1 %v4116_v58  ;;  %5863 = vst [vmem:[#allocation42_spill] sm:$0xff] %v4244_v37  ;;  %5864 = vst [vmem:[#allocation43_spill] sm:$0xff] %v4246_v38  ;;  %v4250_v39 = vld [vmem:[#allocation3 + $0x1e0] sm:$0xff]  ;;  %v4252_v40 = vld [vmem:[#allocation3 + $0x1f0] sm:$0xff] }
  0x35   :  { %3761 = vmatmul.mubr.msk.f32.gmra.mxu0 %vm261_vm0, %v4072_v26  ;;  %3763 = vmatmul.mubr.msk.f32.gmra.mxu1 %vm261_vm0, %v4072_v26  ;;  %v4210_v26 = vld [vmem:[#allocation3 + $0x258] sm:$0xff]  ;;  %5865 = vst [vmem:[#allocation44_spill] sm:$0xff] %v4250_v39  ;;  %5866 = vst [vmem:[#allocation45_spill] sm:$0xff] %v4252_v40  ;;  %v4256_v41 = vld [vmem:[#allocation3 + $0x1c8] sm:$0xff] }
  0x36   :  { %776 = vmatprep.subr.mxu0 %v4122_v59  ;;  %847 = vmatprep.subr.mxu1 %v4124_v60  ;;  %5852 = vst [vmem:[#allocation31_spill] sm:$0xff] %v4210_v26  ;;  %5867 = vst [vmem:[#allocation46_spill] sm:$0xff] %v4256_v41  ;;  %v4258_v42 = vld [vmem:[#allocation3 + $0x1d8] sm:$0xff]  ;;  %v4262_v43 = vld [vmem:[#allocation3 + $0x1c0] sm:$0xff] }
  0x37   :  { %777 = vmatpush1.msra.mxu0 %v4128_v61  ;;  %848 = vmatpush1.msra.mxu1 %v4130_v62  ;;  %5868 = vst [vmem:[#allocation47_spill] sm:$0xff] %v4258_v42  ;;  %5869 = vst [vmem:[#allocation48_spill] sm:$0xff] %v4262_v43  ;;  %v4264_v44 = vld [vmem:[#allocation3 + $0x1d0] sm:$0xff]  ;;  %v4268_v45 = vld [vmem:[#allocation3 + $0x1a8] sm:$0xff] }
  0x38   :  { %778 = vmatprep.subr.mxu0 %v4136_v63  ;;  %849 = vmatprep.subr.mxu1 %v4138_v1  ;;  %5870 = vst [vmem:[#allocation49_spill] sm:$0xff] %v4264_v44  ;;  %5871 = vst [vmem:[#allocation50_spill] sm:$0xff] %v4268_v45  ;;  %v4270_v46 = vld [vmem:[#allocation3 + $0x1b8] sm:$0xff]  ;;  %v4274_v47 = vld [vmem:[#allocation3 + $0x1a0] sm:$0xff] }
  0x39   :  { %779 = vmatpush1.msra.mxu0 %v4142_v2  ;;  %850 = vmatpush1.msra.mxu1 %v4144_v3  ;;  %5872 = vst [vmem:[#allocation51_spill] sm:$0xff] %v4270_v46  ;;  %5873 = vst [vmem:[#allocation52_spill] sm:$0xff] %v4274_v47  ;;  %v4276_v48 = vld [vmem:[#allocation3 + $0x1b0] sm:$0xff]  ;;  %v4280_v49 = vld [vmem:[#allocation3 + $0x188] sm:$0xff] }
  0x3a   :  { %780 = vmatprep.subr.mxu0 %v4148_v4  ;;  %851 = vmatprep.subr.mxu1 %v4150_v5  ;;  %5874 = vst [vmem:[#allocation53_spill] sm:$0xff] %v4276_v48  ;;  %5875 = vst [vmem:[#allocation54_spill] sm:$0xff] %v4280_v49  ;;  %v4282_v50 = vld [vmem:[#allocation3 + $0x198] sm:$0xff]  ;;  %v4286_v0 = vld [vmem:[#allocation3 + $0x180] sm:$0xff] }
  0x3b   :  { %781 = vmatpush1.msra.mxu0 %v4154_v6  ;;  %852 = vmatpush1.msra.mxu1 %v4156_v7  ;;  %5876 = vst [vmem:[#allocation55_spill] sm:$0xff] %v4282_v50  ;;  %5877 = vst [vmem:[#allocation56_spill] sm:$0xff] %v4286_v0  ;;  %v4290_v17 = vld [vmem:[#allocation3 + $0x190] sm:$0xff] }
  0x3c   :  { %782 = vmatprep.subr.mxu0 %v4160_v8  ;;  %853 = vmatprep.subr.mxu1 %v4162_v9  ;;  %5878 = vst [vmem:[#allocation57_spill] sm:$0xff] %v4290_v17 }
  0x3d   :  { %783 = vmatpush1.msra.mxu0 %v4166_v10  ;;  %854 = vmatpush1.msra.mxu1 %v4168_v11 }
  0x3e   :  { %784 = vmatprep.subr.mxu0 %v4172_v12  ;;  %855 = vmatprep.subr.mxu1 %v4174_v13 }
  0x3f   :  { %785 = vmatpush1.msra.mxu0 %v4178_v14  ;;  %856 = vmatpush1.msra.mxu1 %v4180_v15 }
  0x40   :  { %786 = vmatprep.subr.mxu0 %v4184_v16  ;;  %857 = vmatprep.subr.mxu1 %v4186_v18 }
  0x41   :  { %787 = vmatpush1.msra.mxu0 %v4190_v19  ;;  %858 = vmatpush1.msra.mxu1 %v4192_v20 }
  0x42   :  { %788 = vmatprep.subr.mxu0 %v4196_v21  ;;  %859 = vmatprep.subr.mxu1 %v4198_v22 }
  0x43   :  { %789 = vmatpush1.msra.mxu0 %v4202_v23  ;;  %860 = vmatpush1.msra.mxu1 %v4204_v24 }
  0x44   :  { %790 = vmatprep.subr.mxu0 %v4208_v25  ;;  %861 = vmatprep.subr.mxu1 %v4210_v26 }
  0x45   :  { %791 = vmatpush1.msra.mxu0 %v4214_v27  ;;  %862 = vmatpush1.msra.mxu1 %v4216_v28 }
  0x46   :  { %792 = vmatprep.subr.mxu0 %v4220_v29  ;;  %863 = vmatprep.subr.mxu1 %v4222_v30 }
  0x47   :  { %793 = vmatpush1.msra.mxu0 %v4226_v31  ;;  %864 = vmatpush1.msra.mxu1 %v4228_v32 }
  0x48   :  { %794 = vmatprep.subr.mxu0 %v4232_v33  ;;  %865 = vmatprep.subr.mxu1 %v4234_v34 }
  0x49   :  { %795 = vmatpush1.msra.mxu0 %v4238_v35  ;;  %866 = vmatpush1.msra.mxu1 %v4240_v36 }
  0x4a   :  { %796 = vmatprep.subr.mxu0 %v4244_v37  ;;  %867 = vmatprep.subr.mxu1 %v4246_v38 }
  0x4b   :  { %797 = vmatpush1.msra.mxu0 %v4250_v39  ;;  %868 = vmatpush1.msra.mxu1 %v4252_v40 }
  0x4c   :  { %798 = vmatprep.subr.mxu0 %v4256_v41  ;;  %869 = vmatprep.subr.mxu1 %v4258_v42 }
  0x4d   :  { %799 = vmatpush1.msra.mxu0 %v4262_v43  ;;  %870 = vmatpush1.msra.mxu1 %v4264_v44  ;;  %v4297_v44 = vld [vmem:[%s5669_s3] sm:$0xf]  ;;  %s4024_s3 = smov 48  }
  0x4e   :  { %800 = vmatprep.subr.mxu0 %v4268_v45  ;;  %871 = vmatprep.subr.mxu1 %v4270_v46  ;;  %v5879_v46 = vmov 0.0  }
  0x4f   :  { %801 = vmatpush1.msra.mxu0 %v4274_v47  ;;  %872 = vmatpush1.msra.mxu1 %v4276_v48 }
  0x50   :  { %802 = vmatprep.subr.mxu0 %v4280_v49  ;;  %873 = vmatprep.subr.mxu1 %v4282_v50 }
  0x51   :  { %803 = vmatpush1.msra.mxu0 %v4286_v0  ;;  %836 = vmatprep.mubr.f32.mxu0 %v5879_v46 }
  0x52   :  { %874 = vmatpush1.msra.mxu1 %v4290_v17  ;;  %907 = vmatprep.mubr.f32.mxu1 %v5879_v46 }
  0x53   :  { %837 = vmatmul.mubr.f32.vlgmr.msra.gmra.mxu0 %v4297_v44  ;;  %908 = vmatmul.mubr.f32.vlgmr.msra.gmra.mxu1 %v4297_v44 }
  0x54   :  { %968 = vmatprep.subr.mxu0 %v4093_v51  ;;  %1039 = vmatprep.subr.mxu1 %v4095_v52 }
  0x55   :  { %969 = vmatpush1.msra.mxu0 %v4098_v53  ;;  %1040 = vmatpush1.msra.mxu1 %v4100_v54 }
  0x56   :  { %970 = vmatprep.subr.mxu0 %v4106_v55  ;;  %1041 = vmatprep.subr.mxu1 %v4108_v56 }
  0x57   :  { %971 = vmatpush1.msra.mxu0 %v4114_v57  ;;  %1042 = vmatpush1.msra.mxu1 %v4116_v58 }
  0x58   :  { %972 = vmatprep.subr.mxu0 %v4122_v59  ;;  %1043 = vmatprep.subr.mxu1 %v4124_v60 }
  0x59   :  { %973 = vmatpush1.msra.mxu0 %v4128_v61  ;;  %1044 = vmatpush1.msra.mxu1 %v4130_v62 }
  0x5a   :  { %974 = vmatprep.subr.mxu0 %v4136_v63  ;;  %1045 = vmatprep.subr.mxu1 %v4138_v1 }
  0x5b   :  { %975 = vmatpush1.msra.mxu0 %v4142_v2  ;;  %1046 = vmatpush1.msra.mxu1 %v4144_v3 }
  0x5c   :  { %976 = vmatprep.subr.mxu0 %v4148_v4  ;;  %1047 = vmatprep.subr.mxu1 %v4150_v5 }
  0x5d   :  { %977 = vmatpush1.msra.mxu0 %v4154_v6  ;;  %1048 = vmatpush1.msra.mxu1 %v4156_v7 }
  0x5e   :  { %978 = vmatprep.subr.mxu0 %v4160_v8  ;;  %1049 = vmatprep.subr.mxu1 %v4162_v9 }
  0x5f   :  { %979 = vmatpush1.msra.mxu0 %v4166_v10  ;;  %1050 = vmatpush1.msra.mxu1 %v4168_v11 }
  0x60   :  { %980 = vmatprep.subr.mxu0 %v4172_v12  ;;  %1051 = vmatprep.subr.mxu1 %v4174_v13 }
  0x61   :  { %981 = vmatpush1.msra.mxu0 %v4178_v14  ;;  %1052 = vmatpush1.msra.mxu1 %v4180_v15 }
  0x62   :  { %982 = vmatprep.subr.mxu0 %v4184_v16  ;;  %1053 = vmatprep.subr.mxu1 %v4186_v18 }
  0x63   :  { %983 = vmatpush1.msra.mxu0 %v4190_v19  ;;  %1054 = vmatpush1.msra.mxu1 %v4192_v20 }
  0x64   :  { %984 = vmatprep.subr.mxu0 %v4196_v21  ;;  %1055 = vmatprep.subr.mxu1 %v4198_v22 }
  0x65   :  { %985 = vmatpush1.msra.mxu0 %v4202_v23  ;;  %1056 = vmatpush1.msra.mxu1 %v4204_v24 }
  0x66   :  { %986 = vmatprep.subr.mxu0 %v4208_v25  ;;  %1057 = vmatprep.subr.mxu1 %v4210_v26 }
  0x67   :  { %987 = vmatpush1.msra.mxu0 %v4214_v27  ;;  %1058 = vmatpush1.msra.mxu1 %v4216_v28 }
  0x68   :  { %988 = vmatprep.subr.mxu0 %v4220_v29  ;;  %1059 = vmatprep.subr.mxu1 %v4222_v30 }
  0x69   :  { %989 = vmatpush1.msra.mxu0 %v4226_v31  ;;  %1060 = vmatpush1.msra.mxu1 %v4228_v32 }
  0x6a   :  { %990 = vmatprep.subr.mxu0 %v4232_v33  ;;  %1061 = vmatprep.subr.mxu1 %v4234_v34  ;;  %v5880_v33 = vld [vmem:[#allocation49_spill] sm:$0xff] }
  0x6b   :  { %991 = vmatpush1.msra.mxu0 %v4238_v35  ;;  %1062 = vmatpush1.msra.mxu1 %v4240_v36  ;;  %v5881_v35 = vld [vmem:[#allocation51_spill] sm:$0xff] }
  0x6c   :  { %992 = vmatprep.subr.mxu0 %v4244_v37  ;;  %1063 = vmatprep.subr.mxu1 %v4246_v38 }
  0x6d   :  { %993 = vmatpush1.msra.mxu0 %v4250_v39  ;;  %1064 = vmatpush1.msra.mxu1 %v4252_v40 }
  0x6e   :  { %994 = vmatprep.subr.mxu0 %v4256_v41  ;;  %1065 = vmatprep.subr.mxu1 %v4258_v42 }
  0x6f   :  { %995 = vmatpush1.msra.mxu0 %v4262_v43  ;;  %1066 = vmatpush1.msra.mxu1 %v5880_v33 }
  0x70   :  { %996 = vmatprep.subr.mxu0 %v4268_v45  ;;  %1067 = vmatprep.subr.mxu1 %v5881_v35  ;;  %v144_v45 = vld [vmem:[#allocation3 + $0x380] ss:$8 sm:$0xf] }
  0x71   :  { %997 = vmatpush1.msra.mxu0 %v4274_v47  ;;  %1068 = vmatpush1.msra.mxu1 %v4276_v48  ;;  %v5882_v47 = vld [vmem:[#allocation6_spill] sm:$0xff]  ;;  %v5703_v48 = vlaneseq }
  0x72   :  { %998 = vmatprep.subr.mxu0 %v4280_v49  ;;  %1069 = vmatprep.subr.mxu1 %v4282_v50 }
  0x73   :  { %999 = vmatpush1.msra.mxu0 %v4286_v0  ;;  %1032 = vmatprep.mubr.f32.mxu0 %v5879_v46  ;;  %v4376_v49 = vshrl.u32 %v5703_v48, 7 }
  0x74   :  { %1070 = vmatpush1.msra.mxu1 %v4290_v17  ;;  %1103 = vmatprep.mubr.f32.mxu1 %v5879_v46 }
  0x75   :  { %1174 = vmatprep.subr.mxu0 %v4093_v51  ;;  %1245 = vmatprep.subr.mxu1 %v4095_v52  ;;  %5883 = vst [vmem:[#allocation6_spill] sm:$0xff] %v4376_v49  ;;  %v5724_v35 = vsub.s32 0, %v4376_v49  ;;  %v251_v17 = vsub.s32 2, %v4376_v49  ;;  %v5733_v51 = vsub.s32 1, %v4376_v49  ;;  %v255_v52 = vsub.s32 3, %v4376_v49 }
  0x76   :  { %730 = vrot.lane.b32.xlu0 %v5882_v47, %s4024_s3 }
  0x77   :  { %v244_v47 = vrot.slane %v144_v45, %v5724_v35  ;;  %v252_v43 = vrot.slane %v144_v45, %v251_v17  ;;  %v248_v41 = vrot.slane %v144_v45, %v5733_v51  ;;  %v256_v40 = vrot.slane %v144_v45, %v255_v52 }
  0xd7   :  { %v334_v50 = vpop.f32.mrf.mxu0  ;;  %v411_v0 = vpop.f32.mrf.mxu1 }
  0xd8   :  { %v4390_v31 = vadd.f32 %v334_v50, %v244_v47  ;;  %v4392_v30 = vadd.f32 %v411_v0, %v252_v43 }
  0xd9   :  { %v336_v46 = vpop.f32.mrf.mxu0  ;;  %v413_v33 = vpop.f32.mrf.mxu1 }
  0xda   :  { %v4394_v51 = vadd.f32 %v336_v46, %v248_v41  ;;  %v4408_v26 = vadd.f32 %v413_v33, %v256_v40 }
  0xdd   :  { %v340_v42 = vpop.f32.mrf.mxu0  ;;  %v417_v48 = vpop.f32.mrf.mxu1 }
  0xde   :  { %v341_v39 = vadd.f32 %v340_v42, %v244_v47  ;;  %v418_v38 = vadd.f32 %v417_v48, %v252_v43 }
  0xdf   :  { %v342_v37 = vpop.f32.mrf.mxu0  ;;  %v419_v36 = vpop.f32.mrf.mxu1 }
  0xe0   :  { %v4386_v34 = vadd.f32 %v342_v37, %v248_v41  ;;  %v4388_v32 = vadd.f32 %v419_v36, %v256_v40 }
  0xe3   :  { %v488_v35 = vpop.f32.mrf.mxu0  ;;  %v565_v17 = vpop.f32.mrf.mxu1 }
  0xe4   :  { %v1156_v29 = vrot.slane %v488_v35, 2  ;;  %v1358_v28 = vrot.slane %v488_v35, 6  ;;  %v1158_v27 = vrot.slane %v565_v17, 2  ;;  %v1360_v49 = vrot.slane %v565_v17, 6 }
  0xe5   :  { %v490_v52 = vpop.f32.mrf.mxu0  ;;  %v567_v42 = vpop.f32.mrf.mxu1 }
  0xe6   :  { %v4397_v45 = vadd.f32 %v1156_v29, %v4390_v31  ;;  %v4400_v36 = vadd.f32 %v1358_v28, %v4390_v31  ;;  %v1560_v37 = vadd.f32 %v1156_v29, %v341_v39  ;;  %v1753_v48 = vadd.f32 %v1358_v28, %v341_v39 }
  0xe7   :  { %v4403_v0 = vadd.f32 %v1158_v27, %v4392_v30  ;;  %v4406_v43 = vadd.f32 %v1360_v49, %v4392_v30  ;;  %v1562_v35 = vadd.f32 %v1158_v27, %v418_v38  ;;  %v1755_v50 = vadd.f32 %v1360_v49, %v418_v38 }
  0xe8   :  { %v1157_v41 = vrot.slane %v490_v52, 2  ;;  %v1359_v46 = vrot.slane %v490_v52, 6  ;;  %v1159_v47 = vrot.slane %v567_v42, 2  ;;  %v1361_v17 = vrot.slane %v567_v42, 6 }
  0xe9   :  { %v4410_v25 = vpop.f32.mrf.mxu0  ;;  %v4412_v24 = vpop.f32.mrf.mxu1 }
  0xea   :  { %v4415_v28 = vadd.f32 %v1157_v41, %v4394_v51  ;;  %v4418_v29 = vadd.f32 %v1359_v46, %v4394_v51  ;;  %v1561_v23 = vadd.f32 %v1157_v41, %v4386_v34  ;;  %v1754_v27 = vadd.f32 %v1359_v46, %v4386_v34 }
  0xeb   :  { %v4423_v49 = vadd.f32 %v1159_v47, %v4408_v26  ;;  %v4426_v33 = vadd.f32 %v1361_v17, %v4408_v26  ;;  %v1563_v40 = vadd.f32 %v1159_v47, %v4388_v32  ;;  %v1756_v52 = vadd.f32 %v1361_v17, %v4388_v32  ;;  %v4430_v42 = vpop.f32.mrf.mxu0  ;;  %v4432_v22 = vpop.f32.mrf.mxu1 }
  0xec   :  { %v944_v21 = vrot.slane %v4410_v25, 6  ;;  %v946_v41 = vrot.slane %v4412_v24, 6  ;;  %v945_v46 = vrot.slane %v4430_v42, 6  ;;  %v947_v20 = vrot.slane %v4432_v22, 6 }
  0xee   :  { %v952_v19 = vadd.f32 %v944_v21, %v4390_v31  ;;  %v954_v18 = vadd.f32 %v946_v41, %v4392_v30  ;;  %v953_v47 = vadd.f32 %v945_v46, %v4394_v51  ;;  %v955_v17 = vadd.f32 %v947_v20, %v4408_v26 }
  0xef   :  { %v642_v16 = vpop.f32.mrf.mxu0  ;;  %v719_v15 = vpop.f32.mrf.mxu1 }
  0xf0   :  { %v1568_v14 = vrot.slane %v642_v16, 6  ;;  %v1757_v13 = vrot.slane %v642_v16, 2  ;;  %v1570_v12 = vrot.slane %v719_v15, 6  ;;  %v1759_v11 = vrot.slane %v719_v15, 2 }
  0xf1   :  { %v644_v10 = vpop.f32.mrf.mxu0  ;;  %v721_v9 = vpop.f32.mrf.mxu1 }
  0xf2   :  { %v4442_v8 = vadd.f32 %v1757_v13, %v1753_v48  ;;  %v4444_v7 = vadd.f32 %v1568_v14, %v341_v39  ;;  %v4446_v6 = vadd.f32 %v1757_v13, %v341_v39  ;;  %v4448_v21 = vadd.f32 %v1759_v11, %v1755_v50 }
  0xf3   :  { %v4450_v41 = vadd.f32 %v1570_v12, %v418_v38  ;;  %v4452_v46 = vadd.f32 %v1759_v11, %v418_v38  ;;  %v1569_v20 = vrot.slane %v644_v10, 6  ;;  %v1758_v5 = vrot.slane %v644_v10, 2 }
  0xf4   :  { %5884 = vst [vmem:[#allocation58_spill] sm:$0xff] %v4442_v8  ;;  %5885 = vst [vmem:[#allocation59_spill] sm:$0xff] %v4444_v7  ;;  %v1571_v4 = vrot.slane %v721_v9, 6  ;;  %v1760_v16 = vrot.slane %v721_v9, 2  ;;  %v4454_v3 = vadd.f32 %v1568_v14, %v1560_v37  ;;  %v4456_v15 = vadd.f32 %v1570_v12, %v1562_v35  ;;  %v5941_v8 = vld [vmem:[#allocation42_spill] sm:$0xff] }
  0xf5   :  { %5886 = vst [vmem:[#allocation60_spill] sm:$0xff] %v4446_v6  ;;  %5887 = vst [vmem:[#allocation61_spill] sm:$0xff] %v4448_v21  ;;  %v4458_v48 = vadd.f32 %v1758_v5, %v1754_v27  ;;  %v4461_v7 = vadd.f32 %v1569_v20, %v4386_v34  ;;  %v4464_v13 = vadd.f32 %v1758_v5, %v4386_v34  ;;  %v648_v39 = vpop.f32.mrf.mxu0  ;;  %v725_v50 = vpop.f32.mrf.mxu1  ;;  %v5940_v21 = vld [vmem:[#allocation41_spill] sm:$0xff] }
  0xf6   :  { %5888 = vst [vmem:[#allocation62_spill] sm:$0xff] %v4450_v41  ;;  %5889 = vst [vmem:[#allocation63_spill] sm:$0xff] %v4452_v46  ;;  %v4466_v11 = vadd.f32 %v1569_v20, %v1561_v23  ;;  %v4468_v38 = vadd.f32 %v1760_v16, %v1756_v52  ;;  %v4471_v9 = vadd.f32 %v1571_v4, %v4388_v32  ;;  %v760_v12 = vrot.slane %v648_v39, 6  ;;  %v5937_v41 = vld [vmem:[#allocation38_spill] sm:$0xff] }
  0xf7   :  { %5890 = vst [vmem:[#allocation64_spill] sm:$0xff] %v4454_v3  ;;  %5891 = vst [vmem:[#allocation65_spill] sm:$0xff] %v4456_v15  ;;  %v4474_v10 = vadd.f32 %v1760_v16, %v4388_v32  ;;  %v956_v14 = vrot.slane %v648_v39, 2  ;;  %v762_v37 = vrot.slane %v725_v50, 6  ;;  %v958_v35 = vrot.slane %v725_v50, 2  ;;  %v650_v27 = vpop.f32.mrf.mxu0  ;;  %v727_v46 = vpop.f32.mrf.mxu1  ;;  %v5944_v15 = vld [vmem:[#allocation45_spill] sm:$0xff] }
  0xf8   :  { %5892 = vst [vmem:[#allocation66_spill] sm:$0xff] %v4458_v48  ;;  %5893 = vst [vmem:[#allocation67_spill] sm:$0xff] %v4461_v7  ;;  %v4476_v5 = vadd.f32 %v1571_v4, %v1563_v40  ;;  %v4479_v34 = vadd.f32 %v4397_v45, %v760_v12  ;;  %v761_v23 = vrot.slane %v650_v27, 6  ;;  %v957_v52 = vrot.slane %v650_v27, 2  ;;  %v5936_v7 = vld [vmem:[#allocation37_spill] sm:$0xff]  ;;  %v5939_v48 = vld [vmem:[#allocation40_spill] sm:$0xff] }
  0xf9   :  { %5894 = vst [vmem:[#allocation68_spill] sm:$0xff] %v4464_v13  ;;  %5895 = vst [vmem:[#allocation69_spill] sm:$0xff] %v4466_v11  ;;  %v763_v20 = vrot.slane %v727_v46, 6  ;;  %v4481_v13 = vadd.f32 %v956_v14, %v952_v19  ;;  %v4484_v6 = vadd.f32 %v4400_v36, %v956_v14  ;;  %v4486_v32 = vadd.f32 %v958_v35, %v954_v18  ;;  %v5943_v11 = vld [vmem:[#allocation44_spill] sm:$0xff]  ;;  %v5945_v3 = vld [vmem:[#allocation46_spill] sm:$0xff] }
  0xfa   :  { %5896 = vst [vmem:[#allocation70_spill] sm:$0xff] %v4468_v38  ;;  %5897 = vst [vmem:[#allocation71_spill] sm:$0xff] %v4471_v9  ;;  %v4489_v16 = vadd.f32 %v4403_v0, %v762_v37  ;;  %v4492_v39 = vadd.f32 %v4406_v43, %v958_v35  ;;  %v4494_v4 = vadd.f32 %v957_v52, %v953_v47  ;;  %v959_v19 = vrot.slane %v727_v46, 2  ;;  %v5935_v9 = vld [vmem:[#allocation36_spill] sm:$0xff]  ;;  %v5938_v38 = vld [vmem:[#allocation39_spill] sm:$0xff] }
  0xfb   :  { %5898 = vst [vmem:[#allocation72_spill] sm:$0xff] %v4474_v10  ;;  %5899 = vst [vmem:[#allocation73_spill] sm:$0xff] %v4476_v5  ;;  %v4497_v45 = vadd.f32 %v4415_v28, %v761_v23  ;;  %v4500_v40 = vadd.f32 %v4418_v29, %v957_v52  ;;  %v4503_v36 = vadd.f32 %v4423_v49, %v763_v20  ;;  %v744_v43 = vrot.slane %v4410_v25, 2  ;;  %v5934_v10 = vld [vmem:[#allocation35_spill] sm:$0xff] }
  0xfc   :  { %5900 = vst [vmem:[#allocation74_spill] sm:$0xff] %v4479_v34  ;;  %5901 = vst [vmem:[#allocation75_spill] sm:$0xff] %v4484_v6  ;;  %v4505_v18 = vadd.f32 %v959_v19, %v955_v17  ;;  %v4508_v0 = vadd.f32 %v4426_v33, %v959_v19  ;;  %v745_v47 = vrot.slane %v4430_v42, 2  ;;  %v746_v28 = vrot.slane %v4412_v24, 2  ;;  %v5942_v5 = vld [vmem:[#allocation43_spill] sm:$0xff]  ;;  %v5949_v6 = vld [vmem:[#allocation50_spill] sm:$0xff] }
  0xfd   :  { %5902 = vst [vmem:[#allocation76_spill] sm:$0xff] %v4489_v16  ;;  %5903 = vst [vmem:[#allocation77_spill] sm:$0xff] %v4492_v39  ;;  %v752_v50 = vadd.f32 %v744_v43, %v4390_v31  ;;  %v747_v42 = vrot.slane %v4432_v22, 2  ;;  %v5948_v39 = vld [vmem:[#allocation49_spill] sm:$0xff]  ;;  %v5953_v34 = vld [vmem:[#allocation54_spill] sm:$0xff] }
  0xfe   :  { %5904 = vst [vmem:[#allocation78_spill] sm:$0xff] %v4497_v45  ;;  %5905 = vst [vmem:[#allocation79_spill] sm:$0xff] %v4500_v40  ;;  %v753_v29 = vadd.f32 %v745_v47, %v4394_v51  ;;  %v754_v49 = vadd.f32 %v746_v28, %v4392_v30  ;;  %v5947_v40 = vld [vmem:[#allocation48_spill] sm:$0xff]  ;;  %v5952_v16 = vld [vmem:[#allocation53_spill] sm:$0xff] }
  0xff   :  { %5906 = vst [vmem:[#allocation80_spill] sm:$0xff] %v4503_v36  ;;  %5907 = vst [vmem:[#allocation81_spill] sm:$0xff] %v4508_v0  ;;  %v768_v14 = vadd.f32 %v760_v12, %v752_v50  ;;  %v755_v24 = vadd.f32 %v747_v42, %v4408_v26  ;;  %v731_v12 = vpop.permute.xlu0 %730  ;;  %v5913_v42 = vld [vmem:[#allocation14_spill] sm:$0xff]  ;;  %v5946_v0 = vld [vmem:[#allocation47_spill] sm:$0xff] }
 0x100   :  { %v769_v17 = vadd.f32 %v761_v23, %v753_v29  ;;  %v770_v33 = vadd.f32 %v762_v37, %v754_v49  ;;  %737 = vst.msk [vmem:[#allocation2] sm:$0xff] %vm736_vm1, %v731_v12  ;;  %v931_v37 = vrot.slane %v4297_v44, 2  ;;  %v5908_v44 = vld [vmem:[#allocation9_spill] sm:$0xff]  ;;  %v5917_v12 = vld [vmem:[#allocation18_spill] sm:$0xff]  ;;  %v5950_v36 = vld [vmem:[#allocation51_spill] sm:$0xff] }
 0x101   :  { %v771_v51 = vadd.f32 %v763_v20, %v755_v24  ;;  %v5914_v24 = vld [vmem:[#allocation15_spill] sm:$0xff]  ;;  %v5951_v45 = vld [vmem:[#allocation52_spill] sm:$0xff] }
 0x113   :  { %v838_v46 = vpop.f32.mrf.mxu0  ;;  %v909_v27 = vpop.f32.mrf.mxu1 }
 0x114   :  { %v914_v35 = vadd.f32 %v838_v46, %v768_v14  ;;  %v916_v25 = vadd.f32 %v909_v27, %v770_v33  ;;  %v5910_v33 = vld [vmem:[#allocation11_spill] sm:$0xff] }
 0x115   :  { %v840_v52 = vpop.f32.mrf.mxu0  ;;  %v911_v31 = vpop.f32.mrf.mxu1 }
 0x116   :  { %3787 = vtanh.f32 %v914_v35  ;;  %v915_v19 = vadd.f32 %v840_v52, %v769_v17  ;;  %v917_v43 = vadd.f32 %v911_v31, %v771_v51  ;;  %v5909_v52 = vld [vmem:[#allocation10_spill] sm:$0xff]  ;;  %v5915_v31 = vld [vmem:[#allocation16_spill] sm:$0xff]  ;;  %v5916_v51 = vld [vmem:[#allocation17_spill] sm:$0xff] }
 0x118   :  { %3789 = vtanh.f32 %v915_v19  ;;  %v5911_v19 = vld [vmem:[#allocation12_spill] sm:$0xff] }
 0x119   :  { %3791 = vtanh.f32 %v916_v25  ;;  %v5912_v25 = vld [vmem:[#allocation13_spill] sm:$0xff] }
 0x11a   :  { %3793 = vtanh.f32 %v917_v43  ;;  %v5918_v43 = vld [vmem:[#allocation19_spill] sm:$0xff] }
 0x123   :  { %v3788_v30 = vpop.eup %3787 }
 0x124   :  { %v922_v23 = vmul.f32 0.5, %v3788_v30  ;;  %v5919_v30 = vld [vmem:[#allocation20_spill] sm:$0xff] }
 0x125   :  { %v3790_v47 = vpop.eup %3789 }
 0x126   :  { %v926_v50 = vadd.f32 0.5, %v922_v23  ;;  %v923_v28 = vmul.f32 0.5, %v3790_v47  ;;  %v3792_v22 = vpop.eup %3791  ;;  %v5920_v23 = vld [vmem:[#allocation21_spill] sm:$0xff]  ;;  %v5921_v47 = vld [vmem:[#allocation22_spill] sm:$0xff] }
 0x127   :  { %v3794_v20 = vpop.eup %3793 }
 0x128   :  { %v927_v29 = vadd.f32 0.5, %v923_v28  ;;  %v934_v46 = vmul.f32 %v3792_v22, %v926_v50  ;;  %v925_v49 = vmul.f32 0.5, %v3794_v20  ;;  %v5923_v50 = vld [vmem:[#allocation24_spill] sm:$0xff]  ;;  %v5924_v28 = vld [vmem:[#allocation25_spill] sm:$0xff]  ;;  %v5926_v22 = vld [vmem:[#allocation27_spill] sm:$0xff] }
 0x129   :  { %v5929_v20 = vld [vmem:[#allocation30_spill] sm:$0xff] }
 0x12a   :  { %v933_v14 = vmul.f32 %v931_v37, %v927_v29  ;;  %v929_v35 = vadd.f32 0.5, %v925_v49  ;;  %v5922_v37 = vld [vmem:[#allocation23_spill] sm:$0xff]  ;;  %v5925_v29 = vld [vmem:[#allocation26_spill] sm:$0xff] }
 0x12b   :  { %v5930_v49 = vld [vmem:[#allocation31_spill] sm:$0xff] }
 0x12c   :  { %v4520_v26 = vadd.f32 %v934_v46, %v933_v14  ;;  %v5927_v14 = vld [vmem:[#allocation28_spill] sm:$0xff]  ;;  %v5928_v46 = vld [vmem:[#allocation29_spill] sm:$0xff] }
 0x12e   :  { %3795 = vtanh.f32 %v4520_v26 }
 0x13b   :  { %v3796_v17 = vpop.eup %3795 }
 0x13c   :  { %v937_v27 = vmul.f32 %v3796_v17, %v929_v35  ;;  %v5931_v35 = vld [vmem:[#allocation32_spill] sm:$0xff]  ;;  %v5932_v17 = vld [vmem:[#allocation33_spill] sm:$0xff] }
 0x13e   :  { %939 = vrot.lane.b32.xlu0 %v937_v27, %s4025_s27  ;;  %1033 = vmatmul.mubr.f32.vlgmr.msra.gmra.mxu0 %v937_v27 }
 0x13f   :  { %1104 = vmatmul.mubr.f32.vlgmr.msra.gmra.mxu1 %v937_v27  ;;  %1175 = vmatpush1.msra.mxu0 %v4098_v53  ;;  %v5933_v27 = vld [vmem:[#allocation34_spill] sm:$0xff] }
 0x140   :  { %1246 = vmatpush1.msra.mxu1 %v4100_v54  ;;  %1176 = vmatprep.subr.mxu0 %v4106_v55 }
 0x141   :  { %1247 = vmatprep.subr.mxu1 %v4108_v56  ;;  %1177 = vmatpush1.msra.mxu0 %v4114_v57 }
 0x142   :  { %1248 = vmatpush1.msra.mxu1 %v4116_v58  ;;  %1178 = vmatprep.subr.mxu0 %v4122_v59 }
 0x143   :  { %1249 = vmatprep.subr.mxu1 %v4124_v60  ;;  %1179 = vmatpush1.msra.mxu0 %v4128_v61 }
 0x144   :  { %1250 = vmatpush1.msra.mxu1 %v4130_v62  ;;  %1180 = vmatprep.subr.mxu0 %v4136_v63 }
 0x145   :  { %1251 = vmatprep.subr.mxu1 %v4138_v1  ;;  %1181 = vmatpush1.msra.mxu0 %v4142_v2 }
 0x146   :  { %1252 = vmatpush1.msra.mxu1 %v5908_v44  ;;  %1182 = vmatprep.subr.mxu0 %v5909_v52 }
 0x147   :  { %1253 = vmatprep.subr.mxu1 %v5910_v33  ;;  %1183 = vmatpush1.msra.mxu0 %v5911_v19 }
 0x148   :  { %1254 = vmatpush1.msra.mxu1 %v5912_v25  ;;  %1184 = vmatprep.subr.mxu0 %v5913_v42 }
 0x149   :  { %1255 = vmatprep.subr.mxu1 %v5914_v24  ;;  %1185 = vmatpush1.msra.mxu0 %v5915_v31 }
 0x14a   :  { %1256 = vmatpush1.msra.mxu1 %v5916_v51  ;;  %1186 = vmatprep.subr.mxu0 %v5917_v12 }
 0x14b   :  { %1257 = vmatprep.subr.mxu1 %v5918_v43  ;;  %1187 = vmatpush1.msra.mxu0 %v5919_v30 }
 0x14c   :  { %1258 = vmatpush1.msra.mxu1 %v5920_v23  ;;  %1188 = vmatprep.subr.mxu0 %v5921_v47 }
 0x14d   :  { %1259 = vmatprep.subr.mxu1 %v5922_v37  ;;  %1189 = vmatpush1.msra.mxu0 %v5923_v50 }
 0x14e   :  { %1260 = vmatpush1.msra.mxu1 %v5924_v28  ;;  %1190 = vmatprep.subr.mxu0 %v5925_v29 }
 0x14f   :  { %1261 = vmatprep.subr.mxu1 %v5926_v22  ;;  %1191 = vmatpush1.msra.mxu0 %v5927_v14 }
 0x150   :  { %1262 = vmatpush1.msra.mxu1 %v5928_v46  ;;  %1192 = vmatprep.subr.mxu0 %v5929_v20 }
 0x151   :  { %1263 = vmatprep.subr.mxu1 %v5930_v49  ;;  %1193 = vmatpush1.msra.mxu0 %v5931_v35 }
 0x152   :  { %1264 = vmatpush1.msra.mxu1 %v5932_v17  ;;  %1194 = vmatprep.subr.mxu0 %v5933_v27 }
 0x153   :  { %1265 = vmatprep.subr.mxu1 %v5934_v10  ;;  %1195 = vmatpush1.msra.mxu0 %v5935_v9 }
 0x154   :  { %1266 = vmatpush1.msra.mxu1 %v5936_v7  ;;  %1196 = vmatprep.subr.mxu0 %v5937_v41 }
 0x155   :  { %1267 = vmatprep.subr.mxu1 %v5938_v38  ;;  %1197 = vmatpush1.msra.mxu0 %v5939_v48 }
 0x156   :  { %1268 = vmatpush1.msra.mxu1 %v5940_v21  ;;  %1198 = vmatprep.subr.mxu0 %v5941_v8 }
 0x157   :  { %1269 = vmatprep.subr.mxu1 %v5942_v5  ;;  %1199 = vmatpush1.msra.mxu0 %v5943_v11  ;;  %v5954_v11 = vld [vmem:[#allocation55_spill] sm:$0xff] }
 0x158   :  { %1270 = vmatpush1.msra.mxu1 %v5944_v15  ;;  %1200 = vmatprep.subr.mxu0 %v5945_v3  ;;  %v5955_v15 = vld [vmem:[#allocation56_spill] sm:$0xff]  ;;  %v5956_v3 = vmov 0.0  }
 0x159   :  { %1271 = vmatprep.subr.mxu1 %v5946_v0  ;;  %1201 = vmatpush1.msra.mxu0 %v5947_v40  ;;  %v5957_v0 = vld [vmem:[#allocation57_spill] sm:$0xff] }
 0x15a   :  { %1272 = vmatpush1.msra.mxu1 %v5948_v39  ;;  %1202 = vmatprep.subr.mxu0 %v5949_v6  ;;  %v5958_v39 = vld [vmem:[#allocation7_spill] sm:$0xff]  ;;  %v5959_v6 = vld [vmem:[#allocation8_spill] sm:$0xff] }
 0x15b   :  { %1273 = vmatprep.subr.mxu1 %v5950_v36  ;;  %1203 = vmatpush1.msra.mxu0 %v5951_v45 }
 0x15c   :  { %1274 = vmatpush1.msra.mxu1 %v5952_v16  ;;  %1204 = vmatprep.subr.mxu0 %v5953_v34 }
 0x15d   :  { %1275 = vmatprep.subr.mxu1 %v5954_v11  ;;  %1205 = vmatpush1.msra.mxu0 %v5955_v15 }
 0x15e   :  { %1238 = vmatprep.mubr.f32.mxu0 %v5956_v3  ;;  %1276 = vmatpush1.msra.mxu1 %v5957_v0 }
 0x15f   :  { %1309 = vmatprep.mubr.f32.mxu1 %v5956_v3  ;;  %1376 = vmatprep.subr.mxu0 %v5958_v39 }
 0x160   :  { %1447 = vmatprep.subr.mxu1 %v5959_v6 }
 0x1b0   :  { %v940_v45 = vpop.permute.xlu0 %939 }
 0x1b1   :  { %943 = vst.msk [vmem:[#allocation2] sm:$0x3] %vm942_vm2, %v940_v45 }
 0x1fe   :  { %v1034_v16 = vpop.f32.mrf.mxu0 }
 0x1ff   :  { %v1114_v34 = vrot.slane %v1034_v16, 6  ;;  %v1105_v36 = vpop.f32.mrf.mxu1 }
 0x200   :  { %v1116_v11 = vrot.slane %v1105_v36, 6  ;;  %v1036_v40 = vpop.f32.mrf.mxu0 }
 0x201   :  { %v1122_v15 = vadd.f32 %v1114_v34, %v4481_v13  ;;  %v1115_v5 = vrot.slane %v1036_v40, 6  ;;  %v1107_v6 = vpop.f32.mrf.mxu1 }
 0x202   :  { %v1124_v0 = vadd.f32 %v1116_v11, %v4486_v32  ;;  %v1117_v39 = vrot.slane %v1107_v6, 6 }
 0x203   :  { %3797 = vtanh.f32 %v1122_v15  ;;  %v1123_v3 = vadd.f32 %v1115_v5, %v4494_v4  ;;  %v1139_v15 = vrot.slane %v4520_v26, 6  ;;  %v4667_v26 = vld [vmem:[#allocation3 + $0x378] sm:$0xff] }
 0x204   :  { %v1125_v8 = vadd.f32 %v1117_v39, %v4505_v18  ;;  %5981 = vst [vmem:[#allocation10_spill] sm:$0xff] %v4667_v26 }
 0x205   :  { %3799 = vtanh.f32 %v1123_v3 }
 0x206   :  { %3801 = vtanh.f32 %v1124_v0  ;;  %v4664_v0 = vld [vmem:[#allocation3 + $0x368] sm:$0xff] }
 0x207   :  { %3803 = vtanh.f32 %v1125_v8  ;;  %v5974_v8 = vld [vmem:[#allocation53_spill] sm:$0xff]  ;;  %5980 = vst [vmem:[#allocation9_spill] sm:$0xff] %v4664_v0 }
 0x210   :  { %v3798_v45 = vpop.eup %3797 }
 0x211   :  { %v1130_v21 = vmul.f32 0.5, %v3798_v45 }
 0x212   :  { %v3800_v16 = vpop.eup %3799 }
 0x213   :  { %v1134_v48 = vadd.f32 0.5, %v1130_v21  ;;  %v1131_v36 = vmul.f32 0.5, %v3800_v16  ;;  %v3802_v38 = vpop.eup %3801 }
 0x214   :  { %v3804_v3 = vpop.eup %3803 }
 0x215   :  { %v1135_v13 = vadd.f32 0.5, %v1131_v36  ;;  %v1142_v34 = vmul.f32 %v3802_v38, %v1134_v48  ;;  %v1133_v5 = vmul.f32 0.5, %v3804_v3  ;;  %v5976_v48 = vld [vmem:[#allocation55_spill] sm:$0xff]  ;;  %v5977_v38 = vld [vmem:[#allocation56_spill] sm:$0xff] }
 0x216   :  { %v4686_v3 = vld [vmem:[#allocation3 + $0x348] sm:$0xff] }
 0x217   :  { %v1141_v11 = vmul.f32 %v1139_v15, %v1135_v13  ;;  %v1137_v4 = vadd.f32 0.5, %v1133_v5  ;;  %v4689_v5 = vld [vmem:[#allocation3 + $0x358] sm:$0xff] }
 0x219   :  { %v4596_v32 = vadd.f32 %v1142_v34, %v1141_v11  ;;  %v4680_v11 = vld [vmem:[#allocation3 + $0x360] sm:$0xff] }
 0x21b   :  { %3805 = vtanh.f32 %v4596_v32 }
 0x228   :  { %v3806_v40 = vpop.eup %3805 }
 0x229   :  { %v1145_v18 = vmul.f32 %v3806_v40, %v1137_v4  ;;  %v4692_v4 = vld [vmem:[#allocation3 + $0x340] sm:$0xff]  ;;  %v4695_v40 = vld [vmem:[#allocation3 + $0x350] sm:$0xff] }
 0x22b   :  { %1147 = vrot.lane.b32.xlu1 %v1145_v18, %s4025_s27  ;;  %v1172_v21 = vrot.slane %v1145_v18, 2  ;;  %v4698_v18 = vld [vmem:[#allocation3 + $0x328] sm:$0xff] }
 0x22d   :  { %1239 = vmatmul.mubr.f32.vlgmr.msra.gmra.mxu0 %v1172_v21  ;;  %1310 = vmatmul.mubr.f32.vlgmr.msra.gmra.mxu1 %v1172_v21  ;;  %v4701_v21 = vld [vmem:[#allocation3 + $0x338] sm:$0xff] }
 0x22e   :  { %1377 = vmatpush1.msra.mxu0 %v4098_v53  ;;  %1448 = vmatpush1.msra.mxu1 %v4100_v54  ;;  %v5960_v53 = vld [vmem:[#allocation39_spill] sm:$0xff]  ;;  %v5961_v54 = vld [vmem:[#allocation40_spill] sm:$0xff] }
 0x22f   :  { %1378 = vmatprep.subr.mxu0 %v4106_v55  ;;  %1449 = vmatprep.subr.mxu1 %v4108_v56  ;;  %v5962_v55 = vld [vmem:[#allocation41_spill] sm:$0xff]  ;;  %v5963_v56 = vld [vmem:[#allocation42_spill] sm:$0xff] }
 0x230   :  { %1379 = vmatpush1.msra.mxu0 %v4114_v57  ;;  %1450 = vmatpush1.msra.mxu1 %v4116_v58  ;;  %v5964_v57 = vld [vmem:[#allocation43_spill] sm:$0xff]  ;;  %v5965_v58 = vld [vmem:[#allocation44_spill] sm:$0xff] }
 0x231   :  { %1380 = vmatprep.subr.mxu0 %v4122_v59  ;;  %1451 = vmatprep.subr.mxu1 %v4124_v60  ;;  %v5966_v59 = vld [vmem:[#allocation45_spill] sm:$0xff]  ;;  %v5967_v60 = vld [vmem:[#allocation46_spill] sm:$0xff] }
 0x232   :  { %1381 = vmatpush1.msra.mxu0 %v4128_v61  ;;  %1452 = vmatpush1.msra.mxu1 %v4130_v62  ;;  %v5968_v61 = vld [vmem:[#allocation47_spill] sm:$0xff]  ;;  %v5969_v62 = vld [vmem:[#allocation48_spill] sm:$0xff] }
 0x233   :  { %1382 = vmatprep.subr.mxu0 %v4136_v63  ;;  %1453 = vmatprep.subr.mxu1 %v4138_v1  ;;  %v5970_v63 = vld [vmem:[#allocation49_spill] sm:$0xff]  ;;  %v5971_v1 = vld [vmem:[#allocation50_spill] sm:$0xff] }
 0x234   :  { %1383 = vmatpush1.msra.mxu0 %v4142_v2  ;;  %1454 = vmatpush1.msra.mxu1 %v5908_v44  ;;  %v5972_v2 = vld [vmem:[#allocation51_spill] sm:$0xff] }
 0x235   :  { %1384 = vmatprep.subr.mxu0 %v5909_v52  ;;  %1455 = vmatprep.subr.mxu1 %v5910_v33 }
 0x236   :  { %1385 = vmatpush1.msra.mxu0 %v5911_v19  ;;  %1456 = vmatpush1.msra.mxu1 %v5912_v25 }
 0x237   :  { %1386 = vmatprep.subr.mxu0 %v5913_v42  ;;  %1457 = vmatprep.subr.mxu1 %v5914_v24  ;;  %v5982_v24 = vld [vmem:[#allocation74_spill] sm:$0xff] }
 0x238   :  { %1387 = vmatpush1.msra.mxu0 %v5915_v31  ;;  %1458 = vmatpush1.msra.mxu1 %v5916_v51 }
 0x239   :  { %1388 = vmatprep.subr.mxu0 %v5917_v12  ;;  %1459 = vmatprep.subr.mxu1 %v5918_v43  ;;  %v5983_v12 = vld [vmem:[#allocation76_spill] sm:$0xff] }
 0x23a   :  { %1389 = vmatpush1.msra.mxu0 %v5919_v30  ;;  %1460 = vmatpush1.msra.mxu1 %v5920_v23  ;;  %v5984_v30 = vld [vmem:[#allocation78_spill] sm:$0xff] }
 0x23b   :  { %1390 = vmatprep.subr.mxu0 %v5921_v47  ;;  %1461 = vmatprep.subr.mxu1 %v5922_v37 }
 0x23c   :  { %1391 = vmatpush1.msra.mxu0 %v5923_v50  ;;  %1462 = vmatpush1.msra.mxu1 %v5924_v28  ;;  %v5985_v50 = vld [vmem:[#allocation80_spill] sm:$0xff] }
 0x23d   :  { %1392 = vmatprep.subr.mxu0 %v5925_v29  ;;  %1463 = vmatprep.subr.mxu1 %v5926_v22 }
 0x23e   :  { %1393 = vmatpush1.msra.mxu0 %v5927_v14  ;;  %1464 = vmatpush1.msra.mxu1 %v5928_v46 }
 0x23f   :  { %1394 = vmatprep.subr.mxu0 %v5929_v20  ;;  %1465 = vmatprep.subr.mxu1 %v5930_v49 }
 0x240   :  { %1395 = vmatpush1.msra.mxu0 %v5931_v35  ;;  %1466 = vmatpush1.msra.mxu1 %v5932_v17  ;;  %v1345_v17 = vrot.slane %v4596_v32, 6  ;;  %v4683_v32 = vld [vmem:[#allocation3 + $0x370] sm:$0xff] }
 0x241   :  { %1396 = vmatprep.subr.mxu0 %v5933_v27  ;;  %1467 = vmatprep.subr.mxu1 %v5934_v10  ;;  %v5979_v10 = vld [vmem:[#allocation57_spill] sm:$0xff] }
 0x242   :  { %1397 = vmatpush1.msra.mxu0 %v5935_v9  ;;  %1468 = vmatpush1.msra.mxu1 %v5936_v7  ;;  %v5973_v7 = vld [vmem:[#allocation52_spill] sm:$0xff]  ;;  %v5978_v9 = vmov 0.0  }
 0x243   :  { %1398 = vmatprep.subr.mxu0 %v5937_v41  ;;  %1469 = vmatprep.subr.mxu1 %v5960_v53  ;;  %v5975_v41 = vld [vmem:[#allocation54_spill] sm:$0xff] }
 0x244   :  { %1399 = vmatpush1.msra.mxu0 %v5961_v54  ;;  %1470 = vmatpush1.msra.mxu1 %v5962_v55  ;;  %v4704_v53 = vld [vmem:[#allocation3 + $0x320] sm:$0xff]  ;;  %v4707_v54 = vld [vmem:[#allocation3 + $0x330] sm:$0xff]  ;;  %v4710_v55 = vld [vmem:[#allocation3 + $0x308] sm:$0xff] }
 0x245   :  { %1400 = vmatprep.subr.mxu0 %v5963_v56  ;;  %1471 = vmatprep.subr.mxu1 %v5964_v57  ;;  %v4713_v56 = vld [vmem:[#allocation3 + $0x318] sm:$0xff]  ;;  %v4716_v57 = vld [vmem:[#allocation3 + $0x300] sm:$0xff] }
 0x246   :  { %1401 = vmatpush1.msra.mxu0 %v5965_v58  ;;  %1472 = vmatpush1.msra.mxu1 %v5966_v59  ;;  %v4719_v58 = vld [vmem:[#allocation3 + $0x310] sm:$0xff]  ;;  %v4722_v59 = vld [vmem:[#allocation3 + $0x2e8] sm:$0xff] }
 0x247   :  { %1402 = vmatprep.subr.mxu0 %v5967_v60  ;;  %1473 = vmatprep.subr.mxu1 %v5968_v61  ;;  %v4725_v60 = vld [vmem:[#allocation3 + $0x2f8] sm:$0xff]  ;;  %v4728_v61 = vld [vmem:[#allocation3 + $0x2e0] sm:$0xff] }
 0x248   :  { %1403 = vmatpush1.msra.mxu0 %v5969_v62  ;;  %1474 = vmatpush1.msra.mxu1 %v5970_v63  ;;  %v4731_v62 = vld [vmem:[#allocation3 + $0x2f0] sm:$0xff]  ;;  %v4734_v63 = vld [vmem:[#allocation3 + $0x2c8] sm:$0xff] }
 0x249   :  { %1404 = vmatprep.subr.mxu0 %v5971_v1  ;;  %1475 = vmatprep.subr.mxu1 %v5972_v2  ;;  %v4737_v1 = vld [vmem:[#allocation3 + $0x2d8] sm:$0xff]  ;;  %v4740_v2 = vld [vmem:[#allocation3 + $0x2c0] sm:$0xff] }
 0x24a   :  { %1405 = vmatpush1.msra.mxu0 %v5973_v7  ;;  %1476 = vmatpush1.msra.mxu1 %v5974_v8  ;;  %v4743_v7 = vld [vmem:[#allocation3 + $0x2d0] sm:$0xff]  ;;  %v4746_v8 = vld [vmem:[#allocation3 + $0x2a8] sm:$0xff] }
 0x24b   :  { %1406 = vmatprep.subr.mxu0 %v5975_v41  ;;  %1477 = vmatprep.subr.mxu1 %v5976_v48  ;;  %v4749_v41 = vld [vmem:[#allocation3 + $0x2b8] sm:$0xff]  ;;  %v4752_v48 = vld [vmem:[#allocation3 + $0x2a0] sm:$0xff] }
 0x24c   :  { %1407 = vmatpush1.msra.mxu0 %v5977_v38  ;;  %1440 = vmatprep.mubr.f32.mxu0 %v5978_v9  ;;  %v4755_v38 = vld [vmem:[#allocation3 + $0x2b0] sm:$0xff] }
 0x24d   :  { %1478 = vmatpush1.msra.mxu1 %v5979_v10  ;;  %1511 = vmatprep.mubr.f32.mxu1 %v5978_v9  ;;  %v4758_v10 = vld [vmem:[#allocation3 + $0x288] sm:$0xff] }
 0x24e   :  { %1582 = vmatprep.subr.mxu0 %v4664_v0  ;;  %1653 = vmatprep.subr.mxu1 %v4667_v26 }
 0x29d   :  { %v1148_v44 = vpop.permute.xlu1 %1147 }
 0x29e   :  { %1151 = vst.msk [vmem:[#allocation2] sm:$0xc] %vm1150_vm3, %v1148_v44  ;;  %v4761_v44 = vld [vmem:[#allocation3 + $0x298] sm:$0xff] }
 0x2ed   :  { %v1240_v52 = vpop.f32.mrf.mxu0  ;;  %v1311_v33 = vpop.f32.mrf.mxu1 }
 0x2ee   :  { %v1320_v19 = vrot.slane %v1240_v52, 4  ;;  %v1322_v25 = vrot.slane %v1311_v33, 4  ;;  %v4764_v52 = vld [vmem:[#allocation3 + $0x280] sm:$0xff]  ;;  %v4767_v33 = vld [vmem:[#allocation3 + $0x290] sm:$0xff] }
 0x2ef   :  { %v1242_v42 = vpop.f32.mrf.mxu0  ;;  %v1313_v47 = vpop.f32.mrf.mxu1 }
 0x2f0   :  { %v1328_v31 = vadd.f32 %v1320_v19, %v5982_v24  ;;  %v1321_v51 = vrot.slane %v1242_v42, 4  ;;  %v1330_v43 = vadd.f32 %v1322_v25, %v5983_v12  ;;  %v1323_v37 = vrot.slane %v1313_v47, 4  ;;  %v4770_v19 = vld [vmem:[#allocation3 + $0x268] sm:$0xff]  ;;  %v4773_v25 = vld [vmem:[#allocation3 + $0x278] sm:$0xff]  ;;  %v4776_v42 = vld [vmem:[#allocation3 + $0x260] sm:$0xff] }
 0x2f1   :  { %v4779_v24 = vld [vmem:[#allocation3 + $0x270] sm:$0xff]  ;;  %v4788_v12 = vld [vmem:[#allocation3 + $0x240] sm:$0xff] }
 0x2f2   :  { %3807 = vtanh.f32 %v1328_v31  ;;  %v1329_v23 = vadd.f32 %v1321_v51, %v5984_v30  ;;  %v1331_v28 = vadd.f32 %v1323_v37, %v5985_v50  ;;  %v4782_v31 = vld [vmem:[#allocation3 + $0x248] sm:$0xff]  ;;  %v4785_v51 = vld [vmem:[#allocation3 + $0x258] sm:$0xff]  ;;  %v4800_v47 = vld [vmem:[#allocation3 + $0x220] sm:$0xff] }
 0x2f3   :  { %v4794_v30 = vld [vmem:[#allocation3 + $0x228] sm:$0xff]  ;;  %v4803_v37 = vld [vmem:[#allocation3 + $0x230] sm:$0xff] }
 0x2f4   :  { %3809 = vtanh.f32 %v1329_v23  ;;  %v4797_v23 = vld [vmem:[#allocation3 + $0x238] sm:$0xff]  ;;  %v4806_v50 = vld [vmem:[#allocation3 + $0x208] sm:$0xff] }
 0x2f5   :  { %3811 = vtanh.f32 %v1330_v43  ;;  %v4791_v43 = vld [vmem:[#allocation3 + $0x250] sm:$0xff] }
 0x2f6   :  { %3813 = vtanh.f32 %v1331_v28  ;;  %v4809_v28 = vld [vmem:[#allocation3 + $0x218] sm:$0xff] }
 0x2f7   :  { %5986 = vst [vmem:[#allocation11_spill] sm:$0xff] %v4809_v28 }
 0x2ff   :  { %v3808_v29 = vpop.eup %3807 }
 0x300   :  { %v1336_v22 = vmul.f32 0.5, %v3808_v29  ;;  %v4812_v29 = vld [vmem:[#allocation3 + $0x200] sm:$0xff] }
 0x301   :  { %v3810_v14 = vpop.eup %3809  ;;  %5987 = vst [vmem:[#allocation12_spill] sm:$0xff] %v4812_v29 }
 0x302   :  { %v1340_v46 = vadd.f32 0.5, %v1336_v22  ;;  %v1337_v20 = vmul.f32 0.5, %v3810_v14  ;;  %v3812_v49 = vpop.eup %3811  ;;  %v4815_v22 = vld [vmem:[#allocation3 + $0x210] sm:$0xff]  ;;  %v4818_v14 = vld [vmem:[#allocation3 + $0x1e8] sm:$0xff] }
 0x303   :  { %v3814_v45 = vpop.eup %3813  ;;  %5988 = vst [vmem:[#allocation13_spill] sm:$0xff] %v4815_v22  ;;  %5989 = vst [vmem:[#allocation14_spill] sm:$0xff] %v4818_v14 }
 0x304   :  { %v1341_v35 = vadd.f32 0.5, %v1337_v20  ;;  %v1348_v27 = vmul.f32 %v3812_v49, %v1340_v46  ;;  %v1339_v16 = vmul.f32 0.5, %v3814_v45  ;;  %v4821_v46 = vld [vmem:[#allocation3 + $0x1f8] sm:$0xff]  ;;  %v4824_v20 = vld [vmem:[#allocation3 + $0x1e0] sm:$0xff]  ;;  %v4827_v49 = vld [vmem:[#allocation3 + $0x1f0] sm:$0xff] }
 0x305   :  { %5990 = vst [vmem:[#allocation15_spill] sm:$0xff] %v4821_v46  ;;  %5991 = vst [vmem:[#allocation16_spill] sm:$0xff] %v4824_v20  ;;  %v4842_v45 = vld [vmem:[#allocation3 + $0x1a8] sm:$0xff] }
 0x306   :  { %v1347_v6 = vmul.f32 %v1345_v17, %v1341_v35  ;;  %v1343_v36 = vadd.f32 0.5, %v1339_v16  ;;  %5992 = vst [vmem:[#allocation17_spill] sm:$0xff] %v4827_v49  ;;  %v4830_v35 = vld [vmem:[#allocation3 + $0x1c8] sm:$0xff]  ;;  %v4833_v17 = vld [vmem:[#allocation3 + $0x1d8] sm:$0xff]  ;;  %5997 = vst [vmem:[#allocation22_spill] sm:$0xff] %v4842_v45 }
 0x307   :  { %5993 = vst [vmem:[#allocation18_spill] sm:$0xff] %v4830_v35  ;;  %5994 = vst [vmem:[#allocation19_spill] sm:$0xff] %v4833_v17  ;;  %v4845_v16 = vld [vmem:[#allocation3 + $0x1b8] sm:$0xff] }
 0x308   :  { %v4676_v39 = vadd.f32 %v1348_v27, %v1347_v6  ;;  %v4836_v27 = vld [vmem:[#allocation3 + $0x1c0] sm:$0xff]  ;;  %v4839_v6 = vld [vmem:[#allocation3 + $0x1d0] sm:$0xff]  ;;  %5998 = vst [vmem:[#allocation23_spill] sm:$0xff] %v4845_v16 }
 0x309   :  { %5995 = vst [vmem:[#allocation20_spill] sm:$0xff] %v4836_v27  ;;  %5996 = vst [vmem:[#allocation21_spill] sm:$0xff] %v4839_v6 }
 0x30a   :  { %3815 = vtanh.f32 %v4676_v39 }
 0x317   :  { %v3816_v13 = vpop.eup %3815 }
 0x318   :  { %v1351_v15 = vmul.f32 %v3816_v13, %v1343_v36  ;;  %v4848_v36 = vld [vmem:[#allocation3 + $0x1a0] sm:$0xff]  ;;  %v4851_v13 = vld [vmem:[#allocation3 + $0x1b0] sm:$0xff] }
 0x319   :  { %5999 = vst [vmem:[#allocation24_spill] sm:$0xff] %v4848_v36  ;;  %6000 = vst [vmem:[#allocation25_spill] sm:$0xff] %v4851_v13 }
 0x31a   :  { %1353 = vrot.lane.b32.xlu1 %v1351_v15, %s4025_s27  ;;  %v1374_v34 = vrot.slane %v1351_v15, 4  ;;  %v4854_v15 = vld [vmem:[#allocation3 + $0x188] sm:$0xff] }
 0x31b   :  { %6001 = vst [vmem:[#allocation26_spill] sm:$0xff] %v4854_v15 }
 0x31c   :  { %1441 = vmatmul.mubr.f32.vlgmr.msra.gmra.mxu0 %v1374_v34  ;;  %1512 = vmatmul.mubr.f32.vlgmr.msra.gmra.mxu1 %v1374_v34  ;;  %v4857_v34 = vld [vmem:[#allocation3 + $0x198] sm:$0xff] }
 0x31d   :  { %1583 = vmatpush1.msra.mxu0 %v4680_v11  ;;  %1654 = vmatpush1.msra.mxu1 %v4683_v32  ;;  %6002 = vst [vmem:[#allocation27_spill] sm:$0xff] %v4857_v34 }
 0x31e   :  { %1584 = vmatprep.subr.mxu0 %v4686_v3  ;;  %1655 = vmatprep.subr.mxu1 %v4689_v5 }
 0x31f   :  { %1585 = vmatpush1.msra.mxu0 %v4692_v4  ;;  %1656 = vmatpush1.msra.mxu1 %v4695_v40 }
 0x320   :  { %1586 = vmatprep.subr.mxu0 %v4698_v18  ;;  %1657 = vmatprep.subr.mxu1 %v4701_v21 }
 0x321   :  { %1587 = vmatpush1.msra.mxu0 %v4704_v53  ;;  %1658 = vmatpush1.msra.mxu1 %v4707_v54 }
 0x322   :  { %1588 = vmatprep.subr.mxu0 %v4710_v55  ;;  %1659 = vmatprep.subr.mxu1 %v4713_v56 }
 0x323   :  { %1589 = vmatpush1.msra.mxu0 %v4716_v57  ;;  %1660 = vmatpush1.msra.mxu1 %v4719_v58 }
 0x324   :  { %1590 = vmatprep.subr.mxu0 %v4722_v59  ;;  %1661 = vmatprep.subr.mxu1 %v4725_v60 }
 0x325   :  { %1591 = vmatpush1.msra.mxu0 %v4728_v61  ;;  %1662 = vmatpush1.msra.mxu1 %v4731_v62 }
 0x326   :  { %1592 = vmatprep.subr.mxu0 %v4734_v63  ;;  %1663 = vmatprep.subr.mxu1 %v4737_v1 }
 0x327   :  { %1593 = vmatpush1.msra.mxu0 %v4740_v2  ;;  %1664 = vmatpush1.msra.mxu1 %v4743_v7 }
 0x328   :  { %1594 = vmatprep.subr.mxu0 %v4746_v8  ;;  %1665 = vmatprep.subr.mxu1 %v4749_v41 }
 0x329   :  { %1595 = vmatpush1.msra.mxu0 %v4752_v48  ;;  %1666 = vmatpush1.msra.mxu1 %v4755_v38 }
 0x32a   :  { %1596 = vmatprep.subr.mxu0 %v4758_v10  ;;  %1667 = vmatprep.subr.mxu1 %v4761_v44 }
 0x32b   :  { %1597 = vmatpush1.msra.mxu0 %v4764_v52  ;;  %1668 = vmatpush1.msra.mxu1 %v4767_v33 }
 0x32c   :  { %1598 = vmatprep.subr.mxu0 %v4770_v19  ;;  %1669 = vmatprep.subr.mxu1 %v4773_v25 }
 0x32d   :  { %1599 = vmatpush1.msra.mxu0 %v4776_v42  ;;  %1670 = vmatpush1.msra.mxu1 %v4779_v24 }
 0x32e   :  { %1600 = vmatprep.subr.mxu0 %v4782_v31  ;;  %1671 = vmatprep.subr.mxu1 %v4785_v51 }
 0x32f   :  { %1601 = vmatpush1.msra.mxu0 %v4788_v12  ;;  %1672 = vmatpush1.msra.mxu1 %v4791_v43 }
 0x330   :  { %1602 = vmatprep.subr.mxu0 %v4794_v30  ;;  %1673 = vmatprep.subr.mxu1 %v4797_v23 }
 0x331   :  { %1603 = vmatpush1.msra.mxu0 %v4800_v47  ;;  %1674 = vmatpush1.msra.mxu1 %v4803_v37 }
 0x332   :  { %1604 = vmatprep.subr.mxu0 %v4806_v50  ;;  %1675 = vmatprep.subr.mxu1 %v4809_v28 }
 0x333   :  { %1605 = vmatpush1.msra.mxu0 %v4812_v29  ;;  %1676 = vmatpush1.msra.mxu1 %v4815_v22 }
 0x334   :  { %1606 = vmatprep.subr.mxu0 %v4818_v14  ;;  %1677 = vmatprep.subr.mxu1 %v4821_v46  ;;  %v6008_v46 = vld [vmem:[#allocation81_spill] sm:$0xff] }
 0x335   :  { %1607 = vmatpush1.msra.mxu0 %v4824_v20  ;;  %1678 = vmatpush1.msra.mxu1 %v4827_v49 }
 0x336   :  { %1608 = vmatprep.subr.mxu0 %v4830_v35  ;;  %1679 = vmatprep.subr.mxu1 %v4833_v17  ;;  %v6007_v35 = vld [vmem:[#allocation79_spill] sm:$0xff] }
 0x337   :  { %1609 = vmatpush1.msra.mxu0 %v4836_v27  ;;  %1680 = vmatpush1.msra.mxu1 %v4839_v6 }
 0x338   :  { %1610 = vmatprep.subr.mxu0 %v4842_v45  ;;  %1681 = vmatprep.subr.mxu1 %v4845_v16  ;;  %v4860_v45 = vld [vmem:[#allocation3 + $0x180] sm:$0xff]  ;;  %v4864_v16 = vld [vmem:[#allocation3 + $0x190] sm:$0xff] }
 0x339   :  { %1611 = vmatpush1.msra.mxu0 %v4848_v36  ;;  %1682 = vmatpush1.msra.mxu1 %v4851_v13  ;;  %6003 = vst [vmem:[#allocation28_spill] sm:$0xff] %v4860_v45  ;;  %6004 = vst [vmem:[#allocation29_spill] sm:$0xff] %v4864_v16 }
 0x33a   :  { %1612 = vmatprep.subr.mxu0 %v4854_v15  ;;  %1683 = vmatprep.subr.mxu1 %v4857_v34  ;;  %v3997_v34 = vld [vmem:[%s5666_s0 + $0x8] sm:$0xff] }
 0x33b   :  { %1613 = vmatpush1.msra.mxu0 %v4860_v45  ;;  %1646 = vmatprep.mubr.f32.mxu0 %v5978_v9 }
 0x33c   :  { %1684 = vmatpush1.msra.mxu1 %v4864_v16  ;;  %1717 = vmatprep.mubr.f32.mxu1 %v5978_v9  ;;  %v6005_v9 = vld [vmem:[#allocation75_spill] sm:$0xff] }
 0x33d   :  { %1769 = vmatprep.subr.mxu0 %v4664_v0  ;;  %1840 = vmatprep.subr.mxu1 %v4667_v26  ;;  %v6006_v26 = vld [vmem:[#allocation77_spill] sm:$0xff] }
 0x33e   :  { %732 = vrot.lane.b32.xlu1 %v3997_v34, %s4024_s3 }
 0x38c   :  { %v1354_v45 = vpop.permute.xlu1 %1353 }
 0x38d   :  { %1357 = vst.msk [vmem:[#allocation2] sm:$0x30] %vm1356_vm4, %v1354_v45 }
 0x3dc   :  { %v1442_v15 = vpop.f32.mrf.mxu0  ;;  %v1513_v13 = vpop.f32.mrf.mxu1 }
 0x3dd   :  { %v1522_v36 = vrot.slane %v1442_v15, 2  ;;  %v1524_v16 = vrot.slane %v1513_v13, 2 }
 0x3de   :  { %v1444_v6 = vpop.f32.mrf.mxu0  ;;  %v1515_v34 = vpop.f32.mrf.mxu1 }
 0x3df   :  { %v1530_v27 = vadd.f32 %v1522_v36, %v6005_v9  ;;  %v1523_v0 = vrot.slane %v1444_v6, 2  ;;  %v1532_v17 = vadd.f32 %v1524_v16, %v6006_v26  ;;  %v1525_v20 = vrot.slane %v1515_v34, 2  ;;  %v6014_v36 = vld [vmem:[#allocation16_spill] sm:$0xff]  ;;  %v6015_v34 = vld [vmem:[#allocation17_spill] sm:$0xff] }
 0x3e1   :  { %3817 = vtanh.f32 %v1530_v27  ;;  %v1531_v49 = vadd.f32 %v1523_v0, %v6007_v35  ;;  %v1533_v14 = vadd.f32 %v1525_v20, %v6008_v46  ;;  %v1547_v27 = vrot.slane %v4676_v39, 6  ;;  %v6009_v39 = vld [vmem:[#allocation11_spill] sm:$0xff] }
 0x3e3   :  { %3819 = vtanh.f32 %v1531_v49 }
 0x3e4   :  { %3821 = vtanh.f32 %v1532_v17  ;;  %v6013_v17 = vld [vmem:[#allocation15_spill] sm:$0xff] }
 0x3e5   :  { %3823 = vtanh.f32 %v1533_v14  ;;  %v6012_v14 = vld [vmem:[#allocation14_spill] sm:$0xff] }
 0x3ee   :  { %v3818_v45 = vpop.eup %3817 }
 0x3ef   :  { %v1538_v22 = vmul.f32 0.5, %v3818_v45  ;;  %v6016_v45 = vld [vmem:[#allocation18_spill] sm:$0xff] }
 0x3f0   :  { %v3820_v29 = vpop.eup %3819 }
 0x3f1   :  { %v1542_v15 = vadd.f32 0.5, %v1538_v22  ;;  %v1539_v13 = vmul.f32 0.5, %v3820_v29  ;;  %v3822_v28 = vpop.eup %3821  ;;  %v6011_v29 = vld [vmem:[#allocation13_spill] sm:$0xff] }
 0x3f2   :  { %v3824_v0 = vpop.eup %3823 }
 0x3f3   :  { %v1543_v9 = vadd.f32 0.5, %v1539_v13  ;;  %v1550_v6 = vmul.f32 %v3822_v28, %v1542_v15  ;;  %v1541_v49 = vmul.f32 0.5, %v3824_v0  ;;  %v6010_v28 = vld [vmem:[#allocation12_spill] sm:$0xff]  ;;  %v6017_v15 = vld [vmem:[#allocation19_spill] sm:$0xff]  ;;  %v6023_v0 = vld [vmem:[#allocation25_spill] sm:$0xff] }
 0x3f4   :  { %v6018_v13 = vld [vmem:[#allocation20_spill] sm:$0xff] }
 0x3f5   :  { %v1549_v26 = vmul.f32 %v1547_v27, %v1543_v9  ;;  %v1545_v35 = vadd.f32 0.5, %v1541_v49  ;;  %v6019_v9 = vld [vmem:[#allocation21_spill] sm:$0xff]  ;;  %v6020_v27 = vld [vmem:[#allocation22_spill] sm:$0xff] }
 0x3f6   :  { %v6024_v49 = vld [vmem:[#allocation26_spill] sm:$0xff] }
 0x3f7   :  { %v4880_v16 = vadd.f32 %v1550_v6, %v1549_v26  ;;  %v6021_v6 = vld [vmem:[#allocation23_spill] sm:$0xff]  ;;  %v6022_v26 = vld [vmem:[#allocation24_spill] sm:$0xff] }
 0x3f9   :  { %3825 = vtanh.f32 %v4880_v16 }
 0x406   :  { %v3826_v46 = vpop.eup %3825 }
 0x407   :  { %v1553_v20 = vmul.f32 %v3826_v46, %v1545_v35  ;;  %v6025_v35 = vld [vmem:[#allocation27_spill] sm:$0xff]  ;;  %v6026_v46 = vld [vmem:[#allocation28_spill] sm:$0xff] }
 0x409   :  { %1555 = vrot.lane.b32.xlu0 %v1553_v20, %s4025_s27  ;;  %v1580_v22 = vrot.slane %v1553_v20, 6  ;;  %v6027_v20 = vmov 0.0  }
 0x40b   :  { %1647 = vmatmul.mubr.f32.vlgmr.msra.gmra.mxu0 %v1580_v22  ;;  %1718 = vmatmul.mubr.f32.vlgmr.msra.gmra.mxu1 %v1580_v22  ;;  %v6028_v22 = vld [vmem:[#allocation29_spill] sm:$0xff] }
 0x40c   :  { %1770 = vmatpush1.msra.mxu0 %v4680_v11  ;;  %1841 = vmatpush1.msra.mxu1 %v4683_v32 }
 0x40d   :  { %1771 = vmatprep.subr.mxu0 %v4686_v3  ;;  %1842 = vmatprep.subr.mxu1 %v4689_v5 }
 0x40e   :  { %1772 = vmatpush1.msra.mxu0 %v4692_v4  ;;  %1843 = vmatpush1.msra.mxu1 %v4695_v40 }
 0x40f   :  { %1773 = vmatprep.subr.mxu0 %v4698_v18  ;;  %1844 = vmatprep.subr.mxu1 %v4701_v21 }
 0x410   :  { %1774 = vmatpush1.msra.mxu0 %v4704_v53  ;;  %1845 = vmatpush1.msra.mxu1 %v4707_v54 }
 0x411   :  { %1775 = vmatprep.subr.mxu0 %v4710_v55  ;;  %1846 = vmatprep.subr.mxu1 %v4713_v56 }
 0x412   :  { %1776 = vmatpush1.msra.mxu0 %v4716_v57  ;;  %1847 = vmatpush1.msra.mxu1 %v4719_v58 }
 0x413   :  { %1777 = vmatprep.subr.mxu0 %v4722_v59  ;;  %1848 = vmatprep.subr.mxu1 %v4725_v60 }
 0x414   :  { %1778 = vmatpush1.msra.mxu0 %v4728_v61  ;;  %1849 = vmatpush1.msra.mxu1 %v4731_v62 }
 0x415   :  { %1779 = vmatprep.subr.mxu0 %v4734_v63  ;;  %1850 = vmatprep.subr.mxu1 %v4737_v1 }
 0x416   :  { %1780 = vmatpush1.msra.mxu0 %v4740_v2  ;;  %1851 = vmatpush1.msra.mxu1 %v4743_v7 }
 0x417   :  { %1781 = vmatprep.subr.mxu0 %v4746_v8  ;;  %1852 = vmatprep.subr.mxu1 %v4749_v41 }
 0x418   :  { %1782 = vmatpush1.msra.mxu0 %v4752_v48  ;;  %1853 = vmatpush1.msra.mxu1 %v4755_v38 }
 0x419   :  { %1783 = vmatprep.subr.mxu0 %v4758_v10  ;;  %1854 = vmatprep.subr.mxu1 %v4761_v44 }
 0x41a   :  { %1784 = vmatpush1.msra.mxu0 %v4764_v52  ;;  %1855 = vmatpush1.msra.mxu1 %v4767_v33 }
 0x41b   :  { %1785 = vmatprep.subr.mxu0 %v4770_v19  ;;  %1856 = vmatprep.subr.mxu1 %v4773_v25 }
 0x41c   :  { %1786 = vmatpush1.msra.mxu0 %v4776_v42  ;;  %1857 = vmatpush1.msra.mxu1 %v4779_v24 }
 0x41d   :  { %1787 = vmatprep.subr.mxu0 %v4782_v31  ;;  %1858 = vmatprep.subr.mxu1 %v4785_v51 }
 0x41e   :  { %1788 = vmatpush1.msra.mxu0 %v4788_v12  ;;  %1859 = vmatpush1.msra.mxu1 %v4791_v43 }
 0x41f   :  { %1789 = vmatprep.subr.mxu0 %v4794_v30  ;;  %1860 = vmatprep.subr.mxu1 %v4797_v23 }
 0x420   :  { %1790 = vmatpush1.msra.mxu0 %v4800_v47  ;;  %1861 = vmatpush1.msra.mxu1 %v4803_v37 }
 0x421   :  { %1791 = vmatprep.subr.mxu0 %v4806_v50  ;;  %1862 = vmatprep.subr.mxu1 %v6009_v39 }
 0x422   :  { %1792 = vmatpush1.msra.mxu0 %v6010_v28  ;;  %1863 = vmatpush1.msra.mxu1 %v6011_v29 }
 0x423   :  { %1793 = vmatprep.subr.mxu0 %v6012_v14  ;;  %1864 = vmatprep.subr.mxu1 %v6013_v17 }
 0x424   :  { %1794 = vmatpush1.msra.mxu0 %v6014_v36  ;;  %1865 = vmatpush1.msra.mxu1 %v6015_v34 }
 0x425   :  { %1795 = vmatprep.subr.mxu0 %v6016_v45  ;;  %1866 = vmatprep.subr.mxu1 %v6017_v15 }
 0x426   :  { %1796 = vmatpush1.msra.mxu0 %v6018_v13  ;;  %1867 = vmatpush1.msra.mxu1 %v6019_v9  ;;  %v6029_v9 = vld [vmem:[#allocation9_spill] sm:$0xff] }
 0x427   :  { %1797 = vmatprep.subr.mxu0 %v6020_v27  ;;  %1868 = vmatprep.subr.mxu1 %v6021_v6  ;;  %v6030_v27 = vld [vmem:[#allocation10_spill] sm:$0xff]  ;;  %v733_v6 = vpop.permute.xlu1 %732 }
 0x428   :  { %1798 = vmatpush1.msra.mxu0 %v6022_v26  ;;  %1869 = vmatpush1.msra.mxu1 %v6023_v0  ;;  %738 = vst.msk [vmem:[#allocation2 + $0x8] sm:$0xff] %vm736_vm1, %v733_v6 }
 0x429   :  { %1799 = vmatprep.subr.mxu0 %v6024_v49  ;;  %1870 = vmatprep.subr.mxu1 %v6025_v35 }
 0x42a   :  { %1800 = vmatpush1.msra.mxu0 %v6026_v46  ;;  %1833 = vmatprep.mubr.f32.mxu0 %v6027_v20  ;;  %v6031_v46 = vld [vmem:[#allocation64_spill] sm:$0xff] }
 0x42b   :  { %1871 = vmatpush1.msra.mxu1 %v6028_v22  ;;  %1904 = vmatprep.mubr.f32.mxu1 %v6027_v20  ;;  %v6032_v22 = vld [vmem:[#allocation65_spill] sm:$0xff] }
 0x42c   :  { %1958 = vmatprep.subr.mxu0 %v6029_v9  ;;  %2029 = vmatprep.subr.mxu1 %v6030_v27  ;;  %v6033_v20 = vld [vmem:[#allocation69_spill] sm:$0xff] }
 0x42d   :  { %v6034_v9 = vld [vmem:[#allocation73_spill] sm:$0xff] }
 0x47b   :  { %v1556_v0 = vpop.permute.xlu0 %1555 }
 0x47c   :  { %1559 = vst.msk [vmem:[#allocation2] sm:$0xc0] %vm1558_vm5, %v1556_v0 }
 0x4cb   :  { %v1648_v35 = vpop.f32.mrf.mxu0  ;;  %v1719_v49 = vpop.f32.mrf.mxu1 }
 0x4cc   :  { %v1724_v26 = vadd.f32 %v1648_v35, %v6031_v46  ;;  %v1726_v15 = vadd.f32 %v1719_v49, %v6032_v22  ;;  %v1741_v35 = vrot.slane %v4880_v16, 6  ;;  %v6035_v16 = vld [vmem:[#allocation12_spill] sm:$0xff] }
 0x4cd   :  { %v1650_v13 = vpop.f32.mrf.mxu0  ;;  %v1721_v27 = vpop.f32.mrf.mxu1  ;;  %v6043_v22 = vld [vmem:[#allocation20_spill] sm:$0xff] }
 0x4ce   :  { %3827 = vtanh.f32 %v1724_v26  ;;  %v1725_v45 = vadd.f32 %v1650_v13, %v6033_v20  ;;  %v1727_v34 = vadd.f32 %v1721_v27, %v6034_v9  ;;  %v6042_v20 = vld [vmem:[#allocation19_spill] sm:$0xff] }
 0x4d0   :  { %3829 = vtanh.f32 %v1725_v45 }
 0x4d1   :  { %3831 = vtanh.f32 %v1726_v15 }
 0x4d2   :  { %3833 = vtanh.f32 %v1727_v34  ;;  %v6041_v34 = vld [vmem:[#allocation18_spill] sm:$0xff] }
 0x4db   :  { %v3828_v6 = vpop.eup %3827 }
 0x4dc   :  { %v1732_v36 = vmul.f32 0.5, %v3828_v6  ;;  %v6044_v6 = vld [vmem:[#allocation21_spill] sm:$0xff] }
 0x4dd   :  { %v3830_v17 = vpop.eup %3829 }
 0x4de   :  { %v1736_v14 = vadd.f32 0.5, %v1732_v36  ;;  %v1733_v0 = vmul.f32 0.5, %v3830_v17  ;;  %v3832_v29 = vpop.eup %3831  ;;  %v6039_v17 = vld [vmem:[#allocation16_spill] sm:$0xff]  ;;  %v6040_v36 = vld [vmem:[#allocation17_spill] sm:$0xff] }
 0x4df   :  { %v3834_v45 = vpop.eup %3833 }
 0x4e0   :  { %v1737_v28 = vadd.f32 0.5, %v1733_v0  ;;  %v1744_v26 = vmul.f32 %v3832_v29, %v1736_v14  ;;  %v1735_v15 = vmul.f32 0.5, %v3834_v45  ;;  %v6037_v29 = vld [vmem:[#allocation14_spill] sm:$0xff]  ;;  %v6038_v14 = vld [vmem:[#allocation15_spill] sm:$0xff] }
 0x4e1   :  { %v6045_v0 = vld [vmem:[#allocation22_spill] sm:$0xff] }
 0x4e2   :  { %v1743_v46 = vmul.f32 %v1741_v35, %v1737_v28  ;;  %v1739_v13 = vadd.f32 0.5, %v1735_v15  ;;  %v6036_v28 = vld [vmem:[#allocation13_spill] sm:$0xff]  ;;  %v6046_v35 = vld [vmem:[#allocation23_spill] sm:$0xff]  ;;  %v6049_v45 = vld [vmem:[#allocation26_spill] sm:$0xff] }
 0x4e3   :  { %v6050_v15 = vld [vmem:[#allocation27_spill] sm:$0xff] }
 0x4e4   :  { %v4957_v49 = vadd.f32 %v1744_v26, %v1743_v46  ;;  %v6047_v26 = vld [vmem:[#allocation24_spill] sm:$0xff]  ;;  %v6048_v46 = vld [vmem:[#allocation25_spill] sm:$0xff] }
 0x4e6   :  { %3835 = vtanh.f32 %v4957_v49 }
 0x4f3   :  { %v3836_v9 = vpop.eup %3835 }
 0x4f4   :  { %v1747_v27 = vmul.f32 %v3836_v9, %v1739_v13  ;;  %v6051_v13 = vld [vmem:[#allocation28_spill] sm:$0xff]  ;;  %v6052_v9 = vmov 0.0  }
 0x4f6   :  { %1749 = vrot.lane.b32.xlu0 %v1747_v27, %s4025_s27  ;;  %1834 = vmatmul.mubr.f32.vlgmr.msra.gmra.mxu0 %v1747_v27 }
 0x4f7   :  { %1905 = vmatmul.mubr.f32.vlgmr.msra.gmra.mxu1 %v1747_v27  ;;  %1959 = vmatpush1.msra.mxu0 %v4680_v11  ;;  %v6053_v27 = vld [vmem:[#allocation29_spill] sm:$0xff] }
 0x4f8   :  { %2030 = vmatpush1.msra.mxu1 %v4683_v32  ;;  %1960 = vmatprep.subr.mxu0 %v4686_v3 }
 0x4f9   :  { %2031 = vmatprep.subr.mxu1 %v4689_v5  ;;  %1961 = vmatpush1.msra.mxu0 %v4692_v4 }
 0x4fa   :  { %2032 = vmatpush1.msra.mxu1 %v4695_v40  ;;  %1962 = vmatprep.subr.mxu0 %v4698_v18 }
 0x4fb   :  { %2033 = vmatprep.subr.mxu1 %v4701_v21  ;;  %1963 = vmatpush1.msra.mxu0 %v4704_v53 }
 0x4fc   :  { %2034 = vmatpush1.msra.mxu1 %v4707_v54  ;;  %1964 = vmatprep.subr.mxu0 %v4710_v55 }
 0x4fd   :  { %2035 = vmatprep.subr.mxu1 %v4713_v56  ;;  %1965 = vmatpush1.msra.mxu0 %v4716_v57 }
 0x4fe   :  { %2036 = vmatpush1.msra.mxu1 %v4719_v58  ;;  %1966 = vmatprep.subr.mxu0 %v4722_v59 }
 0x4ff   :  { %2037 = vmatprep.subr.mxu1 %v4725_v60  ;;  %1967 = vmatpush1.msra.mxu0 %v4728_v61 }
 0x500   :  { %2038 = vmatpush1.msra.mxu1 %v4731_v62  ;;  %1968 = vmatprep.subr.mxu0 %v4734_v63 }
 0x501   :  { %2039 = vmatprep.subr.mxu1 %v4737_v1  ;;  %1969 = vmatpush1.msra.mxu0 %v4740_v2 }
 0x502   :  { %2040 = vmatpush1.msra.mxu1 %v4743_v7  ;;  %1970 = vmatprep.subr.mxu0 %v4746_v8 }
 0x503   :  { %2041 = vmatprep.subr.mxu1 %v4749_v41  ;;  %1971 = vmatpush1.msra.mxu0 %v4752_v48 }
 0x504   :  { %2042 = vmatpush1.msra.mxu1 %v4755_v38  ;;  %1972 = vmatprep.subr.mxu0 %v4758_v10 }
 0x505   :  { %2043 = vmatprep.subr.mxu1 %v4761_v44  ;;  %1973 = vmatpush1.msra.mxu0 %v4764_v52 }
 0x506   :  { %2044 = vmatpush1.msra.mxu1 %v4767_v33  ;;  %1974 = vmatprep.subr.mxu0 %v4770_v19 }
 0x507   :  { %2045 = vmatprep.subr.mxu1 %v4773_v25  ;;  %1975 = vmatpush1.msra.mxu0 %v4776_v42 }
 0x508   :  { %2046 = vmatpush1.msra.mxu1 %v4779_v24  ;;  %1976 = vmatprep.subr.mxu0 %v4782_v31 }
 0x509   :  { %2047 = vmatprep.subr.mxu1 %v4785_v51  ;;  %1977 = vmatpush1.msra.mxu0 %v4788_v12 }
 0x50a   :  { %2048 = vmatpush1.msra.mxu1 %v4791_v43  ;;  %1978 = vmatprep.subr.mxu0 %v4794_v30 }
 0x50b   :  { %2049 = vmatprep.subr.mxu1 %v4797_v23  ;;  %1979 = vmatpush1.msra.mxu0 %v4800_v47 }
 0x50c   :  { %2050 = vmatpush1.msra.mxu1 %v4803_v37  ;;  %1980 = vmatprep.subr.mxu0 %v4806_v50 }
 0x50d   :  { %2051 = vmatprep.subr.mxu1 %v6009_v39  ;;  %1981 = vmatpush1.msra.mxu0 %v6035_v16 }
 0x50e   :  { %2052 = vmatpush1.msra.mxu1 %v6036_v28  ;;  %1982 = vmatprep.subr.mxu0 %v6037_v29 }
 0x50f   :  { %2053 = vmatprep.subr.mxu1 %v6038_v14  ;;  %1983 = vmatpush1.msra.mxu0 %v6039_v17  ;;  %v6058_v17 = vld [vmem:[#allocation66_spill] sm:$0xff] }
 0x510   :  { %2054 = vmatpush1.msra.mxu1 %v6040_v36  ;;  %1984 = vmatprep.subr.mxu0 %v6041_v34  ;;  %v6057_v36 = vld [vmem:[#allocation61_spill] sm:$0xff]  ;;  %v6059_v14 = vld [vmem:[#allocation70_spill] sm:$0xff] }
 0x511   :  { %2055 = vmatprep.subr.mxu1 %v6042_v20  ;;  %1985 = vmatpush1.msra.mxu0 %v6043_v22  ;;  %v6056_v20 = vld [vmem:[#allocation58_spill] sm:$0xff] }
 0x512   :  { %2056 = vmatpush1.msra.mxu1 %v6044_v6  ;;  %1986 = vmatprep.subr.mxu0 %v6045_v0  ;;  %v6054_v6 = vld [vmem:[#allocation9_spill] sm:$0xff]  ;;  %v6055_v0 = vld [vmem:[#allocation10_spill] sm:$0xff] }
 0x513   :  { %2057 = vmatprep.subr.mxu1 %v6046_v35  ;;  %1987 = vmatpush1.msra.mxu0 %v6047_v26 }
 0x514   :  { %2058 = vmatpush1.msra.mxu1 %v6048_v46  ;;  %1988 = vmatprep.subr.mxu0 %v6049_v45 }
 0x515   :  { %2059 = vmatprep.subr.mxu1 %v6050_v15  ;;  %1989 = vmatpush1.msra.mxu0 %v6051_v13 }
 0x516   :  { %2022 = vmatprep.mubr.f32.mxu0 %v6052_v9  ;;  %2060 = vmatpush1.msra.mxu1 %v6053_v27 }
 0x517   :  { %2093 = vmatprep.mubr.f32.mxu1 %v6052_v9  ;;  %2147 = vmatprep.subr.mxu0 %v6054_v6 }
 0x518   :  { %2218 = vmatprep.subr.mxu1 %v6055_v0 }
 0x568   :  { %v1750_v35 = vpop.permute.xlu0 %1749 }
 0x569   :  { %1752 = vst.msk [vmem:[#allocation2 + $0x8] sm:$0x3] %vm942_vm2, %v1750_v35 }
 0x5b6   :  { %v1835_v46 = vpop.f32.mrf.mxu0 }
 0x5b7   :  { %v1915_v26 = vrot.slane %v1835_v46, 6  ;;  %v1906_v45 = vpop.f32.mrf.mxu1 }
 0x5b8   :  { %v1917_v22 = vrot.slane %v1906_v45, 6  ;;  %v1837_v15 = vpop.f32.mrf.mxu0 }
 0x5b9   :  { %v1923_v13 = vadd.f32 %v1915_v26, %v6056_v20  ;;  %v1916_v34 = vrot.slane %v1837_v15, 6  ;;  %v1908_v6 = vpop.f32.mrf.mxu1  ;;  %v1940_v26 = vrot.slane %v4957_v49, 6 }
 0x5ba   :  { %v1925_v27 = vadd.f32 %v1917_v22, %v6057_v36  ;;  %v1918_v0 = vrot.slane %v1908_v6, 6 }
 0x5bb   :  { %3837 = vtanh.f32 %v1923_v13  ;;  %v1924_v9 = vadd.f32 %v1916_v34, %v6058_v17 }
 0x5bc   :  { %v1926_v29 = vadd.f32 %v1918_v0, %v6059_v14 }
 0x5bd   :  { %3839 = vtanh.f32 %v1924_v9 }
 0x5be   :  { %3841 = vtanh.f32 %v1925_v27 }
 0x5bf   :  { %3843 = vtanh.f32 %v1926_v29 }
 0x5c8   :  { %v3838_v35 = vpop.eup %3837 }
 0x5c9   :  { %v1931_v28 = vmul.f32 0.5, %v3838_v35 }
 0x5ca   :  { %v3840_v46 = vpop.eup %3839 }
 0x5cb   :  { %v1935_v16 = vadd.f32 0.5, %v1931_v28  ;;  %v1932_v45 = vmul.f32 0.5, %v3840_v46  ;;  %v3842_v39 = vpop.eup %3841 }
 0x5cc   :  { %v3844_v17 = vpop.eup %3843 }
 0x5cd   :  { %v1936_v20 = vadd.f32 0.5, %v1932_v45  ;;  %v1943_v15 = vmul.f32 %v3842_v39, %v1935_v16  ;;  %v1934_v34 = vmul.f32 0.5, %v3844_v17  ;;  %v162_v17 = vld [vmem:[%s5668_s2 + $0x88] sm:$0xff] }
 0x5cf   :  { %v1942_v36 = vmul.f32 %v1940_v26, %v1936_v20  ;;  %v1938_v13 = vadd.f32 0.5, %v1934_v34  ;;  %v182_v34 = vld [vmem:[%s5668_s2 + $0x128] sm:$0xff] }
 0x5d1   :  { %v5033_v22 = vadd.f32 %v1943_v15, %v1942_v36  ;;  %v163_v36 = vld [vmem:[%s5668_s2 + $0x90] sm:$0xff] }
 0x5d3   :  { %3845 = vtanh.f32 %v5033_v22  ;;  %v2129_v29 = vrot.slane %v5033_v22, 6  ;;  %v183_v22 = vld [vmem:[%s5668_s2 + $0x130] sm:$0xff] }
 0x5e0   :  { %v3846_v14 = vpop.eup %3845 }
 0x5e1   :  { %v5036_v9 = vmul.f32 %v3846_v14, %v1938_v13  ;;  %v161_v13 = vld [vmem:[%s5668_s2 + $0x80] sm:$0xff] }
 0x5e2   :  { %v181_v14 = vld [vmem:[%s5668_s2 + $0x120] sm:$0xff] }
 0x5e3   :  { %1948 = vrot.lane.b32.xlu1 %v5036_v9, %s4025_s27  ;;  %v1956_v28 = vrot.slane %v5036_v9, 2 }
 0x5e5   :  { %2023 = vmatmul.mubr.f32.vlgmr.msra.gmra.mxu0 %v1956_v28  ;;  %2094 = vmatmul.mubr.f32.vlgmr.msra.gmra.mxu1 %v1956_v28  ;;  %v160_v28 = vld [vmem:[%s5668_s2 + $0x78] sm:$0xff] }
 0x5e6   :  { %2148 = vmatpush1.msra.mxu0 %v4680_v11  ;;  %2219 = vmatpush1.msra.mxu1 %v4683_v32  ;;  %v6060_v11 = vld [vmem:[#allocation11_spill] sm:$0xff]  ;;  %v6061_v32 = vld [vmem:[#allocation12_spill] sm:$0xff] }
 0x5e7   :  { %2149 = vmatprep.subr.mxu0 %v4686_v3  ;;  %2220 = vmatprep.subr.mxu1 %v4689_v5  ;;  %v6062_v3 = vld [vmem:[#allocation13_spill] sm:$0xff]  ;;  %v6063_v5 = vld [vmem:[#allocation14_spill] sm:$0xff] }
 0x5e8   :  { %2150 = vmatpush1.msra.mxu0 %v4692_v4  ;;  %2221 = vmatpush1.msra.mxu1 %v4695_v40  ;;  %v6064_v4 = vld [vmem:[#allocation15_spill] sm:$0xff]  ;;  %v6065_v40 = vld [vmem:[#allocation16_spill] sm:$0xff] }
 0x5e9   :  { %2151 = vmatprep.subr.mxu0 %v4698_v18  ;;  %2222 = vmatprep.subr.mxu1 %v4701_v21  ;;  %v6066_v18 = vld [vmem:[#allocation17_spill] sm:$0xff]  ;;  %v6067_v21 = vld [vmem:[#allocation18_spill] sm:$0xff] }
 0x5ea   :  { %2152 = vmatpush1.msra.mxu0 %v4704_v53  ;;  %2223 = vmatpush1.msra.mxu1 %v4707_v54  ;;  %v6068_v53 = vld [vmem:[#allocation19_spill] sm:$0xff]  ;;  %v6069_v54 = vld [vmem:[#allocation20_spill] sm:$0xff] }
 0x5eb   :  { %2153 = vmatprep.subr.mxu0 %v4710_v55  ;;  %2224 = vmatprep.subr.mxu1 %v4713_v56  ;;  %v6070_v55 = vld [vmem:[#allocation21_spill] sm:$0xff]  ;;  %v6071_v56 = vld [vmem:[#allocation22_spill] sm:$0xff] }
 0x5ec   :  { %2154 = vmatpush1.msra.mxu0 %v4716_v57  ;;  %2225 = vmatpush1.msra.mxu1 %v4719_v58  ;;  %v6072_v57 = vld [vmem:[#allocation23_spill] sm:$0xff]  ;;  %v6073_v58 = vld [vmem:[#allocation24_spill] sm:$0xff] }
 0x5ed   :  { %2155 = vmatprep.subr.mxu0 %v4722_v59  ;;  %2226 = vmatprep.subr.mxu1 %v4725_v60  ;;  %v6074_v59 = vld [vmem:[#allocation25_spill] sm:$0xff]  ;;  %v6075_v60 = vld [vmem:[#allocation26_spill] sm:$0xff] }
 0x5ee   :  { %2156 = vmatpush1.msra.mxu0 %v4728_v61  ;;  %2227 = vmatpush1.msra.mxu1 %v4731_v62  ;;  %v6076_v61 = vld [vmem:[#allocation27_spill] sm:$0xff]  ;;  %v6077_v62 = vld [vmem:[#allocation28_spill] sm:$0xff] }
 0x5ef   :  { %2157 = vmatprep.subr.mxu0 %v4734_v63  ;;  %2228 = vmatprep.subr.mxu1 %v4737_v1  ;;  %v6078_v63 = vld [vmem:[#allocation29_spill] sm:$0xff]  ;;  %v6079_v1 = vmov 0.0  }
 0x5f0   :  { %2158 = vmatpush1.msra.mxu0 %v4740_v2  ;;  %2229 = vmatpush1.msra.mxu1 %v4743_v7  ;;  %v164_v2 = vld [vmem:[%s5668_s2 + $0x98] sm:$0xff] }
 0x5f1   :  { %2159 = vmatprep.subr.mxu0 %v4746_v8  ;;  %2230 = vmatprep.subr.mxu1 %v4749_v41  ;;  %v184_v7 = vld [vmem:[%s5668_s2 + $0x138] sm:$0xff] }
 0x5f2   :  { %2160 = vmatpush1.msra.mxu0 %v4752_v48  ;;  %2231 = vmatpush1.msra.mxu1 %v4755_v38 }
 0x5f3   :  { %2161 = vmatprep.subr.mxu0 %v4758_v10  ;;  %2232 = vmatprep.subr.mxu1 %v4761_v44 }
 0x5f4   :  { %2162 = vmatpush1.msra.mxu0 %v4764_v52  ;;  %2233 = vmatpush1.msra.mxu1 %v4767_v33  ;;  %v6080_v52 = vld [vmem:[#allocation59_spill] sm:$0xff] }
 0x5f5   :  { %2163 = vmatprep.subr.mxu0 %v4770_v19  ;;  %2234 = vmatprep.subr.mxu1 %v4773_v25  ;;  %v6081_v25 = vld [vmem:[#allocation62_spill] sm:$0xff] }
 0x5f6   :  { %2164 = vmatpush1.msra.mxu0 %v4776_v42  ;;  %2235 = vmatpush1.msra.mxu1 %v4779_v24  ;;  %v6082_v24 = vld [vmem:[#allocation67_spill] sm:$0xff] }
 0x5f7   :  { %2165 = vmatprep.subr.mxu0 %v4782_v31  ;;  %2236 = vmatprep.subr.mxu1 %v4785_v51 }
 0x5f8   :  { %2166 = vmatpush1.msra.mxu0 %v4788_v12  ;;  %2237 = vmatpush1.msra.mxu1 %v4791_v43  ;;  %v6083_v43 = vld [vmem:[#allocation71_spill] sm:$0xff] }
 0x5f9   :  { %2167 = vmatprep.subr.mxu0 %v4794_v30  ;;  %2238 = vmatprep.subr.mxu1 %v4797_v23 }
 0x5fa   :  { %2168 = vmatpush1.msra.mxu0 %v4800_v47  ;;  %2239 = vmatpush1.msra.mxu1 %v4803_v37 }
 0x5fb   :  { %2169 = vmatprep.subr.mxu0 %v4806_v50  ;;  %2240 = vmatprep.subr.mxu1 %v6060_v11  ;;  %v180_v11 = vld [vmem:[%s5668_s2 + $0x118] sm:$0xff] }
 0x5fc   :  { %2170 = vmatpush1.msra.mxu0 %v6061_v32  ;;  %2241 = vmatpush1.msra.mxu1 %v6062_v3  ;;  %v159_v32 = vld [vmem:[%s5668_s2 + $0x70] sm:$0xff] }
 0x5fd   :  { %2171 = vmatprep.subr.mxu0 %v6063_v5  ;;  %2242 = vmatprep.subr.mxu1 %v6064_v4  ;;  %v179_v3 = vld [vmem:[%s5668_s2 + $0x110] sm:$0xff]  ;;  %v158_v5 = vld [vmem:[%s5668_s2 + $0x68] sm:$0xff] }
 0x5fe   :  { %2172 = vmatpush1.msra.mxu0 %v6065_v40  ;;  %2243 = vmatpush1.msra.mxu1 %v6066_v18  ;;  %v178_v4 = vld [vmem:[%s5668_s2 + $0x108] sm:$0xff]  ;;  %v157_v40 = vld [vmem:[%s5668_s2 + $0x60] sm:$0xff] }
 0x5ff   :  { %2173 = vmatprep.subr.mxu0 %v6067_v21  ;;  %2244 = vmatprep.subr.mxu1 %v6068_v53  ;;  %v177_v18 = vld [vmem:[%s5668_s2 + $0x100] sm:$0xff]  ;;  %v156_v21 = vld [vmem:[%s5668_s2 + $0x58] sm:$0xff] }
 0x600   :  { %2174 = vmatpush1.msra.mxu0 %v6069_v54  ;;  %2245 = vmatpush1.msra.mxu1 %v6070_v55  ;;  %v176_v53 = vld [vmem:[%s5668_s2 + $0xf8] sm:$0xff]  ;;  %v155_v54 = vld [vmem:[%s5668_s2 + $0x50] sm:$0xff] }
 0x601   :  { %2175 = vmatprep.subr.mxu0 %v6071_v56  ;;  %2246 = vmatprep.subr.mxu1 %v6072_v57  ;;  %v175_v55 = vld [vmem:[%s5668_s2 + $0xf0] sm:$0xff]  ;;  %v154_v56 = vld [vmem:[%s5668_s2 + $0x48] sm:$0xff] }
 0x602   :  { %2176 = vmatpush1.msra.mxu0 %v6073_v58  ;;  %2247 = vmatpush1.msra.mxu1 %v6074_v59  ;;  %v174_v57 = vld [vmem:[%s5668_s2 + $0xe8] sm:$0xff]  ;;  %v153_v58 = vld [vmem:[%s5668_s2 + $0x40] sm:$0xff] }
 0x603   :  { %2177 = vmatprep.subr.mxu0 %v6075_v60  ;;  %2248 = vmatprep.subr.mxu1 %v6076_v61  ;;  %v173_v59 = vld [vmem:[%s5668_s2 + $0xe0] sm:$0xff]  ;;  %v152_v60 = vld [vmem:[%s5668_s2 + $0x38] sm:$0xff] }
 0x604   :  { %2178 = vmatpush1.msra.mxu0 %v6077_v62  ;;  %2249 = vmatpush1.msra.mxu1 %v6078_v63  ;;  %v172_v61 = vld [vmem:[%s5668_s2 + $0xd8] sm:$0xff]  ;;  %v151_v62 = vld [vmem:[%s5668_s2 + $0x30] sm:$0xff] }
 0x605   :  { %2211 = vmatprep.mubr.f32.mxu0 %v6079_v1  ;;  %2282 = vmatprep.mubr.f32.mxu1 %v6079_v1  ;;  %v171_v63 = vld [vmem:[%s5668_s2 + $0xd0] sm:$0xff] }
 0x606   :  { %2362 = vmatprep.subr.mxu0 %v164_v2  ;;  %2439 = vmatprep.subr.mxu1 %v184_v7  ;;  %v150_v2 = vld [vmem:[%s5668_s2 + $0x28] sm:$0xff] }
 0x607   :  { %v170_v7 = vld [vmem:[%s5668_s2 + $0xc8] sm:$0xff] }
 0x655   :  { %v1949_v8 = vpop.permute.xlu1 %1948 }
 0x656   :  { %1951 = vst.msk [vmem:[#allocation2 + $0x8] sm:$0xc] %vm1150_vm3, %v1949_v8  ;;  %v149_v8 = vld [vmem:[%s5668_s2 + $0x20] sm:$0xff] }
 0x6a5   :  { %v2024_v41 = vpop.f32.mrf.mxu0  ;;  %v2095_v48 = vpop.f32.mrf.mxu1 }
 0x6a6   :  { %v2104_v38 = vrot.slane %v2024_v41, 4  ;;  %v2106_v10 = vrot.slane %v2095_v48, 4  ;;  %v169_v41 = vld [vmem:[%s5668_s2 + $0xc0] sm:$0xff]  ;;  %v148_v48 = vld [vmem:[%s5668_s2 + $0x18] sm:$0xff] }
 0x6a7   :  { %v2026_v44 = vpop.f32.mrf.mxu0  ;;  %v2097_v51 = vpop.f32.mrf.mxu1 }
 0x6a8   :  { %v2112_v33 = vadd.f32 %v2104_v38, %v6080_v52  ;;  %v2105_v19 = vrot.slane %v2026_v44, 4  ;;  %v2114_v42 = vadd.f32 %v2106_v10, %v6081_v25  ;;  %v2107_v12 = vrot.slane %v2097_v51, 4  ;;  %v168_v38 = vld [vmem:[%s5668_s2 + $0xb8] sm:$0xff]  ;;  %v147_v10 = vld [vmem:[%s5668_s2 + $0x10] sm:$0xff]  ;;  %v146_v52 = vld [vmem:[%s5668_s2 + $0x8] sm:$0xff] }
 0x6a9   :  { %v167_v44 = vld [vmem:[%s5668_s2 + $0xb0] sm:$0xff]  ;;  %v165_v25 = vld [vmem:[%s5668_s2 + $0xa0] sm:$0xff]  ;;  %v5254_v51 = vld [vmem:[%s5668_s2 + $0x1a8] sm:$0xff] }
 0x6aa   :  { %3847 = vtanh.f32 %v2112_v33  ;;  %v2113_v31 = vadd.f32 %v2105_v19, %v6082_v24  ;;  %v2115_v30 = vadd.f32 %v2107_v12, %v6083_v43  ;;  %v166_v33 = vld [vmem:[%s5668_s2 + $0xa8] sm:$0xff]  ;;  %v145_v19 = vld [vmem:[%s5668_s2] sm:$0xff]  ;;  %v5244_v24 = vld [vmem:[%s5668_s2 + $0x1b8] sm:$0xff] }
 0x6ab   :  { %v5260_v43 = vld [vmem:[%s5668_s2 + $0x1a0] sm:$0xff] }
 0x6ac   :  { %3849 = vtanh.f32 %v2113_v31  ;;  %v5249_v31 = vld [vmem:[%s5668_s2 + $0x1b0] sm:$0xff] }
 0x6ad   :  { %3851 = vtanh.f32 %v2114_v42  ;;  %v2330_v42 = vld [vmem:[#allocation2] sm:$0xff] }
 0x6ae   :  { %3853 = vtanh.f32 %v2115_v30 }
 0x6b7   :  { %v3848_v23 = vpop.eup %3847 }
 0x6b8   :  { %v2120_v47 = vmul.f32 0.5, %v3848_v23 }
 0x6b9   :  { %v3850_v37 = vpop.eup %3849 }
 0x6ba   :  { %v2124_v50 = vadd.f32 0.5, %v2120_v47  ;;  %v2121_v39 = vmul.f32 0.5, %v3850_v37  ;;  %v3852_v49 = vpop.eup %3851 }
 0x6bb   :  { %v3854_v35 = vpop.eup %3853 }
 0x6bc   :  { %v2125_v16 = vadd.f32 0.5, %v2121_v39  ;;  %v2132_v27 = vmul.f32 %v3852_v49, %v2124_v50  ;;  %v2123_v46 = vmul.f32 0.5, %v3854_v35  ;;  %v6084_v39 = vld [vmem:[#allocation60_spill] sm:$0xff] }
 0x6be   :  { %v2131_v6 = vmul.f32 %v2129_v29, %v2125_v16  ;;  %v2127_v45 = vadd.f32 0.5, %v2123_v46  ;;  %v6085_v29 = vld [vmem:[#allocation63_spill] sm:$0xff] }
 0x6c0   :  { %v5117_v0 = vadd.f32 %v2132_v27, %v2131_v6  ;;  %v6086_v6 = vld [vmem:[#allocation68_spill] sm:$0xff] }
 0x6c2   :  { %3855 = vtanh.f32 %v5117_v0 }
 0x6cf   :  { %v3856_v20 = vpop.eup %3855 }
 0x6d0   :  { %v2135_v26 = vmul.f32 %v3856_v20, %v2127_v45  ;;  %v6087_v20 = vld [vmem:[#allocation72_spill] sm:$0xff] }
 0x6d2   :  { %2137 = vrot.lane.b32.xlu0 %v2135_v26, %s4025_s27  ;;  %v2145_v15 = vrot.slane %v2135_v26, 4 }
 0x6d4   :  { %2212 = vmatmul.mubr.f32.vlgmr.msra.gmra.mxu0 %v2145_v15  ;;  %2283 = vmatmul.mubr.f32.vlgmr.msra.gmra.mxu1 %v2145_v15 }
 0x6d5   :  { %2363 = vmatpush1.msra.mxu0 %v163_v36  ;;  %2440 = vmatpush1.msra.mxu1 %v183_v22 }
 0x6d6   :  { %2364 = vmatprep.subr.mxu0 %v162_v17  ;;  %2441 = vmatprep.subr.mxu1 %v182_v34 }
 0x6d7   :  { %2365 = vmatpush1.msra.mxu0 %v161_v13  ;;  %2442 = vmatpush1.msra.mxu1 %v181_v14 }
 0x6d8   :  { %2366 = vmatprep.subr.mxu0 %v160_v28  ;;  %2443 = vmatprep.subr.mxu1 %v180_v11  ;;  %v2318_v28 = vrot.slane %v5117_v0, 6  ;;  %v5292_v0 = vld [vmem:[%s5668_s2 + $0x188] sm:$0xff] }
 0x6d9   :  { %2367 = vmatpush1.msra.mxu0 %v159_v32  ;;  %2444 = vmatpush1.msra.mxu1 %v179_v3 }
 0x6da   :  { %2368 = vmatprep.subr.mxu0 %v158_v5  ;;  %2445 = vmatprep.subr.mxu1 %v178_v4  ;;  %v5281_v5 = vld [vmem:[%s5668_s2 + $0x198] sm:$0xff]  ;;  %v5286_v4 = vld [vmem:[%s5668_s2 + $0x190] sm:$0xff] }
 0x6db   :  { %2369 = vmatpush1.msra.mxu0 %v157_v40  ;;  %2446 = vmatpush1.msra.mxu1 %v177_v18  ;;  %v5297_v40 = vld [vmem:[%s5668_s2 + $0x180] sm:$0xff] }
 0x6dc   :  { %2370 = vmatprep.subr.mxu0 %v156_v21  ;;  %2447 = vmatprep.subr.mxu1 %v176_v53  ;;  %v5304_v21 = vld [vmem:[%s5668_s2 + $0x178] sm:$0xff]  ;;  %v5311_v53 = vld [vmem:[%s5668_s2 + $0x170] sm:$0xff] }
 0x6dd   :  { %2371 = vmatpush1.msra.mxu0 %v155_v54  ;;  %2448 = vmatpush1.msra.mxu1 %v175_v55  ;;  %v5318_v54 = vld [vmem:[%s5668_s2 + $0x168] sm:$0xff] }
 0x6de   :  { %2372 = vmatprep.subr.mxu0 %v154_v56  ;;  %2449 = vmatprep.subr.mxu1 %v174_v57  ;;  %v5325_v56 = vld [vmem:[%s5668_s2 + $0x160] sm:$0xff]  ;;  %v5336_v57 = vld [vmem:[%s5668_s2 + $0x158] sm:$0xff] }
 0x6df   :  { %2373 = vmatpush1.msra.mxu0 %v153_v58  ;;  %2450 = vmatpush1.msra.mxu1 %v173_v59  ;;  %v5341_v58 = vld [vmem:[%s5668_s2 + $0x150] sm:$0xff]  ;;  %v5346_v59 = vld [vmem:[%s5668_s2 + $0x148] sm:$0xff] }
 0x6e0   :  { %2374 = vmatprep.subr.mxu0 %v152_v60  ;;  %2451 = vmatprep.subr.mxu1 %v172_v61  ;;  %v5353_v61 = vld [vmem:[%s5668_s2 + $0x140] sm:$0xff] }
 0x6e1   :  { %2375 = vmatpush1.msra.mxu0 %v151_v62  ;;  %2452 = vmatpush1.msra.mxu1 %v171_v63 }
 0x6e2   :  { %2376 = vmatprep.subr.mxu0 %v150_v2  ;;  %2453 = vmatprep.subr.mxu1 %v170_v7 }
 0x6e3   :  { %2377 = vmatpush1.msra.mxu0 %v149_v8  ;;  %2454 = vmatpush1.msra.mxu1 %v169_v41 }
 0x6e4   :  { %2378 = vmatprep.subr.mxu0 %v148_v48  ;;  %2455 = vmatprep.subr.mxu1 %v168_v38  ;;  %v3751_v48 = vld [vmem:[%s5668_s2 + $0x1c0] ss:$8 sm:$0x3]  ;;  %s4027_s2 = smov 96  }
 0x6e5   :  { %2379 = vmatpush1.msra.mxu0 %v147_v10  ;;  %2456 = vmatpush1.msra.mxu1 %v167_v44  ;;  %v6088_v44 = vld [vmem:[#allocation6_spill] sm:$0xff] }
 0x6e6   :  { %2380 = vmatprep.subr.mxu0 %v146_v52  ;;  %2457 = vmatprep.subr.mxu1 %v166_v33  ;;  %v6089_v52 = vsub.s32 0, %v6088_v44 }
 0x6e7   :  { %2381 = vmatpush1.msra.mxu0 %v145_v19  ;;  %2414 = vmatprep.mubr.f32.mxu0 %v6079_v1 }
 0x6e8   :  { %2458 = vmatpush1.msra.mxu1 %v165_v25  ;;  %2491 = vmatprep.mubr.f32.mxu1 %v6079_v1  ;;  %v2336_v33 = vrot.slane %v3751_v48, %v6089_v52 }
 0x6e9   :  { %3764 = vmatmul.mubr.msk.f32.vlgmr.msra.gmra.mxu0 %vm2343_vm6, %v2330_v42  ;;  %3766 = vmatmul.mubr.msk.f32.vlgmr.msra.gmra.mxu1 %vm2343_vm6, %v2330_v42  ;;  %v6090_v42 = vsub.s32 1, %v6088_v44 }
 0x6ea   :  { %2420 = vmatprep.mubr.f32.mxu0 %v6079_v1  ;;  %2497 = vmatprep.mubr.f32.mxu1 %v6079_v1 }
 0x6eb   :  { %2534 = vmatprep.subr.mxu0 %v5244_v24  ;;  %2636 = vmatprep.subr.mxu1 %v5244_v24 }
 0x6ec   :  { %2535 = vmatpush1.msra.mxu0 %v5249_v31  ;;  %2637 = vmatpush1.msra.mxu1 %v5249_v31 }
 0x6ed   :  { %2536 = vmatprep.subr.mxu0 %v5254_v51  ;;  %2638 = vmatprep.subr.mxu1 %v5254_v51 }
 0x6ee   :  { %2537 = vmatpush1.msra.mxu0 %v5260_v43  ;;  %2639 = vmatpush1.msra.mxu1 %v5260_v43 }
 0x6ef   :  { %2538 = vmatprep.subr.mxu0 %v5281_v5  ;;  %2640 = vmatprep.subr.mxu1 %v5281_v5 }
 0x6f0   :  { %2539 = vmatpush1.msra.mxu0 %v5286_v4  ;;  %2641 = vmatpush1.msra.mxu1 %v5286_v4 }
 0x6f1   :  { %2540 = vmatprep.subr.mxu0 %v5292_v0  ;;  %2642 = vmatprep.subr.mxu1 %v5292_v0 }
 0x6f2   :  { %2541 = vmatpush1.msra.mxu0 %v5297_v40  ;;  %2643 = vmatpush1.msra.mxu1 %v5297_v40 }
 0x6f3   :  { %2542 = vmatprep.subr.mxu0 %v5304_v21  ;;  %2644 = vmatprep.subr.mxu1 %v5304_v21 }
 0x6f4   :  { %2543 = vmatpush1.msra.mxu0 %v5311_v53  ;;  %2645 = vmatpush1.msra.mxu1 %v5311_v53 }
 0x6f5   :  { %2544 = vmatprep.subr.mxu0 %v5318_v54  ;;  %2646 = vmatprep.subr.mxu1 %v5318_v54 }
 0x6f6   :  { %2545 = vmatpush1.msra.mxu0 %v5325_v56  ;;  %2647 = vmatpush1.msra.mxu1 %v5325_v56 }
 0x6f7   :  { %2546 = vmatprep.subr.mxu0 %v5336_v57  ;;  %2648 = vmatprep.subr.mxu1 %v5336_v57 }
 0x6f8   :  { %2547 = vmatpush1.msra.mxu0 %v5341_v58  ;;  %2649 = vmatpush1.msra.mxu1 %v5341_v58 }
 0x6f9   :  { %2548 = vmatprep.subr.mxu0 %v5346_v59  ;;  %2650 = vmatprep.subr.mxu1 %v5346_v59 }
 0x6fa   :  { %2549 = vmatpush1.msra.mxu0 %v5353_v61  ;;  %2651 = vmatpush1.msra.mxu1 %v5353_v61 }
 0x6fb   :  { %2739 = vmatprep.subr.mxu0 %v5244_v24  ;;  %2842 = vmatprep.subr.mxu1 %v5244_v24 }
 0x744   :  { %v2138_v12 = vpop.permute.xlu0 %2137 }
 0x745   :  { %2140 = vst.msk [vmem:[#allocation2 + $0x8] sm:$0x30] %vm1356_vm4, %v2138_v12  ;;  %v5398_v12 = vrot.slane %v3751_v48, %v6090_v42 }
 0x794   :  { %v2213_v30 = vpop.f32.mrf.mxu0  ;;  %v2284_v23 = vpop.f32.mrf.mxu1 }
 0x795   :  { %v2293_v47 = vrot.slane %v2213_v30, 2  ;;  %v2295_v37 = vrot.slane %v2284_v23, 2 }
 0x796   :  { %v2215_v50 = vpop.f32.mrf.mxu0  ;;  %v2286_v46 = vpop.f32.mrf.mxu1 }
 0x797   :  { %v2301_v49 = vadd.f32 %v2293_v47, %v6084_v39  ;;  %v2294_v16 = vrot.slane %v2215_v50, 2  ;;  %v2303_v27 = vadd.f32 %v2295_v37, %v6085_v29  ;;  %v2296_v45 = vrot.slane %v2286_v46, 2 }
 0x799   :  { %3857 = vtanh.f32 %v2301_v49  ;;  %v2302_v35 = vadd.f32 %v2294_v16, %v6086_v6  ;;  %v2304_v26 = vadd.f32 %v2296_v45, %v6087_v20 }
 0x79b   :  { %3859 = vtanh.f32 %v2302_v35 }
 0x79c   :  { %3861 = vtanh.f32 %v2303_v27 }
 0x79d   :  { %3863 = vtanh.f32 %v2304_v26 }
 0x7a6   :  { %v3858_v15 = vpop.eup %3857 }
 0x7a7   :  { %v2309_v36 = vmul.f32 0.5, %v3858_v15 }
 0x7a8   :  { %v3860_v22 = vpop.eup %3859 }
 0x7a9   :  { %v2313_v17 = vadd.f32 0.5, %v2309_v36  ;;  %v2310_v34 = vmul.f32 0.5, %v3860_v22  ;;  %v3862_v13 = vpop.eup %3861  ;;  %v2416_v38 = vpop.f32.mrf.mxu0 }
 0x7aa   :  { %v3864_v18 = vpop.eup %3863  ;;  %v2493_v10 = vpop.f32.mrf.mxu1  ;;  %v2417_v30 = vadd.f32 %v2416_v38, %v2336_v33 }
 0x7ab   :  { %v2314_v14 = vadd.f32 0.5, %v2310_v34  ;;  %v2321_v11 = vmul.f32 %v3862_v13, %v2313_v17  ;;  %v2312_v55 = vmul.f32 0.5, %v3864_v18  ;;  %v2418_v19 = vpop.f32.mrf.mxu0  ;;  %v3028_v37 = vrot.slane %v2493_v10, 2 }
 0x7ac   :  { %v5394_v25 = vpop.f32.mrf.mxu1  ;;  %v2925_v16 = vrot.slane %v2493_v10, 6  ;;  %v2419_v6 = vadd.f32 %v2418_v19, %v5398_v12  ;;  %v6091_v13 = vlaneseq }
 0x7ad   :  { %v2320_v32 = vmul.f32 %v2318_v28, %v2314_v14  ;;  %v2316_v60 = vadd.f32 0.5, %v2312_v55 }
 0x7ae   :  { %v204_v14 = vand.u32 127, %v6091_v13 }
 0x7af   :  { %v5275_v3 = vadd.f32 %v2321_v11, %v2320_v32  ;;  %v4026_v11 = vmov 0.5  }
 0x7b0   :  { %v205_v28 = vadd.s32 128, %v204_v14 }
 0x7b1   :  { %3865 = vtanh.f32 %v5275_v3 }
 0x7b2   :  { %vm231_vm8 = vcmp.lt.s32.totalorder %v205_v28, 192 }
 0x7b3   :  { %v5416_v32 = vsel %vm231_vm8, 1.0, %v4026_v11 }
 0x7be   :  { %v3866_v62 = vpop.eup %3865 }
 0x7bf   :  { %v2324_v63 = vmul.f32 %v3866_v62, %v2316_v60  ;;  %v5418_v60 = vsel %vm231_vm8, 0.0, %v4026_v11 }
 0x7c1   :  { %2326 = vrot.lane.b32.xlu1 %v2324_v63, %s4025_s27  ;;  %v2512_v2 = vrot.slane %v2324_v63, 6 }
 0x7c3   :  { %2513 = vrot.lane.b32.xlu0 %v2512_v2, %s4025_s27 }
 0x833   :  { %v2327_v7 = vpop.permute.xlu1 %2326 }
 0x834   :  { %2329 = vst.msk [vmem:[#allocation2 + $0x8] sm:$0xc0] %vm1558_vm5, %v2327_v7  ;;  %v2598_v7 = vrot.slane %v5275_v3, 6 }
 0x835   :  { %v2514_v41 = vpop.permute.xlu0 %2513 }
 0x83b   :  { %v2331_v8 = vld [vmem:[#allocation2 + $0x8] sm:$0xff] }
 0x83c   :  { %3765 = vmatmul.mubr.msk.f32.gmra.mxu0 %vm2343_vm6, %v2331_v8  ;;  %3767 = vmatmul.mubr.msk.f32.gmra.mxu1 %vm2343_vm6, %v2331_v8 }
 0x83d   :  { %2582 = vmatprep.mubr.f32.mxu0 %v6079_v1  ;;  %2684 = vmatprep.mubr.f32.mxu1 %v6079_v1 }
 0x840   :  { %3768 = vmatmul.mubr.msk.f32.vlgmr.msra.gmra.mxu0 %vm2515_vm7, %v2514_v41 }
 0x841   :  { %2740 = vmatpush1.msra.mxu0 %v5249_v31  ;;  %2787 = vmatprep.mubr.f32.mxu0 %v6079_v1 }
 0x842   :  { %2741 = vmatprep.subr.mxu0 %v5254_v51 }
 0x843   :  { %2742 = vmatpush1.msra.mxu0 %v5260_v43 }
 0x844   :  { %2743 = vmatprep.subr.mxu0 %v5281_v5 }
 0x845   :  { %2744 = vmatpush1.msra.mxu0 %v5286_v4 }
 0x846   :  { %2745 = vmatprep.subr.mxu0 %v5292_v0 }
 0x847   :  { %2746 = vmatpush1.msra.mxu0 %v5297_v40 }
 0x848   :  { %2747 = vmatprep.subr.mxu0 %v5304_v21 }
 0x849   :  { %2748 = vmatpush1.msra.mxu0 %v5311_v53 }
 0x84a   :  { %2749 = vmatprep.subr.mxu0 %v5318_v54 }
 0x84b   :  { %2750 = vmatpush1.msra.mxu0 %v5325_v56 }
 0x84c   :  { %2751 = vmatprep.subr.mxu0 %v5336_v57 }
 0x84d   :  { %2752 = vmatpush1.msra.mxu0 %v5341_v58 }
 0x84e   :  { %2753 = vmatprep.subr.mxu0 %v5346_v59 }
 0x84f   :  { %2754 = vmatpush1.msra.mxu0 %v5353_v61 }
 0x850   :  { %2953 = vmatprep.subr.mxu0 %v5244_v24 }
 0x8fc   :  { %v2422_v23 = vpop.f32.mrf.mxu0  ;;  %v2499_v47 = vpop.f32.mrf.mxu1 }
 0x8fd   :  { %v2423_v50 = vadd.f32 %v2422_v23, %v2336_v33  ;;  %v2506_v39 = vrot.slane %v2499_v47, 6  ;;  %v2609_v49 = vrot.slane %v2499_v47, 2 }
 0x8fe   :  { %v5400_v29 = vpop.f32.mrf.mxu0  ;;  %v2501_v27 = vpop.f32.mrf.mxu1 }
 0x8ff   :  { %v5403_v35 = vadd.f32 %v3028_v37, %v2423_v50  ;;  %v5405_v46 = vadd.f32 %v2609_v49, %v2417_v30  ;;  %v2507_v45 = vrot.slane %v2501_v27, 6  ;;  %v5407_v20 = vadd.f32 %v2506_v39, %v2417_v30 }
 0x900   :  { %v2584_v26 = vpop.f32.mrf.mxu0  ;;  %v5409_v15 = vadd.f32 %v2925_v16, %v2423_v50  ;;  %v2610_v3 = vrot.slane %v2501_v27, 2 }
 0x901   :  { %v5411_v36 = vadd.f32 %v2507_v45, %v2419_v6  ;;  %v2589_v22 = vadd.f32 %v2584_v26, %v5407_v20 }
 0x902   :  { %v2586_v17 = vpop.f32.mrf.mxu0  ;;  %v5446_v23 = vadd.f32 %v2610_v3, %v2419_v6 }
 0x903   :  { %v2590_v34 = vadd.f32 %v2586_v17, %v5411_v36  ;;  %3867 = vtanh.f32 %v2589_v22 }
 0x905   :  { %3869 = vtanh.f32 %v2590_v34 }
 0x910   :  { %v3868_v18 = vpop.eup %3867 }
 0x911   :  { %v2593_v62 = vmul.f32 0.5, %v3868_v18 }
 0x912   :  { %v3870_v55 = vpop.eup %3869 }
 0x913   :  { %v2594_v63 = vmul.f32 %v3870_v55, %v5416_v32  ;;  %v2595_v2 = vadd.f32 0.5, %v2593_v62 }
 0x915   :  { %v2596_v8 = vadd.f32 %v2594_v63, %v5418_v60  ;;  %v2600_v41 = vmul.f32 %v2598_v7, %v2595_v2 }
 0x917   :  { %v2601_v48 = vmul.f32 %v2596_v8, %v2595_v2 }
 0x919   :  { %2603 = vrot.lane.b32.xlu1 %v2601_v48, %s4025_s27 }
 0x98b   :  { %v2604_v38 = vpop.permute.xlu1 %2603 }
 0x98c   :  { %v2606_v10 = vadd.f32 %v2604_v38, %v2600_v41 }
 0x98e   :  { %3871 = vtanh.f32 %v2606_v10  ;;  %v2706_v45 = vrot.slane %v2606_v10, 6 }
 0x99b   :  { %v3872_v44 = vpop.eup %3871 }
 0x99c   :  { %v5424_v52 = vmul.f32 %v3872_v44, %v2596_v8 }
 0x99e   :  { %2616 = vrot.lane.b32.xlu0 %v5424_v52, %s4025_s27 }
 0xa10   :  { %v2617_v33 = vpop.permute.xlu0 %2616 }
 0xa11   :  { %3769 = vmatmul.mubr.msk.f32.vlgmr.msra.gmra.mxu1 %vm2515_vm7, %v2617_v33 }
 0xa12   :  { %2843 = vmatpush1.msra.mxu1 %v5249_v31  ;;  %2890 = vmatprep.mubr.f32.mxu1 %v6079_v1 }
 0xa13   :  { %2844 = vmatprep.subr.mxu1 %v5254_v51 }
 0xa14   :  { %2845 = vmatpush1.msra.mxu1 %v5260_v43 }
 0xa15   :  { %2846 = vmatprep.subr.mxu1 %v5281_v5 }
 0xa16   :  { %2847 = vmatpush1.msra.mxu1 %v5286_v4 }
 0xa17   :  { %2848 = vmatprep.subr.mxu1 %v5292_v0 }
 0xa18   :  { %2849 = vmatpush1.msra.mxu1 %v5297_v40 }
 0xa19   :  { %2850 = vmatprep.subr.mxu1 %v5304_v21 }
 0xa1a   :  { %2851 = vmatpush1.msra.mxu1 %v5311_v53 }
 0xa1b   :  { %2852 = vmatprep.subr.mxu1 %v5318_v54 }
 0xa1c   :  { %2853 = vmatpush1.msra.mxu1 %v5325_v56 }
 0xa1d   :  { %2854 = vmatprep.subr.mxu1 %v5336_v57 }
 0xa1e   :  { %2855 = vmatpush1.msra.mxu1 %v5341_v58 }
 0xa1f   :  { %2856 = vmatprep.subr.mxu1 %v5346_v59 }
 0xa20   :  { %2857 = vmatpush1.msra.mxu1 %v5353_v61 }
 0xa21   :  { %3055 = vmatprep.subr.mxu1 %v5244_v24 }
 0xad1   :  { %v2686_v19 = vpop.f32.mrf.mxu1 }
 0xad2   :  { %v2693_v42 = vrot.slane %v2686_v19, 6 }
 0xad3   :  { %v2688_v30 = vpop.f32.mrf.mxu1 }
 0xad4   :  { %v2697_v47 = vadd.f32 %v2693_v42, %v5405_v46  ;;  %v2694_v37 = vrot.slane %v2688_v30, 6 }
 0xad6   :  { %3873 = vtanh.f32 %v2697_v47  ;;  %v2698_v50 = vadd.f32 %v2694_v37, %v5446_v23 }
 0xad8   :  { %3875 = vtanh.f32 %v2698_v50 }
 0xae3   :  { %v3874_v39 = vpop.eup %3873 }
 0xae4   :  { %v2701_v49 = vmul.f32 0.5, %v3874_v39 }
 0xae5   :  { %v3876_v16 = vpop.eup %3875 }
 0xae6   :  { %v2702_v26 = vmul.f32 %v3876_v16, %v5416_v32  ;;  %v2703_v22 = vadd.f32 0.5, %v2701_v49 }
 0xae8   :  { %v2704_v27 = vadd.f32 %v2702_v26, %v5418_v60  ;;  %v2708_v17 = vmul.f32 %v2706_v45, %v2703_v22 }
 0xaea   :  { %v2709_v34 = vmul.f32 %v2704_v27, %v2703_v22 }
 0xaec   :  { %2711 = vrot.lane.b32.xlu1 %v2709_v34, %s4025_s27 }
 0xb5e   :  { %v2712_v6 = vpop.permute.xlu1 %2711 }
 0xb5f   :  { %v2714_v13 = vadd.f32 %v2712_v6, %v2708_v17 }
 0xb61   :  { %3877 = vtanh.f32 %v2714_v13  ;;  %v2809_v10 = vrot.slane %v2714_v13, 6 }
 0xb6e   :  { %v3878_v14 = vpop.eup %3877 }
 0xb6f   :  { %v5453_v28 = vmul.f32 %v3878_v14, %v2704_v27 }
 0xb71   :  { %v2718_v11 = vrot.slane %v5453_v28, 2 }
 0xb73   :  { %2719 = vrot.lane.b32.xlu0 %v2718_v11, %s4025_s27 }
 0xbe5   :  { %v2720_v18 = vpop.permute.xlu0 %2719 }
 0xbe6   :  { %3770 = vmatmul.mubr.msk.f32.vlgmr.msra.gmra.mxu0 %vm2515_vm7, %v2720_v18 }
 0xbe7   :  { %2954 = vmatpush1.msra.mxu0 %v5249_v31  ;;  %3001 = vmatprep.mubr.f32.mxu0 %v6079_v1 }
 0xbe8   :  { %2955 = vmatprep.subr.mxu0 %v5254_v51 }
 0xbe9   :  { %2956 = vmatpush1.msra.mxu0 %v5260_v43 }
 0xbea   :  { %2957 = vmatprep.subr.mxu0 %v5281_v5 }
 0xbeb   :  { %2958 = vmatpush1.msra.mxu0 %v5286_v4 }
 0xbec   :  { %2959 = vmatprep.subr.mxu0 %v5292_v0 }
 0xbed   :  { %2960 = vmatpush1.msra.mxu0 %v5297_v40 }
 0xbee   :  { %2961 = vmatprep.subr.mxu0 %v5304_v21 }
 0xbef   :  { %2962 = vmatpush1.msra.mxu0 %v5311_v53 }
 0xbf0   :  { %2963 = vmatprep.subr.mxu0 %v5318_v54 }
 0xbf1   :  { %2964 = vmatpush1.msra.mxu0 %v5325_v56 }
 0xbf2   :  { %2965 = vmatprep.subr.mxu0 %v5336_v57 }
 0xbf3   :  { %2966 = vmatpush1.msra.mxu0 %v5341_v58 }
 0xbf4   :  { %2967 = vmatprep.subr.mxu0 %v5346_v59 }
 0xbf5   :  { %2968 = vmatpush1.msra.mxu0 %v5353_v61 }
 0xbf6   :  { %3158 = vmatprep.subr.mxu0 %v5244_v24 }
 0xca6   :  { %v2789_v55 = vpop.f32.mrf.mxu0 }
 0xca7   :  { %v2796_v62 = vrot.slane %v2789_v55, 4 }
 0xca8   :  { %v2791_v63 = vpop.f32.mrf.mxu0 }
 0xca9   :  { %v2800_v2 = vadd.f32 %v2796_v62, %v5407_v20  ;;  %v2797_v7 = vrot.slane %v2791_v63, 4 }
 0xcab   :  { %3879 = vtanh.f32 %v2800_v2  ;;  %v2801_v8 = vadd.f32 %v2797_v7, %v5411_v36  ;;  %v2425_v7 = vadd.f32 %v5400_v29, %v5398_v12 }
 0xcad   :  { %3881 = vtanh.f32 %v2801_v8  ;;  %v2926_v8 = vrot.slane %v5394_v25, 6 }
 0xcb8   :  { %v3880_v41 = vpop.eup %3879 }
 0xcb9   :  { %v2804_v48 = vmul.f32 0.5, %v3880_v41 }
 0xcba   :  { %v3882_v38 = vpop.eup %3881 }
 0xcbb   :  { %v2805_v44 = vmul.f32 %v3882_v38, %v5416_v32  ;;  %v2806_v33 = vadd.f32 0.5, %v2804_v48  ;;  %v5534_v38 = vadd.f32 %v2926_v8, %v2425_v7 }
 0xcbd   :  { %v2807_v3 = vadd.f32 %v2805_v44, %v5418_v60  ;;  %v2811_v19 = vmul.f32 %v2809_v10, %v2806_v33 }
 0xcbf   :  { %v2812_v42 = vmul.f32 %v2807_v3, %v2806_v33 }
 0xcc1   :  { %2814 = vrot.lane.b32.xlu1 %v2812_v42, %s4025_s27 }
 0xd33   :  { %v2815_v30 = vpop.permute.xlu1 %2814 }
 0xd34   :  { %v2817_v20 = vadd.f32 %v2815_v30, %v2811_v19 }
 0xd36   :  { %3883 = vtanh.f32 %v2817_v20  ;;  %v2912_v6 = vrot.slane %v2817_v20, 6 }
 0xd43   :  { %v3884_v47 = vpop.eup %3883 }
 0xd44   :  { %v5480_v37 = vmul.f32 %v3884_v47, %v2807_v3 }
 0xd46   :  { %v2821_v36 = vrot.slane %v5480_v37, 4 }
 0xd48   :  { %2822 = vrot.lane.b32.xlu0 %v2821_v36, %s4025_s27 }
 0xdba   :  { %v2823_v50 = vpop.permute.xlu0 %2822 }
 0xdbb   :  { %3771 = vmatmul.mubr.msk.f32.vlgmr.msra.gmra.mxu1 %vm2515_vm7, %v2823_v50 }
 0xdbc   :  { %3056 = vmatpush1.msra.mxu1 %v5249_v31  ;;  %3103 = vmatprep.mubr.f32.mxu1 %v6079_v1 }
 0xdbd   :  { %3057 = vmatprep.subr.mxu1 %v5254_v51 }
 0xdbe   :  { %3058 = vmatpush1.msra.mxu1 %v5260_v43 }
 0xdbf   :  { %3059 = vmatprep.subr.mxu1 %v5281_v5 }
 0xdc0   :  { %3060 = vmatpush1.msra.mxu1 %v5286_v4 }
 0xdc1   :  { %3061 = vmatprep.subr.mxu1 %v5292_v0 }
 0xdc2   :  { %3062 = vmatpush1.msra.mxu1 %v5297_v40 }
 0xdc3   :  { %3063 = vmatprep.subr.mxu1 %v5304_v21 }
 0xdc4   :  { %3064 = vmatpush1.msra.mxu1 %v5311_v53 }
 0xdc5   :  { %3065 = vmatprep.subr.mxu1 %v5318_v54 }
 0xdc6   :  { %3066 = vmatpush1.msra.mxu1 %v5325_v56 }
 0xdc7   :  { %3067 = vmatprep.subr.mxu1 %v5336_v57 }
 0xdc8   :  { %3068 = vmatpush1.msra.mxu1 %v5341_v58 }
 0xdc9   :  { %3069 = vmatprep.subr.mxu1 %v5346_v59 }
 0xdca   :  { %3070 = vmatpush1.msra.mxu1 %v5353_v61 }
 0xdcb   :  { %3261 = vmatprep.subr.mxu1 %v5244_v24 }
 0xe7b   :  { %v2892_v39 = vpop.f32.mrf.mxu1 }
 0xe7c   :  { %v2899_v49 = vrot.slane %v2892_v39, 2 }
 0xe7d   :  { %v2894_v16 = vpop.f32.mrf.mxu1 }
 0xe7e   :  { %v2903_v45 = vadd.f32 %v2899_v49, %v5405_v46  ;;  %v2900_v26 = vrot.slane %v2894_v16, 2 }
 0xe80   :  { %3885 = vtanh.f32 %v2903_v45  ;;  %v2904_v22 = vadd.f32 %v2900_v26, %v5446_v23 }
 0xe82   :  { %3887 = vtanh.f32 %v2904_v22 }
 0xe8d   :  { %v3886_v27 = vpop.eup %3885 }
 0xe8e   :  { %v2907_v17 = vmul.f32 0.5, %v3886_v27 }
 0xe8f   :  { %v3888_v34 = vpop.eup %3887 }
 0xe90   :  { %v2908_v13 = vmul.f32 %v3888_v34, %v5416_v32  ;;  %v2909_v14 = vadd.f32 0.5, %v2907_v17 }
 0xe92   :  { %v2910_v11 = vadd.f32 %v2908_v13, %v5418_v60  ;;  %v2914_v24 = vmul.f32 %v2912_v6, %v2909_v14 }
 0xe94   :  { %v2915_v18 = vmul.f32 %v2910_v11, %v2909_v14 }
 0xe96   :  { %2917 = vrot.lane.b32.xlu1 %v2915_v18, %s4025_s27 }
 0xf08   :  { %v2918_v55 = vpop.permute.xlu1 %2917 }
 0xf09   :  { %v2920_v46 = vadd.f32 %v2918_v55, %v2914_v24 }
 0xf0b   :  { %3889 = vtanh.f32 %v2920_v46  ;;  %v3017_v42 = vrot.slane %v2920_v46, 6 }
 0xf18   :  { %v3890_v62 = vpop.eup %3889 }
 0xf19   :  { %v5507_v63 = vmul.f32 %v3890_v62, %v2910_v11 }
 0xf1b   :  { %v2932_v23 = vrot.slane %v5507_v63, 6 }
 0xf1d   :  { %2933 = vrot.lane.b32.xlu0 %v2932_v23, %s4025_s27 }
 0xf8f   :  { %v2934_v2 = vpop.permute.xlu0 %2933 }
 0xf90   :  { %3772 = vmatmul.mubr.msk.f32.vlgmr.msra.gmra.mxu0 %vm2515_vm7, %v2934_v2 }
 0xf91   :  { %3159 = vmatpush1.msra.mxu0 %v5249_v31  ;;  %3206 = vmatprep.mubr.f32.mxu0 %v6079_v1 }
 0xf92   :  { %3160 = vmatprep.subr.mxu0 %v5254_v51 }
 0xf93   :  { %3161 = vmatpush1.msra.mxu0 %v5260_v43 }
 0xf94   :  { %3162 = vmatprep.subr.mxu0 %v5281_v5 }
 0xf95   :  { %3163 = vmatpush1.msra.mxu0 %v5286_v4 }
 0xf96   :  { %3164 = vmatprep.subr.mxu0 %v5292_v0 }
 0xf97   :  { %3165 = vmatpush1.msra.mxu0 %v5297_v40 }
 0xf98   :  { %3166 = vmatprep.subr.mxu0 %v5304_v21 }
 0xf99   :  { %3167 = vmatpush1.msra.mxu0 %v5311_v53 }
 0xf9a   :  { %3168 = vmatprep.subr.mxu0 %v5318_v54 }
 0xf9b   :  { %3169 = vmatpush1.msra.mxu0 %v5325_v56 }
 0xf9c   :  { %3170 = vmatprep.subr.mxu0 %v5336_v57 }
 0xf9d   :  { %3171 = vmatpush1.msra.mxu0 %v5341_v58 }
 0xf9e   :  { %3172 = vmatprep.subr.mxu0 %v5346_v59 }
 0xf9f   :  { %3173 = vmatpush1.msra.mxu0 %v5353_v61 }
0x1050   :  { %v3003_v41 = vpop.f32.mrf.mxu0 }
0x1051   :  { %v3008_v48 = vadd.f32 %v3003_v41, %v5409_v15 }
0x1052   :  { %v3005_v10 = vpop.f32.mrf.mxu0 }
0x1053   :  { %3891 = vtanh.f32 %v3008_v48  ;;  %v3009_v44 = vadd.f32 %v3005_v10, %v5534_v38 }
0x1055   :  { %3893 = vtanh.f32 %v3009_v44 }
0x1060   :  { %v3892_v33 = vpop.eup %3891 }
0x1061   :  { %v3012_v3 = vmul.f32 0.5, %v3892_v33 }
0x1062   :  { %v3894_v19 = vpop.eup %3893 }
0x1063   :  { %v3014_v30 = vadd.f32 0.5, %v3012_v3  ;;  %v3013_v20 = vmul.f32 %v3894_v19, %v5416_v32 }
0x1065   :  { %v3015_v12 = vadd.f32 %v3013_v20, %v5418_v60  ;;  %v3019_v29 = vmul.f32 %v3017_v42, %v3014_v30 }
0x1067   :  { %v3020_v47 = vmul.f32 %v3015_v12, %v3014_v30 }
0x1069   :  { %3022 = vrot.lane.b32.xlu1 %v3020_v47, %s4025_s27 }
0x10db   :  { %v3023_v36 = vpop.permute.xlu1 %3022 }
0x10dc   :  { %v3025_v50 = vadd.f32 %v3023_v36, %v3019_v29 }
0x10de   :  { %3895 = vtanh.f32 %v3025_v50 }
0x10eb   :  { %v3896_v39 = vpop.eup %3895 }
0x10ec   :  { %v5540_v49 = vmul.f32 %v3896_v39, %v3015_v12 }
0x10ee   :  { %3035 = vrot.lane.b32.xlu0 %v5540_v49, %s4025_s27 }
0x1160   :  { %v3036_v16 = vpop.permute.xlu0 %3035 }
0x1161   :  { %3773 = vmatmul.mubr.msk.f32.vlgmr.msra.gmra.mxu1 %vm2515_vm7, %v3036_v16 }
0x1162   :  { %3262 = vmatpush1.msra.mxu1 %v5249_v31  ;;  %3309 = vmatprep.mubr.f32.mxu1 %v6079_v1  ;;  %v3029_v31 = vrot.slane %v5394_v25, 2 }
0x1163   :  { %3263 = vmatprep.subr.mxu1 %v5254_v51 }
0x1164   :  { %3264 = vmatpush1.msra.mxu1 %v5260_v43 }
0x1165   :  { %3265 = vmatprep.subr.mxu1 %v5281_v5  ;;  %v3033_v5 = vadd.f32 %v3029_v31, %v2425_v7 }
0x1166   :  { %3266 = vmatpush1.msra.mxu1 %v5286_v4 }
0x1167   :  { %3267 = vmatprep.subr.mxu1 %v5292_v0 }
0x1168   :  { %3268 = vmatpush1.msra.mxu1 %v5297_v40 }
0x1169   :  { %3269 = vmatprep.subr.mxu1 %v5304_v21 }
0x116a   :  { %3270 = vmatpush1.msra.mxu1 %v5311_v53 }
0x116b   :  { %3271 = vmatprep.subr.mxu1 %v5318_v54 }
0x116c   :  { %3272 = vmatpush1.msra.mxu1 %v5325_v56  ;;  %v3125_v56 = vrot.slane %v3025_v50, 6 }
0x116d   :  { %3273 = vmatprep.subr.mxu1 %v5336_v57 }
0x116e   :  { %3274 = vmatpush1.msra.mxu1 %v5341_v58 }
0x116f   :  { %3275 = vmatprep.subr.mxu1 %v5346_v59 }
0x1170   :  { %3276 = vmatpush1.msra.mxu1 %v5353_v61 }
0x1221   :  { %v3105_v1 = vpop.f32.mrf.mxu1 }
0x1222   :  { %v3112_v51 = vrot.slane %v3105_v1, 6 }
0x1223   :  { %v3107_v43 = vpop.f32.mrf.mxu1 }
0x1224   :  { %v3116_v4 = vadd.f32 %v3112_v51, %v5403_v35  ;;  %v3113_v0 = vrot.slane %v3107_v43, 6 }
0x1226   :  { %3897 = vtanh.f32 %v3116_v4  ;;  %v3117_v40 = vadd.f32 %v3113_v0, %v3033_v5 }
0x1228   :  { %3899 = vtanh.f32 %v3117_v40 }
0x1233   :  { %v3898_v21 = vpop.eup %3897 }
0x1234   :  { %v3120_v53 = vmul.f32 0.5, %v3898_v21 }
0x1235   :  { %v3900_v54 = vpop.eup %3899 }
0x1236   :  { %v3121_v57 = vmul.f32 %v3900_v54, %v5416_v32  ;;  %v3122_v58 = vadd.f32 0.5, %v3120_v53 }
0x1238   :  { %v3123_v59 = vadd.f32 %v3121_v57, %v5418_v60  ;;  %v3127_v61 = vmul.f32 %v3125_v56, %v3122_v58 }
0x123a   :  { %v3128_v25 = vmul.f32 %v3123_v59, %v3122_v58 }
0x123c   :  { %3130 = vrot.lane.b32.xlu1 %v3128_v25, %s4025_s27 }
0x12ae   :  { %v3131_v45 = vpop.permute.xlu1 %3130 }
0x12af   :  { %v3133_v26 = vadd.f32 %v3131_v45, %v3127_v61 }
0x12b1   :  { %3901 = vtanh.f32 %v3133_v26  ;;  %v3228_v2 = vrot.slane %v3133_v26, 6 }
0x12be   :  { %v3902_v22 = vpop.eup %3901 }
0x12bf   :  { %v5566_v27 = vmul.f32 %v3902_v22, %v3123_v59 }
0x12c1   :  { %v3137_v17 = vrot.slane %v5566_v27, 2 }
0x12c3   :  { %3138 = vrot.lane.b32.xlu0 %v3137_v17, %s4025_s27 }
0x1335   :  { %v3139_v34 = vpop.permute.xlu0 %3138 }
0x1336   :  { %3774 = vmatmul.mubr.msk.f32.vlgmr.msra.gmra.mxu0 %vm2515_vm7, %v3139_v34 }
0x13f6   :  { %v3208_v6 = vpop.f32.mrf.mxu0 }
0x13f7   :  { %v3215_v13 = vrot.slane %v3208_v6, 4 }
0x13f8   :  { %v3210_v14 = vpop.f32.mrf.mxu0 }
0x13f9   :  { %v3219_v11 = vadd.f32 %v3215_v13, %v5409_v15  ;;  %v3216_v24 = vrot.slane %v3210_v14, 4 }
0x13fb   :  { %3903 = vtanh.f32 %v3219_v11  ;;  %v3220_v18 = vadd.f32 %v3216_v24, %v5534_v38 }
0x13fd   :  { %3905 = vtanh.f32 %v3220_v18 }
0x1408   :  { %v3904_v55 = vpop.eup %3903 }
0x1409   :  { %v3223_v46 = vmul.f32 0.5, %v3904_v55 }
0x140a   :  { %v3906_v62 = vpop.eup %3905 }
0x140b   :  { %v3224_v7 = vmul.f32 %v3906_v62, %v5416_v32  ;;  %v3225_v8 = vadd.f32 0.5, %v3223_v46 }
0x140d   :  { %v3226_v41 = vadd.f32 %v3224_v7, %v5418_v60  ;;  %v3230_v48 = vmul.f32 %v3228_v2, %v3225_v8 }
0x140f   :  { %v3231_v10 = vmul.f32 %v3226_v41, %v3225_v8 }
0x1411   :  { %3233 = vrot.lane.b32.xlu1 %v3231_v10, %s4025_s27 }
0x1483   :  { %v3234_v44 = vpop.permute.xlu1 %3233 }
0x1484   :  { %v3236_v15 = vadd.f32 %v3234_v44, %v3230_v48 }
0x1486   :  { %3907 = vtanh.f32 %v3236_v15  ;;  %v3331_v16 = vrot.slane %v3236_v15, 6 }
0x1493   :  { %v3908_v33 = vpop.eup %3907 }
0x1494   :  { %v5576_v3 = vmul.f32 %v3908_v33, %v3226_v41 }
0x1496   :  { %v3240_v38 = vrot.slane %v5576_v3, 4 }
0x1498   :  { %3241 = vrot.lane.b32.xlu0 %v3240_v38, %s4025_s27 }
0x150a   :  { %v3242_v19 = vpop.permute.xlu0 %3241 }
0x150b   :  { %3775 = vmatmul.mubr.msk.f32.vlgmr.msra.gmra.mxu1 %vm2515_vm7, %v3242_v19 }
0x15cb   :  { %v3311_v42 = vpop.f32.mrf.mxu1 }
0x15cc   :  { %v3318_v30 = vrot.slane %v3311_v42, 2 }
0x15cd   :  { %v3313_v20 = vpop.f32.mrf.mxu1 }
0x15ce   :  { %v3322_v12 = vadd.f32 %v3318_v30, %v5403_v35  ;;  %v3319_v29 = vrot.slane %v3313_v20, 2 }
0x15d0   :  { %3909 = vtanh.f32 %v3322_v12  ;;  %v3323_v47 = vadd.f32 %v3319_v29, %v3033_v5 }
0x15d2   :  { %3911 = vtanh.f32 %v3323_v47 }
0x15dd   :  { %v3910_v36 = vpop.eup %3909 }
0x15de   :  { %v3326_v50 = vmul.f32 0.5, %v3910_v36 }
0x15df   :  { %v3912_v39 = vpop.eup %3911 }
0x15e0   :  { %v3327_v1 = vmul.f32 %v3912_v39, %v5416_v32  ;;  %v3328_v31 = vadd.f32 0.5, %v3326_v50 }
0x15e2   :  { %v3329_v51 = vadd.f32 %v3327_v1, %v5418_v60  ;;  %v3333_v43 = vmul.f32 %v3331_v16, %v3328_v31 }
0x15e4   :  { %v3334_v4 = vmul.f32 %v3329_v51, %v3328_v31 }
0x15e6   :  { %3336 = vrot.lane.b32.xlu1 %v3334_v4, %s4025_s27 }
0x1658   :  { %v3337_v0 = vpop.permute.xlu1 %3336 }
0x1659   :  { %v3339_v40 = vadd.f32 %v3337_v0, %v3333_v43 }
0x165b   :  { %3913 = vtanh.f32 %v3339_v40 }
0x1668   :  { %v3914_v35 = vpop.eup %3913 }
0x1669   :  { %v5585_v21 = vmul.f32 %v3914_v35, %v3329_v51 }
0x166b   :  { %v3343_v5 = vrot.slane %v5585_v21, 4 }
0x166d   :  { %3344 = vrot.lane.b32.xlu0 %v3343_v5, %s4025_s27 }
0x16df   :  { %v3345_v53 = vpop.permute.xlu0 %3344 }
0x16e0   :  { %v3347_v32 = vmul.f32 %v3345_v53, %v5036_v9 }
0x16e2   :  { %v3348_v54 = vmul.f32 0.125, %v3347_v32 }
0x16e4   :  { %v3378_v56 = vrot.slane %v3348_v54, 6  ;;  %v3350_v60 = vrot.slane %v3348_v54, 2  ;;  %v3355_v57 = vrot.slane %v3348_v54, 4 }
0x16e6   :  { %3379 = vrot.lane.b32.xlu0 %v3378_v56, %s4027_s2  ;;  %3423 = vrot.lane.b32.xlu1 %v3350_v60, %s4027_s2 }
0x16ea   :  { %3356 = vrot.lane.b32.xlu0 %v3355_v57, %s4027_s2  ;;  %3401 = vrot.lane.b32.xlu1 %v3348_v54, %s4027_s2 }
0x16ee   :  { %3374 = vrot.lane.b32.xlu0 %v3348_v54, %s4022_s19  ;;  %3419 = vrot.lane.b32.xlu1 %v3355_v57, %s4022_s19 }
0x16f2   :  { %3351 = vrot.lane.b32.xlu0 %v3350_v60, %s4022_s19  ;;  %3397 = vrot.lane.b32.xlu1 %v3378_v56, %s4022_s19 }
0x1758   :  { %v3380_v9 = vpop.permute.xlu0 %3379  ;;  %v3424_v58 = vpop.permute.xlu1 %3423 }
0x1759   :  { %v3487_v59 = vmul.f32 %v3424_v58, %v5424_v52  ;;  %v3382_v61 = vmul.f32 %v3380_v9, %v5576_v3  ;;  %v3457_v17 = vmul.f32 %v3380_v9, %v5480_v37  ;;  %v3426_v24 = vmul.f32 %v3424_v58, %v5540_v49 }
0x175b   :  { %v3489_v25 = vrot.slane %v3487_v59, 2  ;;  %v3384_v22 = vrot.slane %v3382_v61, 2  ;;  %v3459_v14 = vrot.slane %v3457_v17, 2  ;;  %v3428_v46 = vrot.slane %v3426_v24, 2 }
0x175c   :  { %v3402_v45 = vpop.permute.xlu1 %3401  ;;  %v3357_v6 = vpop.permute.xlu0 %3356 }
0x175d   :  { %v3404_v26 = vmul.f32 %v3402_v45, %v5566_v27  ;;  %3490 = vrot.lane.b32.xlu1 %v3489_v25, %s4027_s2  ;;  %v3472_v13 = vmul.f32 %v3402_v45, %v5453_v28  ;;  %v3359_v11 = vmul.f32 %v3357_v6, %v5585_v21  ;;  %v3442_v62 = vmul.f32 %v3357_v6, %v5507_v63 }
0x175e   :  { %v3681_v6 = vrot.slane %v5566_v27, 6 }
0x175f   :  { %v3406_v34 = vrot.slane %v3404_v26, 6  ;;  %v3474_v18 = vrot.slane %v3472_v13, 6  ;;  %v3361_v55 = vrot.slane %v3359_v11, 6  ;;  %v3444_v2 = vrot.slane %v3442_v62, 6 }
0x1760   :  { %v3375_v7 = vpop.permute.xlu0 %3374  ;;  %v3420_v8 = vpop.permute.xlu1 %3419  ;;  %v3676_v13 = vrot.slane %v5576_v3, 2  ;;  %v4028_v11 = vmov 0  }
0x1761   :  { %3385 = vrot.lane.b32.xlu1 %v3384_v22, %s4027_s2  ;;  %3407 = vrot.lane.b32.xlu0 %v3406_v34, %s4027_s2  ;;  %v3422_v20 = vmul.f32 %v3420_v8, %v5507_v63  ;;  %v3486_v12 = vmul.f32 %v3420_v8, %v5585_v21  ;;  %v3377_v50 = vmul.f32 %v3375_v7, %v5453_v28  ;;  %v3671_v34 = vrot.slane %v5585_v21, 6 }
0x1762   :  { %v3456_v43 = vmul.f32 %v3375_v7, %v5566_v27  ;;  %3786 = vset.pattern.permute.xlu1 %v4028_v11  ;;  %3785 = vset.pattern.permute.xlu0 %v4028_v11 }
0x1764   :  { %v3352_v41 = vpop.permute.xlu0 %3351  ;;  %v3398_v48 = vpop.permute.xlu1 %3397 }
0x1765   :  { %3460 = vrot.lane.b32.xlu1 %v3459_v14, %s4027_s2  ;;  %3475 = vrot.lane.b32.xlu0 %v3474_v18, %s4027_s2  ;;  %v3400_v10 = vmul.f32 %v3398_v48, %v5480_v37  ;;  %v3471_v38 = vmul.f32 %v3398_v48, %v5576_v3  ;;  %v3441_v39 = vmul.f32 %v3352_v41, %v5540_v49  ;;  %v3686_v14 = vrot.slane %v5540_v49, 2 }
0x1766   :  { %v3354_v40 = vmul.f32 %v3352_v41, %v5424_v52 }
0x1769   :  { %3362 = vrot.lane.b32.xlu1 %v3361_v55, %s4027_s2  ;;  %3429 = vrot.lane.b32.xlu0 %v3428_v46, %s4027_s2 }
0x176d   :  { %3445 = vrot.lane.b32.xlu0 %v3444_v2, %s4027_s2 }
0x17cf   :  { %v3491_v44 = vpop.permute.xlu1 %3490 }
0x17d0   :  { %v3493_v47 = vadd.f32 %v3491_v44, %v3486_v12 }
0x17d3   :  { %v3408_v15 = vpop.permute.xlu0 %3407  ;;  %v3386_v30 = vpop.permute.xlu1 %3385 }
0x17d4   :  { %v3410_v33 = vadd.f32 %v3408_v15, %v3400_v10  ;;  %v3388_v31 = vadd.f32 %v3386_v30, %v3377_v50 }
0x17d6   :  { %3412 = vrot.lane.b32.xlu0 %v3410_v33, %s4025_s27 }
0x17d7   :  { %v3476_v19 = vpop.permute.xlu0 %3475  ;;  %v3461_v16 = vpop.permute.xlu1 %3460 }
0x17d8   :  { %v3478_v42 = vadd.f32 %v3476_v19, %v3471_v38  ;;  %v3463_v4 = vadd.f32 %v3461_v16, %v3456_v43 }
0x17da   :  { %3480 = vrot.lane.b32.xlu0 %v3478_v42, %s4025_s27 }
0x17db   :  { %v3430_v29 = vpop.permute.xlu0 %3429  ;;  %v3363_v0 = vpop.permute.xlu1 %3362 }
0x17dc   :  { %v3432_v36 = vadd.f32 %v3430_v29, %v3422_v20  ;;  %v3365_v35 = vadd.f32 %v3363_v0, %v3354_v40 }
0x17de   :  { %3434 = vrot.lane.b32.xlu1 %v3432_v36, %s4025_s27  ;;  %3495 = vrot.lane.b32.xlu0 %v3493_v47, %s4025_s27 }
0x17df   :  { %v3446_v1 = vpop.permute.xlu0 %3445 }
0x17e0   :  { %v3448_v51 = vadd.f32 %v3446_v1, %v3441_v39 }
0x17e2   :  { %3450 = vrot.lane.b32.xlu0 %v3448_v51, %s4025_s27  ;;  %3390 = vrot.lane.b32.xlu1 %v3388_v31, %s4025_s27 }
0x17e6   :  { %3465 = vrot.lane.b32.xlu1 %v3463_v4, %s4025_s27 }
0x17ea   :  { %3367 = vrot.lane.b32.xlu1 %v3365_v35, %s4025_s27 }
0x1848   :  { %v3413_v5 = vpop.permute.xlu0 %3412 }
0x1849   :  { %v3416_v53 = vsel %vm3415_vm9, %v3413_v5, 0.0 }
0x184a   :  { %3417 = vadd.xlane.f32.xlu1 %v3416_v53 }
0x184c   :  { %v3481_v32 = vpop.permute.xlu0 %3480 }
0x184d   :  { %v3483_v54 = vsel %vm3415_vm9, %v3481_v32, 0.0 }
0x184e   :  { %3484 = vadd.xlane.f32.xlu1 %v3483_v54 }
0x1850   :  { %v3496_v56 = vpop.permute.xlu0 %3495  ;;  %v3435_v60 = vpop.permute.xlu1 %3434 }
0x1851   :  { %v3498_v57 = vsel %vm3437_vm10, %v3496_v56, 0.0  ;;  %v3438_v9 = vsel %vm3437_vm10, %v3435_v60, 0.0 }
0x1852   :  { %3499 = vadd.xlane.f32.xlu0 %v3498_v57  ;;  %3439 = vadd.xlane.f32.xlu1 %v3438_v9 }
0x1854   :  { %v3451_v58 = vpop.permute.xlu0 %3450  ;;  %v3391_v59 = vpop.permute.xlu1 %3390 }
0x1855   :  { %v3453_v61 = vsel %vm3370_vm11, %v3451_v58, 0.0  ;;  %v3394_v25 = vsel %vm3393_vm12, %v3391_v59, 0.0 }
0x1856   :  { %3454 = vadd.xlane.f32.xlu1 %v3453_v61  ;;  %3395 = vadd.xlane.f32.xlu0 %v3394_v25 }
0x1858   :  { %v3466_v45 = vpop.permute.xlu1 %3465 }
0x1859   :  { %v3468_v26 = vsel %vm3393_vm12, %v3466_v45, 0.0 }
0x185a   :  { %3469 = vadd.xlane.f32.xlu0 %v3468_v26 }
0x185c   :  { %v3368_v22 = vpop.permute.xlu1 %3367 }
0x185d   :  { %v3371_v17 = vsel %vm3370_vm11, %v3368_v22, 0.0 }
0x185e   :  { %3372 = vadd.xlane.f32.xlu0 %v3371_v17 }
0x1867   :  { %3672 = vrot.lane.b32.xlu1 %v3671_v34, %s4022_s19 }
0x186b   :  { %3682 = vrot.lane.b32.xlu1 %v3681_v6, %s4022_s19 }
0x1874   :  { %3677 = vrot.lane.b32.xlu0 %v3676_v13, %s4022_s19 }
0x1878   :  { %3687 = vrot.lane.b32.xlu0 %v3686_v14, %s4022_s19 }
0x18d3   :  { %v3418_v24 = vpop.xlane.xlu1 %3417 }
0x18d7   :  { %v3485_v18 = vpop.xlane.xlu1 %3484 }
0x18db   :  { %v3500_v55 = vpop.xlane.xlu0 %3499  ;;  %v3440_v46 = vpop.xlane.xlu1 %3439 }
0x18dc   :  { %v3514_v2 = vrot.slane %v3500_v55, 2  ;;  %v3506_v7 = vrot.slane %v3440_v46, 2 }
0x18de   :  { %v3516_v41 = vmax.f32 %v3485_v18, %v3514_v2  ;;  %v3508_v48 = vmax.f32 %v3418_v24, %v3506_v7 }
0x18df   :  { %v3396_v62 = vpop.xlane.xlu0 %3395  ;;  %v3455_v44 = vpop.xlane.xlu1 %3454 }
0x18e0   :  { %v3502_v15 = vrot.slane %v3396_v62, 2  ;;  %v3522_v19 = vrot.slane %v3516_v41, 4  ;;  %v3518_v42 = vrot.slane %v3508_v48, 4 }
0x18e3   :  { %v3470_v8 = vpop.xlane.xlu0 %3469 }
0x18e4   :  { %v3510_v10 = vrot.slane %v3470_v8, 2 }
0x18e6   :  { %v3512_v33 = vmax.f32 %v3455_v44, %v3510_v10 }
0x18e7   :  { %v3373_v38 = vpop.xlane.xlu0 %3372 }
0x18e8   :  { %v3504_v30 = vmax.f32 %v3373_v38, %v3502_v15  ;;  %v3524_v20 = vmax.f32 %v3512_v33, %v3522_v19 }
0x18ea   :  { %v3520_v12 = vmax.f32 %v3504_v30, %v3518_v42 }
0x18ec   :  { %v3525_v29 = vmax.f32 %v3520_v12, %v3524_v20 }
0x18ee   :  { %v3530_v47 = vrot.slane %v3525_v29, 6  ;;  %v3535_v36 = vrot.slane %v3525_v29, 4  ;;  %v3540_v50 = vrot.slane %v3525_v29, 2  ;;  %v3526_v43 = vsub.f32 %v3373_v38, %v3525_v29 }
0x18ef   :  { %v3545_v53 = vsub.f32 %v3455_v44, %v3525_v29  ;;  %v3695_v44 = vrot.slane %v5480_v37, 2  ;;  %v3705_v38 = vrot.slane %v5424_v52, 2  ;;  %v3700_v29 = vrot.slane %v5453_v28, 6 }
0x18f0   :  { %v3532_v39 = vsub.f32 %v3396_v62, %v3530_v47  ;;  %v3537_v16 = vsub.f32 %v3418_v24, %v3535_v36  ;;  %v3542_v1 = vsub.f32 %v3440_v46, %v3540_v50  ;;  %v3548_v31 = vsub.f32 %v3470_v8, %v3530_v47  ;;  %v3673_v47 = vpop.permute.xlu1 %3672 }
0x18f1   :  { %v3554_v51 = vsub.f32 %v3500_v55, %v3540_v50  ;;  %v3551_v35 = vsub.f32 %v3485_v18, %v3535_v36  ;;  %v3527_v54 = vmul.f32 1.442695, %v3526_v43  ;;  %v3546_v60 = vmul.f32 1.442695, %v3545_v53 }
0x18f2   :  { %v3533_v4 = vmul.f32 1.442695, %v3532_v39  ;;  %v3543_v0 = vmul.f32 1.442695, %v3542_v1  ;;  %v3549_v40 = vmul.f32 1.442695, %v3548_v31 }
0x18f3   :  { %v3538_v5 = vmul.f32 1.442695, %v3537_v16  ;;  %v3555_v32 = vmul.f32 1.442695, %v3554_v51  ;;  %v3552_v56 = vmul.f32 1.442695, %v3551_v35  ;;  %v3678_v16 = vpop.permute.xlu0 %3677 }
0x18f4   :  { %3915 = vpow2.f32 %v3533_v4  ;;  %v3683_v36 = vpop.permute.xlu1 %3682 }
0x18f5   :  { %3917 = vpow2.f32 %v3543_v0 }
0x18f6   :  { %3919 = vpow2.f32 %v3549_v40 }
0x18f7   :  { %3921 = vpow2.f32 %v3538_v5  ;;  %v3688_v31 = vpop.permute.xlu0 %3687 }
0x18f8   :  { %3923 = vpow2.f32 %v3555_v32 }
0x18f9   :  { %3925 = vpow2.f32 %v3527_v54 }
0x18fa   :  { %3927 = vpow2.f32 %v3552_v56 }
0x18fb   :  { %3929 = vpow2.f32 %v3546_v60 }
0x1901   :  { %v3916_v57 = vpop.eup %3915 }
0x1902   :  { %v3918_v9 = vpop.eup %3917  ;;  %v3558_v25 = vrot.slane %v3916_v57, 2 }
0x1903   :  { %v3920_v58 = vpop.eup %3919  ;;  %v3562_v59 = vrot.slane %v3918_v9, 2 }
0x1904   :  { %v3922_v61 = vpop.eup %3921  ;;  %v3566_v34 = vrot.slane %v3920_v58, 2 }
0x1905   :  { %v3924_v45 = vpop.eup %3923  ;;  %v3564_v26 = vadd.f32 %v3922_v61, %v3562_v59 }
0x1906   :  { %v3926_v22 = vpop.eup %3925  ;;  %v3570_v17 = vrot.slane %v3924_v45, 2 }
0x1907   :  { %v3928_v6 = vpop.eup %3927  ;;  %v3574_v13 = vrot.slane %v3564_v26, 4  ;;  %v3560_v14 = vadd.f32 %v3926_v22, %v3558_v25 }
0x1908   :  { %v3572_v11 = vadd.f32 %v3928_v6, %v3570_v17  ;;  %v3930_v24 = vpop.eup %3929 }
0x1909   :  { %v3576_v18 = vadd.f32 %v3574_v13, %v3560_v14  ;;  %v3568_v46 = vadd.f32 %v3930_v24, %v3566_v34 }
0x190a   :  { %v3578_v55 = vrot.slane %v3572_v11, 4 }
0x190c   :  { %v3580_v62 = vadd.f32 %v3578_v55, %v3568_v46 }
0x190e   :  { %v3581_v2 = vadd.f32 %v3580_v62, %v3576_v18 }
0x1910   :  { %3931 = vrcp.f32 %v3581_v2 }
0x191d   :  { %v3932_v7 = vpop.eup %3931 }
0x191e   :  { %v3594_v8 = vmul.f32 %v3932_v7, %v3930_v24  ;;  %v3583_v41 = vmul.f32 %v3932_v7, %v3926_v22  ;;  %v3585_v48 = vrot.slane %v3932_v7, 6  ;;  %v3588_v15 = vrot.slane %v3932_v7, 4 }
0x191f   :  { %v3591_v19 = vrot.slane %v3932_v7, 2 }
0x1920   :  { %3624 = vperm.xlu1 %3786, %v3594_v8   ;;  %3600 = vperm.xlu0 %3785, %v3583_v41   ;;  %v3587_v10 = vmul.f32 %v3916_v57, %v3585_v48  ;;  %v3590_v33 = vmul.f32 %v3922_v61, %v3588_v15  ;;  %v3595_v30 = vmul.f32 %v3920_v58, %v3585_v48 }
0x1921   :  { %v3593_v42 = vmul.f32 %v3918_v9, %v3591_v19  ;;  %v3596_v20 = vmul.f32 %v3928_v6, %v3588_v15  ;;  %v3597_v12 = vmul.f32 %v3924_v45, %v3591_v19 }
0x1924   :  { %3606 = vperm.xlu1 %3786, %v3587_v10   ;;  %3696 = vrot.lane.b32.xlu0 %v3695_v44, %s4022_s19 }
0x1928   :  { %3612 = vperm.xlu1 %3786, %v3590_v33   ;;  %3706 = vrot.lane.b32.xlu0 %v3705_v38, %s4022_s19 }
0x192c   :  { %3618 = vperm.xlu1 %3786, %v3593_v42  }
0x1930   :  { %3630 = vperm.xlu1 %3786, %v3595_v30  }
0x1934   :  { %3636 = vperm.xlu1 %3786, %v3596_v20  }
0x1938   :  { %3642 = vperm.xlu1 %3786, %v3597_v12  }
0x193c   :  { %3691 = vrot.lane.b32.xlu1 %v2932_v23, %s4022_s19 }
0x1940   :  { %3701 = vrot.lane.b32.xlu1 %v3700_v29, %s4022_s19 }
0x199b   :  { %v3625_v50 = vpop.permute.xlu1 %3624  ;;  %v3601_v43 = vpop.permute.xlu0 %3600 }
0x199c   :  { %v3603_v25 = vmul.f32 %v3601_v43, %v5424_v52  ;;  %v3675_v2 = vmul.f32 %v3673_v47, %v3601_v43 }
0x199f   :  { %v3607_v39 = vpop.permute.xlu1 %3606  ;;  %v3697_v5 = vpop.permute.xlu0 %3696 }
0x19a0   :  { %v3609_v23 = vmul.f32 %v3607_v39, %v5453_v28  ;;  %v3680_v45 = vmul.f32 %v3678_v16, %v3607_v39 }
0x19a2   :  { %v3647_v9 = vrot.slane %v3609_v23, 2  ;;  %v3711_v24 = vrot.slane %v3680_v45, 2 }
0x19a3   :  { %v3613_v1 = vpop.permute.xlu1 %3612  ;;  %v3707_v28 = vpop.permute.xlu0 %3706 }
0x19a4   :  { %v3615_v53 = vmul.f32 %v3613_v1, %v5480_v37  ;;  %v3627_v37 = vmul.f32 %v3625_v50, %v5540_v49  ;;  %v3685_v17 = vmul.f32 %v3683_v36, %v3613_v1  ;;  %v3649_v6 = vadd.f32 %v3647_v9, %v3603_v25 }
0x19a5   :  { %v3713_v48 = vadd.f32 %v3711_v24, %v3675_v2 }
0x19a7   :  { %v3619_v51 = vpop.permute.xlu1 %3618 }
0x19a8   :  { %v3621_v4 = vmul.f32 %v3619_v51, %v5507_v63  ;;  %v3690_v32 = vmul.f32 %v3688_v31, %v3619_v51 }
0x19aa   :  { %v3651_v40 = vrot.slane %v3621_v4, 2  ;;  %v3715_v58 = vrot.slane %v3690_v32, 2 }
0x19ab   :  { %v3631_v0 = vpop.permute.xlu1 %3630 }
0x19ac   :  { %v3633_v54 = vmul.f32 %v3631_v0, %v5566_v27  ;;  %v3653_v56 = vadd.f32 %v3651_v40, %v3615_v53  ;;  %v3717_v13 = vadd.f32 %v3715_v58, %v3685_v17  ;;  %v3699_v14 = vmul.f32 %v3697_v5, %v3631_v0 }
0x19ae   :  { %v3655_v59 = vrot.slane %v3633_v54, 2  ;;  %v3663_v26 = vrot.slane %v3653_v56, 4  ;;  %v3727_v7 = vrot.slane %v3717_v13, 4  ;;  %v3719_v8 = vrot.slane %v3699_v14, 2 }
0x19af   :  { %v3637_v35 = vpop.permute.xlu1 %3636 }
0x19b0   :  { %v3639_v63 = vmul.f32 %v3637_v35, %v5576_v3  ;;  %v3665_v3 = vadd.f32 %v3663_v26, %v3649_v6  ;;  %v3729_v15 = vadd.f32 %v3727_v7, %v3713_v48 }
0x19b3   :  { %v3643_v60 = vpop.permute.xlu1 %3642 }
0x19b4   :  { %v3645_v57 = vmul.f32 %v3643_v60, %v5585_v21  ;;  %v3709_v34 = vmul.f32 %v3707_v28, %v3643_v60  ;;  %v3657_v21 = vadd.f32 %v3655_v59, %v3627_v37 }
0x19b6   :  { %v3659_v61 = vrot.slane %v3645_v57, 2  ;;  %v3723_v55 = vrot.slane %v3709_v34, 2 }
0x19b7   :  { %v3692_v22 = vpop.permute.xlu1 %3691 }
0x19b8   :  { %v3661_v27 = vadd.f32 %v3659_v61, %v3639_v63  ;;  %v3694_v46 = vmul.f32 %v3692_v22, %v3625_v50 }
0x19ba   :  { %v3667_v11 = vrot.slane %v3661_v27, 4  ;;  %v3721_v10 = vadd.f32 %v3719_v8, %v3694_v46 }
0x19bb   :  { %v3702_v18 = vpop.permute.xlu1 %3701 }
0x19bc   :  { %v3704_v52 = vmul.f32 %v3702_v18, %v3637_v35  ;;  %v3669_v62 = vadd.f32 %v3667_v11, %v3657_v21 }
0x19be   :  { %v3725_v41 = vadd.f32 %v3723_v55, %v3704_v52  ;;  %v3670_v49 = vadd.f32 %v3669_v62, %v3665_v3 }
0x19c0   :  { %v3731_v44 = vrot.slane %v3725_v41, 4  ;;  %3736 = vrot.lane.b32.xlu1 %v3670_v49, %s4025_s27 }
0x19c2   :  { %v3733_v33 = vadd.f32 %v3731_v44, %v3721_v10 }
0x19c4   :  { %v3734_v38 = vadd.f32 %v3733_v33, %v3729_v15 }
0x19c6   :  { %3741 = vrot.lane.b32.xlu0 %v3734_v38, %s4022_s19 }
0x1a32   :  { %v3737_v19 = vpop.permute.xlu1 %3736 }
0x1a33   :  { %3739 = vst.msk [vmem:[%s5670_s4] sm:$0x3] %vm3370_vm11, %v3737_v19 }
0x1a38   :  { %v3742_v42 = vpop.permute.xlu0 %3741 }
0x1a39   :  { %3745 = vst.msk [vmem:[%s5670_s4] sm:$0x3] %vm3744_vm13, %v3742_v42 }
0x1a3a   :  { %3750 = vsyncpa [#allocation4], 1 }

</bundles_post_ra>
